<compile_context>
chip_gen: v6e
topology: v6e:2x2x1
jax: 0.10.0
libtpu: 0.0.40
codegen_flags: <defaults>
</compile_context>

<pallas_src>
import functools

import numpy as np
import jax
import jax.numpy as jnp
from jax import lax
from jax.experimental import pallas as pl
from jax.experimental.pallas import tpu as pltpu


# ------------------------------ Pallas kernel -------------------------------

def _patch_embed_kernel(x_ref, w_ref, o_ref, xpf_ref, col_ref, *, H, W, Cin):
    """3x3 'same' conv = one im2col^T build + one MXU matmul, all in VMEM.

    x_ref  : (1, Cin, H, W)        f32   one batch element, NCHW as given
    w_ref  : (Cout, 9*Cpad)        bf16  per-tap weights, taps ordered ky*3+kx
    o_ref  : (1, Cout, Hp*Wp)      f32   padded-flat output rows (NCHW-major)
    xpf_ref: (Cpad, Np + 2*G)      f32   flattened zero-padded image + guards
    col_ref: (9*Cpad, Np)          bf16  im2col^T (tap-major row blocks)
    """
    Wp = W + 2
    Np = (H + 2) * Wp                       # padded-flat spatial length
    G = Wp + 1                              # guard = max |tap shift|
    Cpad = xpf_ref.shape[0]

    # (1) zero the flattened padded-image scratch (padding + guard columns).
    xpf_ref[...] = jnp.zeros_like(xpf_ref)

    # (2) drop the H real image rows into their padded-flat slots.
    #     Row h of the image starts at flat position G + (h+1)*Wp + 1.
    for h in range(H):
        start = G + (h + 1) * Wp + 1
        xpf_ref[:Cin, start:start + W] = x_ref[0, :, h, :]

    # (3) im2col^T: each 3x3 tap is a *uniform* shift of the padded-flat image,
    #     so every tap block is one static 2-D slice copy (cast to bf16 here).
    for ky in range(3):
        for kx in range(3):
            t = ky * 3 + kx
            s = (ky - 1) * Wp + (kx - 1)
            col_ref[t * Cpad:(t + 1) * Cpad, :] = (
                xpf_ref[:, G + s:G + s + Np].astype(col_ref.dtype))

    # (4) single MXU matmul (K = 9*Cpad), f32 accumulation, lane-dense store.
    o_ref[0] = jnp.dot(w_ref[...], col_ref[...],
                       preferred_element_type=jnp.float32).astype(o_ref.dtype)


# --------------------------------- wrapper ----------------------------------

def overlap_patch_embed(x_nchw, w3d, bias=None):
    """Equivalent of OverlapPatchEmbed.forward (Conv3d on unsqueezed depth)."""
    B, Cin, H, W = x_nchw.shape
    Cout = w3d.shape[0]

    Hp, Wp = H + 2, W + 2
    Np = Hp * Wp                         # padded-flat spatial length (matmul N)
    G = Wp + 1                           # guard columns on each side of xpf
    Lx = Np + 2 * G                      # flattened padded-image scratch length
    Cpad = ((Cin + 15) // 16) * 16       # sublane-aligned per-tap channel block

    # Only the centre depth slice of the 3x3x3 kernel touches real data.
    w2d = w3d[:, :, 1]                                   # (Cout, Cin, 3, 3)
    wtaps = jnp.transpose(w2d, (0, 2, 3, 1))             # (Cout, 3, 3, Cin)
    wtaps = jnp.pad(wtaps, ((0, 0), (0, 0), (0, 0), (0, Cpad - Cin)))
    wmat = wtaps.reshape(Cout, 9 * Cpad).astype(jnp.bfloat16)

    kernel = functools.partial(_patch_embed_kernel, H=H, W=W, Cin=Cin)

    out = pl.pallas_call(
        kernel,
        out_shape=jax.ShapeDtypeStruct((B, Cout, Np), x_nchw.dtype),
        grid=(B,),
        in_specs=[
            pl.BlockSpec((1, Cin, H, W), lambda b: (b, 0, 0, 0)),   # activations
            pl.BlockSpec((Cout, 9 * Cpad), lambda b: (0, 0)),       # weights (resident)
        ],
        out_specs=pl.BlockSpec((1, Cout, Np), lambda b: (b, 0, 0)),
        scratch_shapes=[
            pltpu.VMEM((Cpad, Lx), jnp.float32),       # flattened padded image
            pltpu.VMEM((9 * Cpad, Np), jnp.bfloat16),  # im2col^T
        ],
        compiler_params=pltpu.CompilerParams(
            dimension_semantics=("parallel",)),
    )(x_nchw, wmat)

    # Free reshape + cheap interior slice back to NCHW; no transpose, no pad.
    out = out.reshape(B, Cout, Hp, Wp)[:, :, 1:H + 1, 1:W + 1]
    if bias is not None:                 # module default is bias=False
        out = out + bias.reshape(1, Cout, 1, 1).astype(out.dtype)
    return out


# ----------------------------------- main ------------------------------------

if __name__ == "__main__":
    # OverlapPatchEmbed(in_c=31, embed_dim=48, bias=False)
    in_c, embed_dim = 31, 48
    b, h, w = 2, 16, 16

    key = jax.random.PRNGKey(0)
    k1, k2 = jax.random.split(key)
    x = jax.random.normal(k1, (b, in_c, h, w), jnp.float32)
    w3d = 0.05 * jax.random.normal(k2, (embed_dim, in_c, 3, 3, 3), jnp.float32)

    fwd = jax.jit(lambda xx: overlap_patch_embed(xx, w3d))
    y = fwd(x)
    jax.block_until_ready(y)
    assert y.shape == (b, embed_dim, h, w)
    assert bool(jnp.all(jnp.isfinite(y)))

    # Pure-JAX reference: the exact 3-D conv the PyTorch module performs.
    x5 = x[:, :, None, :, :]                             # (B, Cin, 1, H, W)
    ref = lax.conv_general_dilated(
        x5, w3d, window_strides=(1, 1, 1),
        padding=((1, 1), (1, 1), (1, 1)),
        dimension_numbers=("NCDHW", "OIDHW", "NCDHW"),
        precision=lax.Precision.HIGHEST)[:, :, 0]
    # Kernel feeds the MXU bf16 inputs (f32 accumulation); tolerance widened
    # accordingly vs. the f32-HIGHEST reference.
    np.testing.assert_allclose(np.asarray(y), np.asarray(ref),
                               rtol=2e-2, atol=2e-2)

    print("KERNEL_OK")
</pallas_src>

<mosaic_0001>
module attributes {stable_mosaic.version = 11 : i64} {
  func.func @_patch_embed_kernel(%arg0: i32, %arg1: memref<1x31x16x16xf32, #tpu.memory_space<vmem>>, %arg2: memref<48x288xbf16, #tpu.memory_space<vmem>>, %arg3: memref<1x48x324xf32, #tpu.memory_space<vmem>>, %arg4: memref<32x362xf32, #tpu.memory_space<vmem>>, %arg5: memref<288x324xbf16, #tpu.memory_space<vmem>>) attributes {dimension_semantics = [#tpu.dimension_semantics<parallel>], iteration_bounds = array<i64: 2>, scalar_prefetch = 0 : i64, scratch_operands = 2 : i64, tpu.core_type = #tpu.core_type<tc>, window_params = [{transform_indices = @transform_0, window_bounds = array<i64: 1, 31, 16, 16>}, {pipeline_mode = #tpu.pipeline_mode<synchronous>, transform_indices = @transform_1, window_bounds = array<i64: 48, 288>}, {transform_indices = @transform_2, window_bounds = array<i64: 1, 48, 324>}]} {
    %cst = arith.constant 0.000000e+00 : f32
    %0 = vector.broadcast %cst : f32 to vector<32x362xf32>
    %c0 = arith.constant 0 : index
    %c0_0 = arith.constant 0 : index
    %1 = vector.load %arg4[%c0, %c0_0] : memref<32x362xf32, #tpu.memory_space<vmem>>, vector<32x362xf32>
    tpu.vector_store %arg4[%c0, %c0_0], %0 {strides = array<i32>} : memref<32x362xf32, #tpu.memory_space<vmem>>, vector<32x362xf32>,
    %c0_1 = arith.constant 0 : index
    %c0_2 = arith.constant 0 : index
    %c0_3 = arith.constant 0 : index
    %c0_4 = arith.constant 0 : index
    %2 = vector.load %arg1[%c0_1, %c0_2, %c0_3, %c0_4] : memref<1x31x16x16xf32, #tpu.memory_space<vmem>>, vector<1x31x1x16xf32>
    %3 = vector.shape_cast %2 : vector<1x31x1x16xf32> to vector<31x16xf32>
    %c0_5 = arith.constant 0 : index
    %c38 = arith.constant 38 : index
    %4 = vector.load %arg4[%c0_5, %c38] : memref<32x362xf32, #tpu.memory_space<vmem>>, vector<31x16xf32>
    tpu.vector_store %arg4[%c0_5, %c38], %3 {strides = array<i32>} : memref<32x362xf32, #tpu.memory_space<vmem>>, vector<31x16xf32>,
    %c0_6 = arith.constant 0 : index
    %c0_7 = arith.constant 0 : index
    %c1 = arith.constant 1 : index
    %c0_8 = arith.constant 0 : index
    %5 = vector.load %arg1[%c0_6, %c0_7, %c1, %c0_8] : memref<1x31x16x16xf32, #tpu.memory_space<vmem>>, vector<1x31x1x16xf32>
    %6 = vector.shape_cast %5 : vector<1x31x1x16xf32> to vector<31x16xf32>
    %c0_9 = arith.constant 0 : index
    %c56 = arith.constant 56 : index
    %7 = vector.load %arg4[%c0_9, %c56] : memref<32x362xf32, #tpu.memory_space<vmem>>, vector<31x16xf32>
    tpu.vector_store %arg4[%c0_9, %c56], %6 {strides = array<i32>} : memref<32x362xf32, #tpu.memory_space<vmem>>, vector<31x16xf32>,
    %c0_10 = arith.constant 0 : index
    %c0_11 = arith.constant 0 : index
    %c2 = arith.constant 2 : index
    %c0_12 = arith.constant 0 : index
    %8 = vector.load %arg1[%c0_10, %c0_11, %c2, %c0_12] : memref<1x31x16x16xf32, #tpu.memory_space<vmem>>, vector<1x31x1x16xf32>
    %9 = vector.shape_cast %8 : vector<1x31x1x16xf32> to vector<31x16xf32>
    %c0_13 = arith.constant 0 : index
    %c74 = arith.constant 74 : index
    %10 = vector.load %arg4[%c0_13, %c74] : memref<32x362xf32, #tpu.memory_space<vmem>>, vector<31x16xf32>
    tpu.vector_store %arg4[%c0_13, %c74], %9 {strides = array<i32>} : memref<32x362xf32, #tpu.memory_space<vmem>>, vector<31x16xf32>,
    %c0_14 = arith.constant 0 : index
    %c0_15 = arith.constant 0 : index
    %c3 = arith.constant 3 : index
    %c0_16 = arith.constant 0 : index
    %11 = vector.load %arg1[%c0_14, %c0_15, %c3, %c0_16] : memref<1x31x16x16xf32, #tpu.memory_space<vmem>>, vector<1x31x1x16xf32>
    %12 = vector.shape_cast %11 : vector<1x31x1x16xf32> to vector<31x16xf32>
    %c0_17 = arith.constant 0 : index
    %c92 = arith.constant 92 : index
    %13 = vector.load %arg4[%c0_17, %c92] : memref<32x362xf32, #tpu.memory_space<vmem>>, vector<31x16xf32>
    tpu.vector_store %arg4[%c0_17, %c92], %12 {strides = array<i32>} : memref<32x362xf32, #tpu.memory_space<vmem>>, vector<31x16xf32>,
    %c0_18 = arith.constant 0 : index
    %c0_19 = arith.constant 0 : index
    %c4 = arith.constant 4 : index
    %c0_20 = arith.constant 0 : index
    %14 = vector.load %arg1[%c0_18, %c0_19, %c4, %c0_20] : memref<1x31x16x16xf32, #tpu.memory_space<vmem>>, vector<1x31x1x16xf32>
    %15 = vector.shape_cast %14 : vector<1x31x1x16xf32> to vector<31x16xf32>
    %c0_21 = arith.constant 0 : index
    %c110 = arith.constant 110 : index
    %16 = vector.load %arg4[%c0_21, %c110] : memref<32x362xf32, #tpu.memory_space<vmem>>, vector<31x16xf32>
    tpu.vector_store %arg4[%c0_21, %c110], %15 {strides = array<i32>} : memref<32x362xf32, #tpu.memory_space<vmem>>, vector<31x16xf32>,
    %c0_22 = arith.constant 0 : index
    %c0_23 = arith.constant 0 : index
    %c5 = arith.constant 5 : index
    %c0_24 = arith.constant 0 : index
    %17 = vector.load %arg1[%c0_22, %c0_23, %c5, %c0_24] : memref<1x31x16x16xf32, #tpu.memory_space<vmem>>, vector<1x31x1x16xf32>
    %18 = vector.shape_cast %17 : vector<1x31x1x16xf32> to vector<31x16xf32>
    %c0_25 = arith.constant 0 : index
    %c128 = arith.constant 128 : index
    %19 = vector.load %arg4[%c0_25, %c128] : memref<32x362xf32, #tpu.memory_space<vmem>>, vector<31x16xf32>
    tpu.vector_store %arg4[%c0_25, %c128], %18 {strides = array<i32>} : memref<32x362xf32, #tpu.memory_space<vmem>>, vector<31x16xf32>,
    %c0_26 = arith.constant 0 : index
    %c0_27 = arith.constant 0 : index
    %c6 = arith.constant 6 : index
    %c0_28 = arith.constant 0 : index
    %20 = vector.load %arg1[%c0_26, %c0_27, %c6, %c0_28] : memref<1x31x16x16xf32, #tpu.memory_space<vmem>>, vector<1x31x1x16xf32>
    %21 = vector.shape_cast %20 : vector<1x31x1x16xf32> to vector<31x16xf32>
    %c0_29 = arith.constant 0 : index
    %c146 = arith.constant 146 : index
    %22 = vector.load %arg4[%c0_29, %c146] : memref<32x362xf32, #tpu.memory_space<vmem>>, vector<31x16xf32>
    tpu.vector_store %arg4[%c0_29, %c146], %21 {strides = array<i32>} : memref<32x362xf32, #tpu.memory_space<vmem>>, vector<31x16xf32>,
    %c0_30 = arith.constant 0 : index
    %c0_31 = arith.constant 0 : index
    %c7 = arith.constant 7 : index
    %c0_32 = arith.constant 0 : index
    %23 = vector.load %arg1[%c0_30, %c0_31, %c7, %c0_32] : memref<1x31x16x16xf32, #tpu.memory_space<vmem>>, vector<1x31x1x16xf32>
    %24 = vector.shape_cast %23 : vector<1x31x1x16xf32> to vector<31x16xf32>
    %c0_33 = arith.constant 0 : index
    %c164 = arith.constant 164 : index
    %25 = vector.load %arg4[%c0_33, %c164] : memref<32x362xf32, #tpu.memory_space<vmem>>, vector<31x16xf32>
    tpu.vector_store %arg4[%c0_33, %c164], %24 {strides = array<i32>} : memref<32x362xf32, #tpu.memory_space<vmem>>, vector<31x16xf32>,
    %c0_34 = arith.constant 0 : index
    %c0_35 = arith.constant 0 : index
    %c8 = arith.constant 8 : index
    %c0_36 = arith.constant 0 : index
    %26 = vector.load %arg1[%c0_34, %c0_35, %c8, %c0_36] : memref<1x31x16x16xf32, #tpu.memory_space<vmem>>, vector<1x31x1x16xf32>
    %27 = vector.shape_cast %26 : vector<1x31x1x16xf32> to vector<31x16xf32>
    %c0_37 = arith.constant 0 : index
    %c182 = arith.constant 182 : index
    %28 = vector.load %arg4[%c0_37, %c182] : memref<32x362xf32, #tpu.memory_space<vmem>>, vector<31x16xf32>
    tpu.vector_store %arg4[%c0_37, %c182], %27 {strides = array<i32>} : memref<32x362xf32, #tpu.memory_space<vmem>>, vector<31x16xf32>,
    %c0_38 = arith.constant 0 : index
    %c0_39 = arith.constant 0 : index
    %c9 = arith.constant 9 : index
    %c0_40 = arith.constant 0 : index
    %29 = vector.load %arg1[%c0_38, %c0_39, %c9, %c0_40] : memref<1x31x16x16xf32, #tpu.memory_space<vmem>>, vector<1x31x1x16xf32>
    %30 = vector.shape_cast %29 : vector<1x31x1x16xf32> to vector<31x16xf32>
    %c0_41 = arith.constant 0 : index
    %c200 = arith.constant 200 : index
    %31 = vector.load %arg4[%c0_41, %c200] : memref<32x362xf32, #tpu.memory_space<vmem>>, vector<31x16xf32>
    tpu.vector_store %arg4[%c0_41, %c200], %30 {strides = array<i32>} : memref<32x362xf32, #tpu.memory_space<vmem>>, vector<31x16xf32>,
    %c0_42 = arith.constant 0 : index
    %c0_43 = arith.constant 0 : index
    %c10 = arith.constant 10 : index
    %c0_44 = arith.constant 0 : index
    %32 = vector.load %arg1[%c0_42, %c0_43, %c10, %c0_44] : memref<1x31x16x16xf32, #tpu.memory_space<vmem>>, vector<1x31x1x16xf32>
    %33 = vector.shape_cast %32 : vector<1x31x1x16xf32> to vector<31x16xf32>
    %c0_45 = arith.constant 0 : index
    %c218 = arith.constant 218 : index
    %34 = vector.load %arg4[%c0_45, %c218] : memref<32x362xf32, #tpu.memory_space<vmem>>, vector<31x16xf32>
    tpu.vector_store %arg4[%c0_45, %c218], %33 {strides = array<i32>} : memref<32x362xf32, #tpu.memory_space<vmem>>, vector<31x16xf32>,
    %c0_46 = arith.constant 0 : index
    %c0_47 = arith.constant 0 : index
    %c11 = arith.constant 11 : index
    %c0_48 = arith.constant 0 : index
    %35 = vector.load %arg1[%c0_46, %c0_47, %c11, %c0_48] : memref<1x31x16x16xf32, #tpu.memory_space<vmem>>, vector<1x31x1x16xf32>
    %36 = vector.shape_cast %35 : vector<1x31x1x16xf32> to vector<31x16xf32>
    %c0_49 = arith.constant 0 : index
    %c236 = arith.constant 236 : index
    %37 = vector.load %arg4[%c0_49, %c236] : memref<32x362xf32, #tpu.memory_space<vmem>>, vector<31x16xf32>
    tpu.vector_store %arg4[%c0_49, %c236], %36 {strides = array<i32>} : memref<32x362xf32, #tpu.memory_space<vmem>>, vector<31x16xf32>,
    %c0_50 = arith.constant 0 : index
    %c0_51 = arith.constant 0 : index
    %c12 = arith.constant 12 : index
    %c0_52 = arith.constant 0 : index
    %38 = vector.load %arg1[%c0_50, %c0_51, %c12, %c0_52] : memref<1x31x16x16xf32, #tpu.memory_space<vmem>>, vector<1x31x1x16xf32>
    %39 = vector.shape_cast %38 : vector<1x31x1x16xf32> to vector<31x16xf32>
    %c0_53 = arith.constant 0 : index
    %c254 = arith.constant 254 : index
    %40 = vector.load %arg4[%c0_53, %c254] : memref<32x362xf32, #tpu.memory_space<vmem>>, vector<31x16xf32>
    tpu.vector_store %arg4[%c0_53, %c254], %39 {strides = array<i32>} : memref<32x362xf32, #tpu.memory_space<vmem>>, vector<31x16xf32>,
    %c0_54 = arith.constant 0 : index
    %c0_55 = arith.constant 0 : index
    %c13 = arith.constant 13 : index
    %c0_56 = arith.constant 0 : index
    %41 = vector.load %arg1[%c0_54, %c0_55, %c13, %c0_56] : memref<1x31x16x16xf32, #tpu.memory_space<vmem>>, vector<1x31x1x16xf32>
    %42 = vector.shape_cast %41 : vector<1x31x1x16xf32> to vector<31x16xf32>
    %c0_57 = arith.constant 0 : index
    %c272 = arith.constant 272 : index
    %43 = vector.load %arg4[%c0_57, %c272] : memref<32x362xf32, #tpu.memory_space<vmem>>, vector<31x16xf32>
    tpu.vector_store %arg4[%c0_57, %c272], %42 {strides = array<i32>} : memref<32x362xf32, #tpu.memory_space<vmem>>, vector<31x16xf32>,
    %c0_58 = arith.constant 0 : index
    %c0_59 = arith.constant 0 : index
    %c14 = arith.constant 14 : index
    %c0_60 = arith.constant 0 : index
    %44 = vector.load %arg1[%c0_58, %c0_59, %c14, %c0_60] : memref<1x31x16x16xf32, #tpu.memory_space<vmem>>, vector<1x31x1x16xf32>
    %45 = vector.shape_cast %44 : vector<1x31x1x16xf32> to vector<31x16xf32>
    %c0_61 = arith.constant 0 : index
    %c290 = arith.constant 290 : index
    %46 = vector.load %arg4[%c0_61, %c290] : memref<32x362xf32, #tpu.memory_space<vmem>>, vector<31x16xf32>
    tpu.vector_store %arg4[%c0_61, %c290], %45 {strides = array<i32>} : memref<32x362xf32, #tpu.memory_space<vmem>>, vector<31x16xf32>,
    %c0_62 = arith.constant 0 : index
    %c0_63 = arith.constant 0 : index
    %c15 = arith.constant 15 : index
    %c0_64 = arith.constant 0 : index
    %47 = vector.load %arg1[%c0_62, %c0_63, %c15, %c0_64] : memref<1x31x16x16xf32, #tpu.memory_space<vmem>>, vector<1x31x1x16xf32>
    %48 = vector.shape_cast %47 : vector<1x31x1x16xf32> to vector<31x16xf32>
    %c0_65 = arith.constant 0 : index
    %c308 = arith.constant 308 : index
    %49 = vector.load %arg4[%c0_65, %c308] : memref<32x362xf32, #tpu.memory_space<vmem>>, vector<31x16xf32>
    tpu.vector_store %arg4[%c0_65, %c308], %48 {strides = array<i32>} : memref<32x362xf32, #tpu.memory_space<vmem>>, vector<31x16xf32>,
    %c0_66 = arith.constant 0 : index
    %c0_67 = arith.constant 0 : index
    %50 = vector.load %arg4[%c0_66, %c0_67] : memref<32x362xf32, #tpu.memory_space<vmem>>, vector<32x324xf32>
    %51 = arith.truncf %50 : vector<32x324xf32> to vector<32x324xbf16>
    %c0_68 = arith.constant 0 : index
    %c0_69 = arith.constant 0 : index
    %52 = vector.load %arg5[%c0_68, %c0_69] : memref<288x324xbf16, #tpu.memory_space<vmem>>, vector<32x324xbf16>
    tpu.vector_store %arg5[%c0_68, %c0_69], %51 {strides = array<i32>} : memref<288x324xbf16, #tpu.memory_space<vmem>>, vector<32x324xbf16>,
    %c0_70 = arith.constant 0 : index
    %c1_71 = arith.constant 1 : index
    %53 = vector.load %arg4[%c0_70, %c1_71] : memref<32x362xf32, #tpu.memory_space<vmem>>, vector<32x324xf32>
    %54 = arith.truncf %53 : vector<32x324xf32> to vector<32x324xbf16>
    %c32 = arith.constant 32 : index
    %c0_72 = arith.constant 0 : index
    %55 = vector.load %arg5[%c32, %c0_72] : memref<288x324xbf16, #tpu.memory_space<vmem>>, vector<32x324xbf16>
    tpu.vector_store %arg5[%c32, %c0_72], %54 {strides = array<i32>} : memref<288x324xbf16, #tpu.memory_space<vmem>>, vector<32x324xbf16>,
    %c0_73 = arith.constant 0 : index
    %c2_74 = arith.constant 2 : index
    %56 = vector.load %arg4[%c0_73, %c2_74] : memref<32x362xf32, #tpu.memory_space<vmem>>, vector<32x324xf32>
    %57 = arith.truncf %56 : vector<32x324xf32> to vector<32x324xbf16>
    %c64 = arith.constant 64 : index
    %c0_75 = arith.constant 0 : index
    %58 = vector.load %arg5[%c64, %c0_75] : memref<288x324xbf16, #tpu.memory_space<vmem>>, vector<32x324xbf16>
    tpu.vector_store %arg5[%c64, %c0_75], %57 {strides = array<i32>} : memref<288x324xbf16, #tpu.memory_space<vmem>>, vector<32x324xbf16>,
    %c0_76 = arith.constant 0 : index
    %c18 = arith.constant 18 : index
    %59 = vector.load %arg4[%c0_76, %c18] : memref<32x362xf32, #tpu.memory_space<vmem>>, vector<32x324xf32>
    %60 = arith.truncf %59 : vector<32x324xf32> to vector<32x324xbf16>
    %c96 = arith.constant 96 : index
    %c0_77 = arith.constant 0 : index
    %61 = vector.load %arg5[%c96, %c0_77] : memref<288x324xbf16, #tpu.memory_space<vmem>>, vector<32x324xbf16>
    tpu.vector_store %arg5[%c96, %c0_77], %60 {strides = array<i32>} : memref<288x324xbf16, #tpu.memory_space<vmem>>, vector<32x324xbf16>,
    %c0_78 = arith.constant 0 : index
    %c19 = arith.constant 19 : index
    %62 = vector.load %arg4[%c0_78, %c19] : memref<32x362xf32, #tpu.memory_space<vmem>>, vector<32x324xf32>
    %63 = arith.truncf %62 : vector<32x324xf32> to vector<32x324xbf16>
    %c128_79 = arith.constant 128 : index
    %c0_80 = arith.constant 0 : index
    %64 = vector.load %arg5[%c128_79, %c0_80] : memref<288x324xbf16, #tpu.memory_space<vmem>>, vector<32x324xbf16>
    tpu.vector_store %arg5[%c128_79, %c0_80], %63 {strides = array<i32>} : memref<288x324xbf16, #tpu.memory_space<vmem>>, vector<32x324xbf16>,
    %c0_81 = arith.constant 0 : index
    %c20 = arith.constant 20 : index
    %65 = vector.load %arg4[%c0_81, %c20] : memref<32x362xf32, #tpu.memory_space<vmem>>, vector<32x324xf32>
    %66 = arith.truncf %65 : vector<32x324xf32> to vector<32x324xbf16>
    %c160 = arith.constant 160 : index
    %c0_82 = arith.constant 0 : index
    %67 = vector.load %arg5[%c160, %c0_82] : memref<288x324xbf16, #tpu.memory_space<vmem>>, vector<32x324xbf16>
    tpu.vector_store %arg5[%c160, %c0_82], %66 {strides = array<i32>} : memref<288x324xbf16, #tpu.memory_space<vmem>>, vector<32x324xbf16>,
    %c0_83 = arith.constant 0 : index
    %c36 = arith.constant 36 : index
    %68 = vector.load %arg4[%c0_83, %c36] : memref<32x362xf32, #tpu.memory_space<vmem>>, vector<32x324xf32>
    %69 = arith.truncf %68 : vector<32x324xf32> to vector<32x324xbf16>
    %c192 = arith.constant 192 : index
    %c0_84 = arith.constant 0 : index
    %70 = vector.load %arg5[%c192, %c0_84] : memref<288x324xbf16, #tpu.memory_space<vmem>>, vector<32x324xbf16>
    tpu.vector_store %arg5[%c192, %c0_84], %69 {strides = array<i32>} : memref<288x324xbf16, #tpu.memory_space<vmem>>, vector<32x324xbf16>,
    %c0_85 = arith.constant 0 : index
    %c37 = arith.constant 37 : index
    %71 = vector.load %arg4[%c0_85, %c37] : memref<32x362xf32, #tpu.memory_space<vmem>>, vector<32x324xf32>
    %72 = arith.truncf %71 : vector<32x324xf32> to vector<32x324xbf16>
    %c224 = arith.constant 224 : index
    %c0_86 = arith.constant 0 : index
    %73 = vector.load %arg5[%c224, %c0_86] : memref<288x324xbf16, #tpu.memory_space<vmem>>, vector<32x324xbf16>
    tpu.vector_store %arg5[%c224, %c0_86], %72 {strides = array<i32>} : memref<288x324xbf16, #tpu.memory_space<vmem>>, vector<32x324xbf16>,
    %c0_87 = arith.constant 0 : index
    %c38_88 = arith.constant 38 : index
    %74 = vector.load %arg4[%c0_87, %c38_88] : memref<32x362xf32, #tpu.memory_space<vmem>>, vector<32x324xf32>
    %75 = arith.truncf %74 : vector<32x324xf32> to vector<32x324xbf16>
    %c256 = arith.constant 256 : index
    %c0_89 = arith.constant 0 : index
    %76 = vector.load %arg5[%c256, %c0_89] : memref<288x324xbf16, #tpu.memory_space<vmem>>, vector<32x324xbf16>
    tpu.vector_store %arg5[%c256, %c0_89], %75 {strides = array<i32>} : memref<288x324xbf16, #tpu.memory_space<vmem>>, vector<32x324xbf16>,
    %c0_90 = arith.constant 0 : index
    %c0_91 = arith.constant 0 : index
    %77 = vector.load %arg2[%c0_90, %c0_91] : memref<48x288xbf16, #tpu.memory_space<vmem>>, vector<48x288xbf16>
    %c0_92 = arith.constant 0 : index
    %c0_93 = arith.constant 0 : index
    %78 = vector.load %arg5[%c0_92, %c0_93] : memref<288x324xbf16, #tpu.memory_space<vmem>>, vector<288x324xbf16>
    %cst_94 = arith.constant dense<0.000000e+00> : vector<48x324xf32>
    %79 = tpu.matmul %77, %78, %cst_94 {dimension_numbers = #tpu.dot_dimension_numbers<[1], [0], [0], [1], [0, 0, 1, 1], [], []>} : vector<48x288xbf16>, vector<288x324xbf16>, vector<48x324xf32> -> vector<48x324xf32>
    %c0_95 = arith.constant 0 : index
    %c0_96 = arith.constant 0 : index
    %c0_97 = arith.constant 0 : index
    %80 = vector.load %arg3[%c0_95, %c0_96, %c0_97] : memref<1x48x324xf32, #tpu.memory_space<vmem>>, vector<1x48x324xf32>
    %81 = vector.shape_cast %80 : vector<1x48x324xf32> to vector<48x324xf32>
    %82 = vector.shape_cast %79 : vector<48x324xf32> to vector<1x48x324xf32>
    tpu.vector_store %arg3[%c0_95, %c0_96, %c0_97], %82 {strides = array<i32>} : memref<1x48x324xf32, #tpu.memory_space<vmem>>, vector<1x48x324xf32>,
    return
  }
  func.func @transform_0(%arg0: i32) -> (i32, i32, i32, i32) {
    %c0_i32 = arith.constant 0 : i32
    %c0_i32_0 = arith.constant 0 : i32
    %c0_i32_1 = arith.constant 0 : i32
    %c0_i32_2 = arith.constant 0 : i32
    return %arg0, %c0_i32, %c0_i32_0, %c0_i32_1 : i32, i32, i32, i32
  }
  func.func @transform_1(%arg0: i32) -> (i32, i32) {
    %c0_i32 = arith.constant 0 : i32
    %c0_i32_0 = arith.constant 0 : i32
    %c0_i32_1 = arith.constant 0 : i32
    return %c0_i32, %c0_i32_0 : i32, i32
  }
  func.func @transform_2(%arg0: i32) -> (i32, i32, i32) {
    %c0_i32 = arith.constant 0 : i32
    %c0_i32_0 = arith.constant 0 : i32
    %c0_i32_1 = arith.constant 0 : i32
    return %arg0, %c0_i32, %c0_i32_0 : i32, i32, i32
  }
}

</mosaic_0001>

<bundles_post_ra>
// kernel: _lambda_.1
= control target key start
LH: loop header
LB: loop body
LE: loop exit
PB: predicated region body
PF: predicated region fallthrough
CT: control target
= control target key end

     0   :  { %s4241_s9 = smov 0   ;;  %s5836_s0 = inlined_call_operand.vmem [shape: f32[2,31,16,16], index: 0, kind: input, shape index: {}]   ;;  %s5837_s1 = inlined_call_operand.vmem [shape: bf16[48,288], index: 1, kind: input, shape index: {}]   ;;  %s5838_s2 = inlined_call_operand.vmem [shape: f32[2,48,324], index: 2, kind: output, shape index: {}]  }
   0x1 LB: > { %s3854_s10 = sadd.s32 4294967295, %s4203_s9   ;;  %p3858_p0 = scmp.ge.s32.totalorder %s4203_s9, 1  ;;  %s4203_s9 = sphi %s4241_s9, %s12_s9  }
   0x2   : > { %p112_p1 = scmp.lt.s32.totalorder %s4203_s9, 3 }
   0x4   : > { %p113_p2 = pnand %p3858_p0, %p112_p1 }
   0x5   : > { %p134_p3 = scmp.lt.s32.totalorder (!%p113_p2), %s3854_s10, 1  ;;  %s4205_s15 = smov (!%p113_p2), 36  }
   0x6   : > { %116 = sbr.rel (%p113_p2) target bundleno = 839 (0x347), region = 28  ;;  %s4206_s16 = smov (!%p113_p2), 18  }
   0x7   : > { %s4207_s17 = smov (!%p113_p2), 38   ;;  %s4208_s18 = smov (!%p113_p2), 54  }
   0x8   : > { %s4209_s19 = smov (!%p113_p2), 56   ;;  %s4210_s20 = smov (!%p113_p2), 72  }
   0x9   : > { %s4211_s21 = smov (!%p113_p2), 126   ;;  %s4212_s22 = smov (!%p113_p2), 74  }
   0xa   : > { %s4213_s23 = smov (!%p113_p2), 90   ;;  %s4214_s24 = smov (!%p113_p2), 16  }
   0xb   : > { %s5854_s10 = smov (!%p134_p3, %s3854_s10), 1  ;;  %vm221_vm0 = vcmask 1041409   ;;  %vm224_vm1 = vcmask 1042434   ;;  %vm227_vm2 = vcmask 1043459   ;;  %vm5840_vm3 = vcmask 1044484   ;;  %s4215_s25 = smov 92  }
   0xc   : > { %s4131_s11 = smul.u32 496, %s5854_s10  ;;  %vm5839_vm4 = vcmask 1045509   ;;  %vm236_vm5 = vcmask 1046534   ;;  %vm239_vm6 = vcmask 1047559   ;;  %s4216_s26 = smov 108   ;;  %vm959_vm7 = vcmask 129024  }
   0xd   : > { %s4217_s27 = smov 34   ;;  %s4219_s28 = smov 110   ;;  %vm1093_vm8 = vcmask 276624   ;;  %vm955_vm9 = vcmask 130048   ;;  %vm1089_vm10 = vcmask 277648   ;;  %vm297_vm11 = vcmask 440624  }
   0xe   : > { %s4255_s14 = scalar_lea.vmem %s5836_s0, %s4131_s11  ;;  %s4220_s29 = smov 52   ;;  %vm1227_vm12 = vcmask 424224   ;;  %vm1361_vm13 = vcmask 571824   ;;  %vm293_vm14 = vcmask 441648   ;;  %vm431_vm15 = vcmask 588224  }
   0xf   : > { %v1119_v0 = vld [vmem:[%s4255_s14 + $0x187] sm:$0x1]  ;;  %v1120_v1 = vld [vmem:[%s4255_s14 + $0x197] sm:$0x1]  ;;  %v985_v13 = vld [vmem:[%s4255_s14 + $0x186] sm:$0x1] }
  0x10   : > { %v1121_v2 = vld [vmem:[%s4255_s14 + $0x1a7] sm:$0x1]  ;;  %v1122_v3 = vld [vmem:[%s4255_s14 + $0x1b7] sm:$0x1]  ;;  %v1199_v7 = vrot.slane %v1120_v1, 7  ;;  %s4221_s30 = smov 91  }
  0x11   : > { %v1123_v4 = vld [vmem:[%s4255_s14 + $0x1c7] sm:$0x1]  ;;  %v1124_v5 = vld [vmem:[%s4255_s14 + $0x1d7] sm:$0x1]  ;;  %v1201_v8 = vrot.slane %v1121_v2, 6  ;;  %v1203_v9 = vrot.slane %v1122_v3, 5 }
  0x12   : > { %v1125_v6 = vld [vmem:[%s4255_s14 + $0x1e7] sm:$0x1]  ;;  %v1205_v10 = vrot.slane %v1123_v4, 4  ;;  %v1207_v11 = vrot.slane %v1124_v5, 3  ;;  %v986_v14 = vld [vmem:[%s4255_s14 + $0x196] sm:$0x1]  ;;  %v1200_v15 = vsel %vm221_vm0, %v1199_v7, %v1119_v0 }
  0x13   : > { %v1209_v12 = vrot.slane %v1125_v6, 2  ;;  %v987_v16 = vld [vmem:[%s4255_s14 + $0x1a6] sm:$0x1]  ;;  %v988_v17 = vld [vmem:[%s4255_s14 + $0x1b6] sm:$0x1]  ;;  %v1202_v19 = vsel %vm224_vm1, %v1201_v8, %v1200_v15  ;;  %v1065_v22 = vrot.slane %v986_v14, 7 }
  0x14   : > { %v989_v18 = vld [vmem:[%s4255_s14 + $0x1c6] sm:$0x1]  ;;  %v990_v20 = vld [vmem:[%s4255_s14 + $0x1d6] sm:$0x1]  ;;  %v1067_v23 = vrot.slane %v987_v16, 6  ;;  %v1204_v24 = vsel %vm227_vm2, %v1203_v9, %v1202_v19  ;;  %v1069_v25 = vrot.slane %v988_v17, 5 }
  0x15   : > { %v991_v21 = vld [vmem:[%s4255_s14 + $0x1e6] sm:$0x1]  ;;  %v1071_v26 = vrot.slane %v989_v18, 4  ;;  %v1206_v28 = vsel %vm5840_vm3, %v1205_v10, %v1204_v24  ;;  %v1066_v29 = vsel %vm221_vm0, %v1065_v22, %v985_v13  ;;  %v1073_v30 = vrot.slane %v990_v20, 3  ;;  %v978_v32 = vld [vmem:[%s4255_s14 + $0x116] sm:$0x1] }
  0x16   : > { %v977_v27 = vld [vmem:[%s4255_s14 + $0x106] sm:$0x1]  ;;  %v1075_v31 = vrot.slane %v991_v21, 2  ;;  %v1208_v34 = vsel %vm5839_vm4, %v1207_v11, %v1206_v28  ;;  %v1068_v35 = vsel %vm224_vm1, %v1067_v23, %v1066_v29  ;;  %v980_v36 = vld [vmem:[%s4255_s14 + $0x136] sm:$0x1]  ;;  %v1051_v43 = vrot.slane %v978_v32, 7 }
  0x17   : > { %v979_v33 = vld [vmem:[%s4255_s14 + $0x126] sm:$0x1]  ;;  %v982_v38 = vld [vmem:[%s4255_s14 + $0x156] sm:$0x1]  ;;  %v1210_v39 = vsel %vm236_vm5, %v1209_v12, %v1208_v34  ;;  %v1070_v40 = vsel %vm227_vm2, %v1069_v25, %v1068_v35  ;;  %v1055_v46 = vrot.slane %v980_v36, 5  ;;  %s4222_s3 = smov 127  }
  0x18   : > { %v981_v37 = vld [vmem:[%s4255_s14 + $0x146] sm:$0x1]  ;;  %v984_v42 = vld [vmem:[%s4255_s14 + $0x176] sm:$0x1]  ;;  %v1053_v44 = vrot.slane %v979_v33, 6  ;;  %1217 = vrot.lane.b32.xlu1 %v1210_v39, %s4205_s15  ;;  %v1072_v45 = vsel %vm5840_vm3, %v1071_v26, %v1070_v40  ;;  %v1059_v48 = vrot.slane %v982_v38, 3  ;;  %v1052_v51 = vsel %vm221_vm0, %v1051_v43, %v977_v27 }
  0x19   : > { %v983_v41 = vld [vmem:[%s4255_s14 + $0x166] sm:$0x1]  ;;  %v1057_v47 = vrot.slane %v981_v37, 4  ;;  %v182_v49 = vld [vmem:[%s4255_s14 + $0x180] sm:$0x1]  ;;  %v1074_v50 = vsel %vm5839_vm4, %v1073_v30, %v1072_v45  ;;  %v1063_v53 = vrot.slane %v984_v42, 1 }
  0x1a   : > { %v1061_v52 = vrot.slane %v983_v41, 2  ;;  %v183_v54 = vld [vmem:[%s4255_s14 + $0x190] sm:$0x1]  ;;  %v184_v55 = vld [vmem:[%s4255_s14 + $0x1a0] sm:$0x1]  ;;  %v1076_v56 = vsel %vm236_vm5, %v1075_v31, %v1074_v50  ;;  %v1054_v57 = vsel %vm224_vm1, %v1053_v44, %v1052_v51  ;;  %s4224_s4 = smov 109  }
  0x1b   : > { %v185_v58 = vld [vmem:[%s4255_s14 + $0x1b0] sm:$0x1]  ;;  %v186_v59 = vld [vmem:[%s4255_s14 + $0x1c0] sm:$0x1]  ;;  %1083 = vrot.lane.b32.xlu0 %v1076_v56, %s4206_s16  ;;  %v1056_v61 = vsel %vm227_vm2, %v1055_v46, %v1054_v57  ;;  %v269_v63 = vrot.slane %v183_v54, 7  ;;  %v271_v0 = vrot.slane %v184_v55, 6 }
  0x1c   : > { %v187_v60 = vld [vmem:[%s4255_s14 + $0x1d0] sm:$0x1]  ;;  %v188_v62 = vld [vmem:[%s4255_s14 + $0x1e0] sm:$0x1]  ;;  %v273_v1 = vrot.slane %v185_v58, 5  ;;  %v1058_v2 = vsel %vm5840_vm3, %v1057_v47, %v1056_v61  ;;  %v275_v3 = vrot.slane %v186_v59, 4 }
  0x1d   : > { %v277_v4 = vrot.slane %v187_v60, 3  ;;  %v279_v5 = vrot.slane %v188_v62, 2  ;;  %v1253_v6 = vld [vmem:[%s4255_s14 + $0x188] sm:$0x1]  ;;  %v1060_v7 = vsel %vm5839_vm4, %v1059_v48, %v1058_v2  ;;  %v270_v8 = vsel %vm221_vm0, %v269_v63, %v182_v49  ;;  %v1254_v9 = vld [vmem:[%s4255_s14 + $0x198] sm:$0x1] }
  0x1e   : > { %v1255_v10 = vld [vmem:[%s4255_s14 + $0x1a8] sm:$0x1]  ;;  %v1256_v11 = vld [vmem:[%s4255_s14 + $0x1b8] sm:$0x1]  ;;  %v1062_v12 = vsel %vm236_vm5, %v1061_v52, %v1060_v7  ;;  %v272_v13 = vsel %vm224_vm1, %v271_v0, %v270_v8  ;;  %v1333_v19 = vrot.slane %v1254_v9, 7 }
  0x1f   : > { %v1257_v14 = vld [vmem:[%s4255_s14 + $0x1c8] sm:$0x1]  ;;  %v1258_v15 = vld [vmem:[%s4255_s14 + $0x1d8] sm:$0x1]  ;;  %v1064_v17 = vsel %vm239_vm6, %v1063_v53, %v1062_v12  ;;  %v274_v18 = vsel %vm227_vm2, %v273_v1, %v272_v13  ;;  %v1335_v20 = vrot.slane %v1255_v10, 6  ;;  %v1337_v24 = vrot.slane %v1256_v11, 5 }
  0x20   : > { %v1259_v16 = vld [vmem:[%s4255_s14 + $0x1e8] sm:$0x1]  ;;  %v174_v21 = vld [vmem:[%s4255_s14 + $0x100] sm:$0x1]  ;;  %v175_v22 = vld [vmem:[%s4255_s14 + $0x110] sm:$0x1]  ;;  %1081 = vrot.lane.b32.xlu0 %v1064_v17, %s4206_s16  ;;  %v276_v23 = vsel %vm5840_vm3, %v275_v3, %v274_v18  ;;  %v1334_v29 = vsel %vm221_vm0, %v1333_v19, %v1253_v6 }
  0x21   : > { %v1339_v25 = vrot.slane %v1257_v14, 4  ;;  %v1341_v26 = vrot.slane %v1258_v15, 3  ;;  %v176_v27 = vld [vmem:[%s4255_s14 + $0x120] sm:$0x1]  ;;  %v278_v28 = vsel %vm5839_vm4, %v277_v4, %v276_v23  ;;  %v1343_v30 = vrot.slane %v1259_v16, 2 }
  0x22   : > { %v177_v31 = vld [vmem:[%s4255_s14 + $0x130] sm:$0x1]  ;;  %v178_v32 = vld [vmem:[%s4255_s14 + $0x140] sm:$0x1]  ;;  %v255_v33 = vrot.slane %v175_v22, 7  ;;  %v280_v34 = vsel %vm236_vm5, %v279_v5, %v278_v28  ;;  %v1336_v35 = vsel %vm224_vm1, %v1335_v20, %v1334_v29  ;;  %v257_v41 = vrot.slane %v176_v27, 6 }
  0x23   : > { %v179_v36 = vld [vmem:[%s4255_s14 + $0x150] sm:$0x1]  ;;  %v180_v37 = vld [vmem:[%s4255_s14 + $0x160] sm:$0x1]  ;;  %287 = vrot.lane.b32.xlu1 %v280_v34, %s4207_s17  ;;  %v1338_v39 = vsel %vm227_vm2, %v1337_v24, %v1336_v35  ;;  %v259_v42 = vrot.slane %v177_v31, 5  ;;  %v261_v46 = vrot.slane %v178_v32, 4 }
  0x24   : > { %v181_v38 = vld [vmem:[%s4255_s14 + $0x170] sm:$0x1]  ;;  %v256_v40 = vsel %vm221_vm0, %v255_v33, %v174_v21  ;;  %v323_v43 = vld [vmem:[%s4255_s14 + $0x181] sm:$0x1]  ;;  %v324_v44 = vld [vmem:[%s4255_s14 + $0x191] sm:$0x1]  ;;  %v1340_v45 = vsel %vm5840_vm3, %v1339_v25, %v1338_v39 }
  0x25   : > { %v263_v47 = vrot.slane %v179_v36, 3  ;;  %v265_v48 = vrot.slane %v180_v37, 2  ;;  %v325_v49 = vld [vmem:[%s4255_s14 + $0x1a1] sm:$0x1]  ;;  %v1342_v50 = vsel %vm5839_vm4, %v1341_v26, %v1340_v45  ;;  %v258_v51 = vsel %vm224_vm1, %v257_v41, %v256_v40  ;;  %v326_v53 = vld [vmem:[%s4255_s14 + $0x1b1] sm:$0x1] }
  0x26   : > { %v267_v52 = vrot.slane %v181_v38, 1  ;;  %v327_v54 = vld [vmem:[%s4255_s14 + $0x1c1] sm:$0x1]  ;;  %v403_v55 = vrot.slane %v324_v44, 7  ;;  %v1344_v56 = vsel %vm236_vm5, %v1343_v30, %v1342_v50  ;;  %v260_v57 = vsel %vm227_vm2, %v259_v42, %v258_v51  ;;  %v328_v58 = vld [vmem:[%s4255_s14 + $0x1d1] sm:$0x1] }
  0x27   : > { %v329_v59 = vld [vmem:[%s4255_s14 + $0x1e1] sm:$0x1]  ;;  %v405_v60 = vrot.slane %v325_v49, 6  ;;  %v407_v61 = vrot.slane %v326_v53, 5  ;;  %1351 = vrot.lane.b32.xlu1 %v1344_v56, %s4208_s18  ;;  %v262_v62 = vsel %vm5840_vm3, %v261_v46, %v260_v57  ;;  %v409_v0 = vrot.slane %v327_v54, 4 }
  0x28   : > { %v404_v63 = vsel %vm221_vm0, %v403_v55, %v323_v43  ;;  %v411_v1 = vrot.slane %v328_v58, 3  ;;  %v1245_v2 = vld [vmem:[%s4255_s14 + $0x108] sm:$0x1]  ;;  %v1246_v3 = vld [vmem:[%s4255_s14 + $0x118] sm:$0x1]  ;;  %v264_v4 = vsel %vm5839_vm4, %v263_v47, %v262_v62  ;;  %v413_v6 = vrot.slane %v329_v59, 2 }
  0x29   : > { %v406_v5 = vsel %vm224_vm1, %v405_v60, %v404_v63  ;;  %v1247_v7 = vld [vmem:[%s4255_s14 + $0x128] sm:$0x1]  ;;  %v1248_v8 = vld [vmem:[%s4255_s14 + $0x138] sm:$0x1]  ;;  %v1319_v9 = vrot.slane %v1246_v3, 7  ;;  %v266_v10 = vsel %vm236_vm5, %v265_v48, %v264_v4 }
  0x2a   : > { %v408_v11 = vsel %vm227_vm2, %v407_v61, %v406_v5  ;;  %v1249_v12 = vld [vmem:[%s4255_s14 + $0x148] sm:$0x1]  ;;  %v1250_v13 = vld [vmem:[%s4255_s14 + $0x158] sm:$0x1]  ;;  %v268_v15 = vsel %vm239_vm6, %v267_v52, %v266_v10  ;;  %v1321_v19 = vrot.slane %v1247_v7, 6  ;;  %v1323_v21 = vrot.slane %v1248_v8, 5 }
  0x2b   : > { %v1251_v14 = vld [vmem:[%s4255_s14 + $0x168] sm:$0x1]  ;;  %v410_v16 = vsel %vm5840_vm3, %v409_v0, %v408_v11  ;;  %v1252_v17 = vld [vmem:[%s4255_s14 + $0x178] sm:$0x1]  ;;  %v1320_v18 = vsel %vm221_vm0, %v1319_v9, %v1245_v2  ;;  %285 = vrot.lane.b32.xlu0 %v268_v15, %s4207_s17  ;;  %v1325_v22 = vrot.slane %v1249_v12, 4  ;;  %v1327_v23 = vrot.slane %v1250_v13, 3 }
  0x2c   : > { %v412_v20 = vsel %vm5839_vm4, %v411_v1, %v410_v16  ;;  %v1111_v24 = vld [vmem:[%s4255_s14 + $0x107] sm:$0x1]  ;;  %v1112_v25 = vld [vmem:[%s4255_s14 + $0x117] sm:$0x1]  ;;  %v1322_v27 = vsel %vm224_vm1, %v1321_v19, %v1320_v18  ;;  %v1329_v28 = vrot.slane %v1251_v14, 2  ;;  %v1331_v29 = vrot.slane %v1252_v17, 1 }
  0x2d   : > { %v414_v26 = vsel %vm236_vm5, %v413_v6, %v412_v20  ;;  %v1113_v30 = vld [vmem:[%s4255_s14 + $0x127] sm:$0x1]  ;;  %v1114_v31 = vld [vmem:[%s4255_s14 + $0x137] sm:$0x1]  ;;  %v1324_v32 = vsel %vm227_vm2, %v1323_v21, %v1322_v27  ;;  %v1185_v38 = vrot.slane %v1112_v25, 7 }
  0x2e   : > { %421 = vrot.lane.b32.xlu1 %v414_v26, %s4209_s19  ;;  %v1115_v33 = vld [vmem:[%s4255_s14 + $0x147] sm:$0x1]  ;;  %v1116_v34 = vld [vmem:[%s4255_s14 + $0x157] sm:$0x1]  ;;  %v1326_v36 = vsel %vm5840_vm3, %v1325_v22, %v1324_v32  ;;  %v1187_v39 = vrot.slane %v1113_v30, 6  ;;  %v1189_v40 = vrot.slane %v1114_v31, 5 }
  0x2f   : > { %v1117_v35 = vld [vmem:[%s4255_s14 + $0x167] sm:$0x1]  ;;  %v1118_v37 = vld [vmem:[%s4255_s14 + $0x177] sm:$0x1]  ;;  %v1328_v41 = vsel %vm5839_vm4, %v1327_v23, %v1326_v36  ;;  %v1191_v42 = vrot.slane %v1115_v33, 4  ;;  %v1193_v43 = vrot.slane %v1116_v34, 3  ;;  %v1186_v46 = vsel %vm221_vm0, %v1185_v38, %v1111_v24 }
  0x30   : > { %v315_v44 = vld [vmem:[%s4255_s14 + $0x101] sm:$0x1]  ;;  %v1330_v45 = vsel %vm236_vm5, %v1329_v28, %v1328_v41  ;;  %v1195_v47 = vrot.slane %v1117_v35, 2  ;;  %v1197_v48 = vrot.slane %v1118_v37, 1  ;;  %v316_v49 = vld [vmem:[%s4255_s14 + $0x111] sm:$0x1]  ;;  %v1188_v52 = vsel %vm224_vm1, %v1187_v39, %v1186_v46 }
  0x31   : > { %v317_v50 = vld [vmem:[%s4255_s14 + $0x121] sm:$0x1]  ;;  %v1332_v51 = vsel %vm239_vm6, %v1331_v29, %v1330_v45  ;;  %v318_v53 = vld [vmem:[%s4255_s14 + $0x131] sm:$0x1]  ;;  %v1190_v56 = vsel %vm227_vm2, %v1189_v40, %v1188_v52  ;;  %v389_v59 = vrot.slane %v316_v49, 7 }
  0x32   : > { %v319_v54 = vld [vmem:[%s4255_s14 + $0x141] sm:$0x1]  ;;  %v320_v55 = vld [vmem:[%s4255_s14 + $0x151] sm:$0x1]  ;;  %1349 = vrot.lane.b32.xlu0 %v1332_v51, %s4208_s18  ;;  %v391_v60 = vrot.slane %v317_v50, 6  ;;  %v1192_v61 = vsel %vm5840_vm3, %v1191_v42, %v1190_v56  ;;  %v393_v62 = vrot.slane %v318_v53, 5 }
  0x33   : > { %v321_v57 = vld [vmem:[%s4255_s14 + $0x161] sm:$0x1]  ;;  %v322_v58 = vld [vmem:[%s4255_s14 + $0x171] sm:$0x1]  ;;  %v395_v63 = vrot.slane %v319_v54, 4  ;;  %v397_v0 = vrot.slane %v320_v55, 3  ;;  %v1194_v2 = vsel %vm5839_vm4, %v1193_v43, %v1192_v61  ;;  %v390_v3 = vsel %vm221_vm0, %v389_v59, %v315_v44 }
  0x34   : > { %v1387_v1 = vld [vmem:[%s4255_s14 + $0x189] sm:$0x1]  ;;  %v399_v4 = vrot.slane %v321_v57, 2  ;;  %v401_v5 = vrot.slane %v322_v58, 1  ;;  %v1388_v6 = vld [vmem:[%s4255_s14 + $0x199] sm:$0x1]  ;;  %v1196_v8 = vsel %vm236_vm5, %v1195_v47, %v1194_v2  ;;  %v392_v9 = vsel %vm224_vm1, %v391_v60, %v390_v3 }
  0x35   : > { %v1389_v7 = vld [vmem:[%s4255_s14 + $0x1a9] sm:$0x1]  ;;  %v1390_v10 = vld [vmem:[%s4255_s14 + $0x1b9] sm:$0x1]  ;;  %v1198_v13 = vsel %vm239_vm6, %v1197_v48, %v1196_v8  ;;  %v394_v14 = vsel %vm227_vm2, %v393_v62, %v392_v9  ;;  %v1467_v16 = vrot.slane %v1388_v6, 7 }
  0x36   : > { %v1391_v11 = vld [vmem:[%s4255_s14 + $0x1c9] sm:$0x1]  ;;  %v1392_v12 = vld [vmem:[%s4255_s14 + $0x1d9] sm:$0x1]  ;;  %v1469_v17 = vrot.slane %v1389_v7, 6  ;;  %1215 = vrot.lane.b32.xlu1 %v1198_v13, %s4205_s15  ;;  %v396_v19 = vsel %vm5840_vm3, %v395_v63, %v394_v14  ;;  %v1471_v20 = vrot.slane %v1390_v10, 5 }
  0x37   : > { %v1393_v15 = vld [vmem:[%s4255_s14 + $0x1e9] sm:$0x1]  ;;  %v1473_v21 = vrot.slane %v1391_v11, 4  ;;  %v1475_v22 = vrot.slane %v1392_v12, 3  ;;  %v1380_v23 = vld [vmem:[%s4255_s14 + $0x119] sm:$0x1]  ;;  %v398_v24 = vsel %vm5839_vm4, %v397_v0, %v396_v19  ;;  %v1468_v25 = vsel %vm221_vm0, %v1467_v16, %v1387_v1 }
  0x38   : > { %v1379_v18 = vld [vmem:[%s4255_s14 + $0x109] sm:$0x1]  ;;  %v1477_v26 = vrot.slane %v1393_v15, 2  ;;  %v1382_v28 = vld [vmem:[%s4255_s14 + $0x139] sm:$0x1]  ;;  %v1453_v29 = vrot.slane %v1380_v23, 7  ;;  %v400_v30 = vsel %vm236_vm5, %v399_v4, %v398_v24  ;;  %v1470_v31 = vsel %vm224_vm1, %v1469_v17, %v1468_v25 }
  0x39   : > { %v1381_v27 = vld [vmem:[%s4255_s14 + $0x129] sm:$0x1]  ;;  %v1384_v33 = vld [vmem:[%s4255_s14 + $0x159] sm:$0x1]  ;;  %v402_v35 = vsel %vm239_vm6, %v401_v5, %v400_v30  ;;  %v1472_v36 = vsel %vm227_vm2, %v1471_v20, %v1470_v31  ;;  %v1457_v41 = vrot.slane %v1382_v28, 5 }
  0x3a   : > { %v1383_v32 = vld [vmem:[%s4255_s14 + $0x149] sm:$0x1]  ;;  %v1386_v37 = vld [vmem:[%s4255_s14 + $0x179] sm:$0x1]  ;;  %v1454_v38 = vsel %vm221_vm0, %v1453_v29, %v1379_v18  ;;  %v1455_v39 = vrot.slane %v1381_v27, 6  ;;  %419 = vrot.lane.b32.xlu0 %v402_v35, %s4209_s19  ;;  %v1474_v40 = vsel %vm5840_vm3, %v1473_v21, %v1472_v36  ;;  %v1461_v43 = vrot.slane %v1384_v33, 3 }
  0x3b   : > { %v1385_v34 = vld [vmem:[%s4255_s14 + $0x169] sm:$0x1]  ;;  %v1459_v42 = vrot.slane %v1383_v32, 4  ;;  %v1789_v44 = vld [vmem:[%s4255_s14 + $0x18c] sm:$0x1]  ;;  %v1476_v46 = vsel %vm5839_vm4, %v1475_v22, %v1474_v40  ;;  %v1465_v49 = vrot.slane %v1386_v37, 1 }
  0x3c   : > { %v1790_v45 = vld [vmem:[%s4255_s14 + $0x19c] sm:$0x1]  ;;  %v1456_v47 = vsel %vm224_vm1, %v1455_v39, %v1454_v38  ;;  %v1463_v48 = vrot.slane %v1385_v34, 2  ;;  %v1791_v50 = vld [vmem:[%s4255_s14 + $0x1ac] sm:$0x1]  ;;  %v1478_v52 = vsel %vm236_vm5, %v1477_v26, %v1476_v46 }
  0x3d   : > { %v1792_v51 = vld [vmem:[%s4255_s14 + $0x1bc] sm:$0x1]  ;;  %v1458_v53 = vsel %vm227_vm2, %v1457_v41, %v1456_v47  ;;  %v1793_v54 = vld [vmem:[%s4255_s14 + $0x1cc] sm:$0x1]  ;;  %1485 = vrot.lane.b32.xlu1 %v1478_v52, %s4210_s20  ;;  %v1869_v58 = vrot.slane %v1790_v45, 7  ;;  %v1871_v59 = vrot.slane %v1791_v50, 6 }
  0x3e   : > { %v1794_v55 = vld [vmem:[%s4255_s14 + $0x1dc] sm:$0x1]  ;;  %v1795_v56 = vld [vmem:[%s4255_s14 + $0x1ec] sm:$0x1]  ;;  %v1460_v57 = vsel %vm5840_vm3, %v1459_v42, %v1458_v53  ;;  %v1873_v60 = vrot.slane %v1792_v51, 5  ;;  %v1875_v62 = vrot.slane %v1793_v54, 4 }
  0x3f   : > { %v1462_v61 = vsel %vm5839_vm4, %v1461_v43, %v1460_v57  ;;  %v1877_v63 = vrot.slane %v1794_v55, 3  ;;  %v1879_v0 = vrot.slane %v1795_v56, 2  ;;  %v1781_v1 = vld [vmem:[%s4255_s14 + $0x10c] sm:$0x1]  ;;  %v1782_v2 = vld [vmem:[%s4255_s14 + $0x11c] sm:$0x1]  ;;  %v1870_v4 = vsel %vm221_vm0, %v1869_v58, %v1789_v44 }
  0x40   : > { %v1464_v3 = vsel %vm236_vm5, %v1463_v48, %v1462_v61  ;;  %v1783_v5 = vld [vmem:[%s4255_s14 + $0x12c] sm:$0x1]  ;;  %v1784_v6 = vld [vmem:[%s4255_s14 + $0x13c] sm:$0x1]  ;;  %v1872_v9 = vsel %vm224_vm1, %v1871_v59, %v1870_v4  ;;  %v1855_v14 = vrot.slane %v1782_v2, 7 }
  0x41   : > { %v1785_v7 = vld [vmem:[%s4255_s14 + $0x14c] sm:$0x1]  ;;  %v1466_v8 = vsel %vm239_vm6, %v1465_v49, %v1464_v3  ;;  %v1786_v10 = vld [vmem:[%s4255_s14 + $0x15c] sm:$0x1]  ;;  %v1874_v13 = vsel %vm227_vm2, %v1873_v60, %v1872_v9  ;;  %v1857_v15 = vrot.slane %v1783_v5, 6  ;;  %v1859_v16 = vrot.slane %v1784_v6, 5 }
  0x42   : > { %v1787_v11 = vld [vmem:[%s4255_s14 + $0x16c] sm:$0x1]  ;;  %v1788_v12 = vld [vmem:[%s4255_s14 + $0x17c] sm:$0x1]  ;;  %1483 = vrot.lane.b32.xlu0 %v1466_v8, %s4210_s20  ;;  %v457_v17 = vld [vmem:[%s4255_s14 + $0x182] sm:$0x1]  ;;  %v1876_v18 = vsel %vm5840_vm3, %v1875_v62, %v1874_v13  ;;  %v1856_v24 = vsel %vm221_vm0, %v1855_v14, %v1781_v1 }
  0x43   : > { %v1861_v19 = vrot.slane %v1785_v7, 4  ;;  %v1863_v20 = vrot.slane %v1786_v10, 3  ;;  %v1865_v21 = vrot.slane %v1787_v11, 2  ;;  %v458_v22 = vld [vmem:[%s4255_s14 + $0x192] sm:$0x1]  ;;  %v1878_v23 = vsel %vm5839_vm4, %v1877_v63, %v1876_v18 }
  0x44   : > { %v1867_v25 = vrot.slane %v1788_v12, 1  ;;  %v459_v26 = vld [vmem:[%s4255_s14 + $0x1a2] sm:$0x1]  ;;  %v460_v27 = vld [vmem:[%s4255_s14 + $0x1b2] sm:$0x1]  ;;  %v537_v28 = vrot.slane %v458_v22, 7  ;;  %v1880_v29 = vsel %vm236_vm5, %v1879_v0, %v1878_v23  ;;  %v1858_v30 = vsel %vm224_vm1, %v1857_v15, %v1856_v24 }
  0x45   : > { %v461_v31 = vld [vmem:[%s4255_s14 + $0x1c2] sm:$0x1]  ;;  %v462_v32 = vld [vmem:[%s4255_s14 + $0x1d2] sm:$0x1]  ;;  %1887 = vrot.lane.b32.xlu1 %v1880_v29, %s4211_s21  ;;  %v1860_v34 = vsel %vm227_vm2, %v1859_v16, %v1858_v30  ;;  %v539_v36 = vrot.slane %v459_v26, 6  ;;  %v541_v37 = vrot.slane %v460_v27, 5 }
  0x46   : > { %v463_v33 = vld [vmem:[%s4255_s14 + $0x1e2] sm:$0x1]  ;;  %v538_v35 = vsel %vm221_vm0, %v537_v28, %v457_v17  ;;  %v450_v39 = vld [vmem:[%s4255_s14 + $0x112] sm:$0x1]  ;;  %v1862_v40 = vsel %vm5840_vm3, %v1861_v19, %v1860_v34  ;;  %v543_v41 = vrot.slane %v461_v31, 4  ;;  %v545_v42 = vrot.slane %v462_v32, 3 }
  0x47   : > { %v449_v38 = vld [vmem:[%s4255_s14 + $0x102] sm:$0x1]  ;;  %v547_v43 = vrot.slane %v463_v33, 2  ;;  %v1864_v45 = vsel %vm5839_vm4, %v1863_v20, %v1862_v40  ;;  %v540_v46 = vsel %vm224_vm1, %v539_v36, %v538_v35  ;;  %v452_v47 = vld [vmem:[%s4255_s14 + $0x132] sm:$0x1]  ;;  %v523_v54 = vrot.slane %v450_v39, 7 }
  0x48   : > { %v451_v44 = vld [vmem:[%s4255_s14 + $0x122] sm:$0x1]  ;;  %v454_v49 = vld [vmem:[%s4255_s14 + $0x152] sm:$0x1]  ;;  %v1866_v50 = vsel %vm236_vm5, %v1865_v21, %v1864_v45  ;;  %v542_v51 = vsel %vm227_vm2, %v541_v37, %v540_v46  ;;  %v527_v58 = vrot.slane %v452_v47, 5 }
  0x49   : > { %v453_v48 = vld [vmem:[%s4255_s14 + $0x142] sm:$0x1]  ;;  %v456_v53 = vld [vmem:[%s4255_s14 + $0x172] sm:$0x1]  ;;  %v525_v55 = vrot.slane %v451_v44, 6  ;;  %v1868_v56 = vsel %vm239_vm6, %v1867_v25, %v1866_v50  ;;  %v544_v57 = vsel %vm5840_vm3, %v543_v41, %v542_v51  ;;  %v524_v63 = vsel %vm221_vm0, %v523_v54, %v449_v38 }
  0x4a   : > { %v455_v52 = vld [vmem:[%s4255_s14 + $0x162] sm:$0x1]  ;;  %v529_v59 = vrot.slane %v453_v48, 4  ;;  %v969_v60 = vld [vmem:[%s4255_s14 + $0x86] sm:$0x1]  ;;  %1885 = vrot.lane.b32.xlu0 %v1868_v56, %s4211_s21  ;;  %v546_v62 = vsel %vm5839_vm4, %v545_v42, %v544_v57  ;;  %v531_v0 = vrot.slane %v454_v49, 3 }
  0x4b   : > { %v970_v61 = vld [vmem:[%s4255_s14 + $0x96] sm:$0x1]  ;;  %v533_v1 = vrot.slane %v455_v52, 2  ;;  %v971_v2 = vld [vmem:[%s4255_s14 + $0xa6] sm:$0x1]  ;;  %v548_v4 = vsel %vm236_vm5, %v547_v43, %v546_v62  ;;  %v526_v5 = vsel %vm224_vm1, %v525_v55, %v524_v63  ;;  %v535_v6 = vrot.slane %v456_v53, 1 }
  0x4c   : > { %v972_v3 = vld [vmem:[%s4255_s14 + $0xb6] sm:$0x1]  ;;  %v973_v7 = vld [vmem:[%s4255_s14 + $0xc6] sm:$0x1]  ;;  %v1037_v9 = vrot.slane %v970_v61, 7  ;;  %555 = vrot.lane.b32.xlu1 %v548_v4, %s4212_s22  ;;  %v528_v10 = vsel %vm227_vm2, %v527_v58, %v526_v5  ;;  %v1039_v13 = vrot.slane %v971_v2, 6 }
  0x4d   : > { %v974_v8 = vld [vmem:[%s4255_s14 + $0xd6] sm:$0x1]  ;;  %v975_v11 = vld [vmem:[%s4255_s14 + $0xe6] sm:$0x1]  ;;  %v1041_v14 = vrot.slane %v972_v3, 5  ;;  %v530_v15 = vsel %vm5840_vm3, %v529_v59, %v528_v10  ;;  %v1043_v17 = vrot.slane %v973_v7, 4 }
  0x4e   : > { %v976_v12 = vld [vmem:[%s4255_s14 + $0xf6] sm:$0x1]  ;;  %v1038_v16 = vsel %vm221_vm0, %v1037_v9, %v969_v60  ;;  %v1045_v18 = vrot.slane %v974_v8, 3  ;;  %v961_v19 = vld [vmem:[%s4255_s14 + $0x6] sm:$0x1]  ;;  %v532_v21 = vsel %vm5839_vm4, %v531_v0, %v530_v15  ;;  %v1047_v23 = vrot.slane %v975_v11, 2 }
  0x4f   : > { %v962_v20 = vld [vmem:[%s4255_s14 + $0x16] sm:$0x1]  ;;  %v1040_v22 = vsel %vm224_vm1, %v1039_v13, %v1038_v16  ;;  %v963_v24 = vld [vmem:[%s4255_s14 + $0x26] sm:$0x1]  ;;  %v534_v26 = vsel %vm236_vm5, %v533_v1, %v532_v21  ;;  %v1049_v28 = vrot.slane %v976_v12, 1 }
  0x50   : > { %v964_v25 = vld [vmem:[%s4255_s14 + $0x36] sm:$0x1]  ;;  %v1042_v27 = vsel %vm227_vm2, %v1041_v14, %v1040_v22  ;;  %v965_v29 = vld [vmem:[%s4255_s14 + $0x46] sm:$0x1]  ;;  %v536_v31 = vsel %vm239_vm6, %v535_v6, %v534_v26  ;;  %v1023_v35 = vrot.slane %v962_v20, 7  ;;  %v1025_v36 = vrot.slane %v963_v24, 6 }
  0x51   : > { %v966_v30 = vld [vmem:[%s4255_s14 + $0x56] sm:$0x1]  ;;  %v1044_v32 = vsel %vm5840_vm3, %v1043_v17, %v1042_v27  ;;  %v967_v33 = vld [vmem:[%s4255_s14 + $0x66] sm:$0x1]  ;;  %553 = vrot.lane.b32.xlu0 %v536_v31, %s4212_s22  ;;  %v1027_v38 = vrot.slane %v964_v25, 5  ;;  %v1029_v39 = vrot.slane %v965_v29, 4 }
  0x52   : > { %v968_v34 = vld [vmem:[%s4255_s14 + $0x76] sm:$0x1]  ;;  %v1046_v37 = vsel %vm5839_vm4, %v1045_v18, %v1044_v32  ;;  %v1521_v40 = vld [vmem:[%s4255_s14 + $0x18a] sm:$0x1]  ;;  %v1522_v41 = vld [vmem:[%s4255_s14 + $0x19a] sm:$0x1]  ;;  %v1024_v43 = vsel %vm221_vm0, %v1023_v35, %v961_v19 }
  0x53   : > { %v1048_v42 = vsel %vm236_vm5, %v1047_v23, %v1046_v37  ;;  %v1031_v44 = vrot.slane %v966_v30, 3  ;;  %v1523_v45 = vld [vmem:[%s4255_s14 + $0x1aa] sm:$0x1]  ;;  %v1524_v46 = vld [vmem:[%s4255_s14 + $0x1ba] sm:$0x1]  ;;  %v1026_v48 = vsel %vm224_vm1, %v1025_v36, %v1024_v43  ;;  %v1033_v49 = vrot.slane %v967_v33, 2 }
  0x54   : > { %v1050_v47 = vsel %vm239_vm6, %v1049_v28, %v1048_v42  ;;  %v1035_v50 = vrot.slane %v968_v34, 1  ;;  %v1525_v51 = vld [vmem:[%s4255_s14 + $0x1ca] sm:$0x1]  ;;  %v1526_v52 = vld [vmem:[%s4255_s14 + $0x1da] sm:$0x1]  ;;  %v1028_v53 = vsel %vm227_vm2, %v1027_v38, %v1026_v48  ;;  %v1601_v55 = vrot.slane %v1522_v41, 7 }
  0x55   : > { %1079 = vrot.lane.b32.xlu1 %v1050_v47, %s4206_s16  ;;  %v1527_v54 = vld [vmem:[%s4255_s14 + $0x1ea] sm:$0x1]  ;;  %v1603_v56 = vrot.slane %v1523_v45, 6  ;;  %v1605_v57 = vrot.slane %v1524_v46, 5  ;;  %v1030_v58 = vsel %vm5840_vm3, %v1029_v39, %v1028_v53  ;;  %v1607_v59 = vrot.slane %v1525_v51, 4 }
  0x56   : > { %v1609_v60 = vrot.slane %v1526_v52, 3  ;;  %v1513_v61 = vld [vmem:[%s4255_s14 + $0x10a] sm:$0x1]  ;;  %v1514_v62 = vld [vmem:[%s4255_s14 + $0x11a] sm:$0x1]  ;;  %v1032_v63 = vsel %vm5839_vm4, %v1031_v44, %v1030_v58  ;;  %v1602_v0 = vsel %vm221_vm0, %v1601_v55, %v1521_v40  ;;  %v1611_v6 = vrot.slane %v1527_v54, 2 }
  0x57   : > { %v1515_v1 = vld [vmem:[%s4255_s14 + $0x12a] sm:$0x1]  ;;  %v1516_v2 = vld [vmem:[%s4255_s14 + $0x13a] sm:$0x1]  ;;  %v1034_v4 = vsel %vm236_vm5, %v1033_v49, %v1032_v63  ;;  %v1604_v5 = vsel %vm224_vm1, %v1603_v56, %v1602_v0  ;;  %v1587_v12 = vrot.slane %v1514_v62, 7 }
  0x58   : > { %v1517_v3 = vld [vmem:[%s4255_s14 + $0x14a] sm:$0x1]  ;;  %v1518_v7 = vld [vmem:[%s4255_s14 + $0x15a] sm:$0x1]  ;;  %v1036_v9 = vsel %vm239_vm6, %v1035_v50, %v1034_v4  ;;  %v1606_v10 = vsel %vm227_vm2, %v1605_v57, %v1604_v5  ;;  %v1589_v13 = vrot.slane %v1515_v1, 6  ;;  %v1591_v16 = vrot.slane %v1516_v2, 5 }
  0x59   : > { %v1519_v8 = vld [vmem:[%s4255_s14 + $0x16a] sm:$0x1]  ;;  %v1520_v11 = vld [vmem:[%s4255_s14 + $0x17a] sm:$0x1]  ;;  %v1930_v14 = vld [vmem:[%s4255_s14 + $0x19d] sm:$0x1]  ;;  %1077 = vrot.lane.b32.xlu0 %v1036_v9, %s4206_s16  ;;  %v1608_v15 = vsel %vm5840_vm3, %v1607_v59, %v1606_v10  ;;  %v1588_v21 = vsel %vm221_vm0, %v1587_v12, %v1513_v61 }
  0x5a   : > { %v1593_v17 = vrot.slane %v1517_v3, 4  ;;  %v1929_v18 = vld [vmem:[%s4255_s14 + $0x18d] sm:$0x1]  ;;  %v1610_v20 = vsel %vm5839_vm4, %v1609_v60, %v1608_v15  ;;  %v1595_v22 = vrot.slane %v1518_v7, 3  ;;  %v1597_v23 = vrot.slane %v1519_v8, 2 }
  0x5b   : > { %v1931_v19 = vld [vmem:[%s4255_s14 + $0x1ad] sm:$0x1]  ;;  %v1932_v24 = vld [vmem:[%s4255_s14 + $0x1bd] sm:$0x1]  ;;  %v1612_v26 = vsel %vm236_vm5, %v1611_v6, %v1610_v20  ;;  %v1590_v27 = vsel %vm224_vm1, %v1589_v13, %v1588_v21  ;;  %v2009_v30 = vrot.slane %v1930_v14, 7  ;;  %v1599_v33 = vrot.slane %v1520_v11, 1 }
  0x5c   : > { %v1933_v25 = vld [vmem:[%s4255_s14 + $0x1cd] sm:$0x1]  ;;  %v1934_v28 = vld [vmem:[%s4255_s14 + $0x1dd] sm:$0x1]  ;;  %v2011_v31 = vrot.slane %v1931_v19, 6  ;;  %1619 = vrot.lane.b32.xlu1 %v1612_v26, %s4213_s23  ;;  %v1592_v32 = vsel %vm227_vm2, %v1591_v16, %v1590_v27  ;;  %v2013_v34 = vrot.slane %v1932_v24, 5 }
  0x5d   : > { %v1935_v29 = vld [vmem:[%s4255_s14 + $0x1ed] sm:$0x1]  ;;  %v2015_v35 = vrot.slane %v1933_v25, 4  ;;  %v1594_v37 = vsel %vm5840_vm3, %v1593_v17, %v1592_v32  ;;  %v2010_v38 = vsel %vm221_vm0, %v2009_v30, %v1929_v18  ;;  %v2017_v39 = vrot.slane %v1934_v28, 3  ;;  %v1922_v41 = vld [vmem:[%s4255_s14 + $0x11d] sm:$0x1] }
  0x5e   : > { %v1921_v36 = vld [vmem:[%s4255_s14 + $0x10d] sm:$0x1]  ;;  %v2019_v40 = vrot.slane %v1935_v29, 2  ;;  %v1596_v43 = vsel %vm5839_vm4, %v1595_v22, %v1594_v37  ;;  %v2012_v44 = vsel %vm224_vm1, %v2011_v31, %v2010_v38  ;;  %v1924_v45 = vld [vmem:[%s4255_s14 + $0x13d] sm:$0x1]  ;;  %v1995_v52 = vrot.slane %v1922_v41, 7 }
  0x5f   : > { %v1923_v42 = vld [vmem:[%s4255_s14 + $0x12d] sm:$0x1]  ;;  %v1926_v47 = vld [vmem:[%s4255_s14 + $0x15d] sm:$0x1]  ;;  %v1598_v48 = vsel %vm236_vm5, %v1597_v23, %v1596_v43  ;;  %v2014_v49 = vsel %vm227_vm2, %v2013_v34, %v2012_v44  ;;  %v1999_v56 = vrot.slane %v1924_v45, 5 }
  0x60   : > { %v1925_v46 = vld [vmem:[%s4255_s14 + $0x14d] sm:$0x1]  ;;  %v1928_v51 = vld [vmem:[%s4255_s14 + $0x17d] sm:$0x1]  ;;  %v1997_v53 = vrot.slane %v1923_v42, 6  ;;  %v1600_v54 = vsel %vm239_vm6, %v1599_v33, %v1598_v48  ;;  %v2016_v55 = vsel %vm5840_vm3, %v2015_v35, %v2014_v49  ;;  %v1996_v61 = vsel %vm221_vm0, %v1995_v52, %v1921_v36 }
  0x61   : > { %v1927_v50 = vld [vmem:[%s4255_s14 + $0x16d] sm:$0x1]  ;;  %v2001_v57 = vrot.slane %v1925_v46, 4  ;;  %v591_v58 = vld [vmem:[%s4255_s14 + $0x183] sm:$0x1]  ;;  %1617 = vrot.lane.b32.xlu0 %v1600_v54, %s4213_s23  ;;  %v2018_v60 = vsel %vm5839_vm4, %v2017_v39, %v2016_v55  ;;  %v2003_v62 = vrot.slane %v1926_v47, 3 }
  0x62   : > { %v592_v59 = vld [vmem:[%s4255_s14 + $0x193] sm:$0x1]  ;;  %v2005_v63 = vrot.slane %v1927_v50, 2  ;;  %v593_v0 = vld [vmem:[%s4255_s14 + $0x1a3] sm:$0x1]  ;;  %v2020_v2 = vsel %vm236_vm5, %v2019_v40, %v2018_v60  ;;  %v1998_v3 = vsel %vm224_vm1, %v1997_v53, %v1996_v61  ;;  %v2007_v4 = vrot.slane %v1928_v51, 1 }
  0x63   : > { %v594_v1 = vld [vmem:[%s4255_s14 + $0x1b3] sm:$0x1]  ;;  %v595_v5 = vld [vmem:[%s4255_s14 + $0x1c3] sm:$0x1]  ;;  %v671_v7 = vrot.slane %v592_v59, 7  ;;  %2027 = vrot.lane.b32.xlu1 %v2020_v2, %s4214_s24  ;;  %v2000_v8 = vsel %vm227_vm2, %v1999_v56, %v1998_v3  ;;  %v673_v10 = vrot.slane %v593_v0, 6 }
  0x64   : > { %v596_v6 = vld [vmem:[%s4255_s14 + $0x1d3] sm:$0x1]  ;;  %v597_v9 = vld [vmem:[%s4255_s14 + $0x1e3] sm:$0x1]  ;;  %v675_v11 = vrot.slane %v594_v1, 5  ;;  %v677_v12 = vrot.slane %v595_v5, 4  ;;  %v2002_v13 = vsel %vm5840_vm3, %v2001_v57, %v2000_v8 }
  0x65   : > { %v672_v14 = vsel %vm221_vm0, %v671_v7, %v591_v58  ;;  %v679_v15 = vrot.slane %v596_v6, 3  ;;  %v681_v16 = vrot.slane %v597_v9, 2  ;;  %v583_v17 = vld [vmem:[%s4255_s14 + $0x103] sm:$0x1]  ;;  %v584_v18 = vld [vmem:[%s4255_s14 + $0x113] sm:$0x1]  ;;  %v2004_v19 = vsel %vm5839_vm4, %v2003_v62, %v2002_v13 }
  0x66   : > { %v674_v20 = vsel %vm224_vm1, %v673_v10, %v672_v14  ;;  %v585_v21 = vld [vmem:[%s4255_s14 + $0x123] sm:$0x1]  ;;  %v586_v22 = vld [vmem:[%s4255_s14 + $0x133] sm:$0x1]  ;;  %v2006_v24 = vsel %vm236_vm5, %v2005_v63, %v2004_v19  ;;  %v657_v31 = vrot.slane %v584_v18, 7 }
  0x67   : > { %v587_v23 = vld [vmem:[%s4255_s14 + $0x143] sm:$0x1]  ;;  %v676_v25 = vsel %vm227_vm2, %v675_v11, %v674_v20  ;;  %v588_v26 = vld [vmem:[%s4255_s14 + $0x153] sm:$0x1]  ;;  %v2008_v29 = vsel %vm239_vm6, %v2007_v4, %v2006_v24  ;;  %v659_v32 = vrot.slane %v585_v21, 6  ;;  %v661_v35 = vrot.slane %v586_v22, 5 }
  0x68   : > { %v589_v27 = vld [vmem:[%s4255_s14 + $0x163] sm:$0x1]  ;;  %v590_v28 = vld [vmem:[%s4255_s14 + $0x173] sm:$0x1]  ;;  %v678_v30 = vsel %vm5840_vm3, %v677_v12, %v676_v25  ;;  %v1104_v33 = vld [vmem:[%s4255_s14 + $0x97] sm:$0x1]  ;;  %2025 = vrot.lane.b32.xlu0 %v2008_v29, %s4214_s24  ;;  %v658_v41 = vsel %vm221_vm0, %v657_v31, %v583_v17 }
  0x69   : > { %v680_v34 = vsel %vm5839_vm4, %v679_v15, %v678_v30  ;;  %v663_v36 = vrot.slane %v587_v23, 4  ;;  %v665_v37 = vrot.slane %v588_v26, 3  ;;  %v1103_v38 = vld [vmem:[%s4255_s14 + $0x87] sm:$0x1]  ;;  %v667_v42 = vrot.slane %v589_v27, 2 }
  0x6a   : > { %v1105_v39 = vld [vmem:[%s4255_s14 + $0xa7] sm:$0x1]  ;;  %v682_v40 = vsel %vm236_vm5, %v681_v16, %v680_v34  ;;  %v669_v43 = vrot.slane %v590_v28, 1  ;;  %v1106_v44 = vld [vmem:[%s4255_s14 + $0xb7] sm:$0x1]  ;;  %v660_v46 = vsel %vm224_vm1, %v659_v32, %v658_v41  ;;  %v1171_v51 = vrot.slane %v1104_v33, 7 }
  0x6b   : > { %v1107_v45 = vld [vmem:[%s4255_s14 + $0xc7] sm:$0x1]  ;;  %689 = vrot.lane.b32.xlu1 %v682_v40, %s4215_s25  ;;  %v1108_v47 = vld [vmem:[%s4255_s14 + $0xd7] sm:$0x1]  ;;  %v662_v50 = vsel %vm227_vm2, %v661_v35, %v660_v46  ;;  %v1173_v52 = vrot.slane %v1105_v39, 6  ;;  %v1175_v53 = vrot.slane %v1106_v44, 5 }
  0x6c   : > { %v1109_v48 = vld [vmem:[%s4255_s14 + $0xe7] sm:$0x1]  ;;  %v1110_v49 = vld [vmem:[%s4255_s14 + $0xf7] sm:$0x1]  ;;  %v664_v55 = vsel %vm5840_vm3, %v663_v36, %v662_v50  ;;  %v1177_v56 = vrot.slane %v1107_v45, 4  ;;  %v1179_v57 = vrot.slane %v1108_v47, 3  ;;  %v1172_v61 = vsel %vm221_vm0, %v1171_v51, %v1103_v38 }
  0x6d   : > { %v1095_v54 = vld [vmem:[%s4255_s14 + $0x7] sm:$0x1]  ;;  %v1181_v58 = vrot.slane %v1109_v48, 2  ;;  %v1096_v59 = vld [vmem:[%s4255_s14 + $0x17] sm:$0x1]  ;;  %v666_v60 = vsel %vm5839_vm4, %v665_v37, %v664_v55  ;;  %v1183_v62 = vrot.slane %v1110_v49, 1  ;;  %v1174_v3 = vsel %vm224_vm1, %v1173_v52, %v1172_v61 }
  0x6e   : > { %v1097_v63 = vld [vmem:[%s4255_s14 + $0x27] sm:$0x1]  ;;  %v1098_v0 = vld [vmem:[%s4255_s14 + $0x37] sm:$0x1]  ;;  %v1157_v1 = vrot.slane %v1096_v59, 7  ;;  %v668_v2 = vsel %vm236_vm5, %v667_v42, %v666_v60  ;;  %v1176_v8 = vsel %vm227_vm2, %v1175_v53, %v1174_v3 }
  0x6f   : > { %v1099_v4 = vld [vmem:[%s4255_s14 + $0x47] sm:$0x1]  ;;  %v1100_v5 = vld [vmem:[%s4255_s14 + $0x57] sm:$0x1]  ;;  %v670_v7 = vsel %vm239_vm6, %v669_v43, %v668_v2  ;;  %v1159_v11 = vrot.slane %v1097_v63, 6  ;;  %v1178_v12 = vsel %vm5840_vm3, %v1177_v56, %v1176_v8  ;;  %v1161_v13 = vrot.slane %v1098_v0, 5 }
  0x70   : > { %v1101_v6 = vld [vmem:[%s4255_s14 + $0x67] sm:$0x1]  ;;  %v1102_v9 = vld [vmem:[%s4255_s14 + $0x77] sm:$0x1]  ;;  %v1158_v10 = vsel %vm221_vm0, %v1157_v1, %v1095_v54  ;;  %687 = vrot.lane.b32.xlu0 %v670_v7, %s4215_s25  ;;  %v1163_v14 = vrot.slane %v1099_v4, 4  ;;  %v1165_v15 = vrot.slane %v1100_v5, 3  ;;  %v1180_v18 = vsel %vm5839_vm4, %v1179_v57, %v1178_v12 }
  0x71   : > { %v1655_v16 = vld [vmem:[%s4255_s14 + $0x18b] sm:$0x1]  ;;  %v1656_v17 = vld [vmem:[%s4255_s14 + $0x19b] sm:$0x1]  ;;  %v1160_v19 = vsel %vm224_vm1, %v1159_v11, %v1158_v10  ;;  %v1167_v20 = vrot.slane %v1101_v6, 2  ;;  %v1169_v21 = vrot.slane %v1102_v9, 1  ;;  %v1182_v24 = vsel %vm236_vm5, %v1181_v58, %v1180_v18 }
  0x72   : > { %v1657_v22 = vld [vmem:[%s4255_s14 + $0x1ab] sm:$0x1]  ;;  %v1658_v23 = vld [vmem:[%s4255_s14 + $0x1bb] sm:$0x1]  ;;  %v1162_v25 = vsel %vm227_vm2, %v1161_v13, %v1160_v19  ;;  %v1184_v29 = vsel %vm239_vm6, %v1183_v62, %v1182_v24  ;;  %v1735_v31 = vrot.slane %v1656_v17, 7 }
  0x73   : > { %v1659_v26 = vld [vmem:[%s4255_s14 + $0x1cb] sm:$0x1]  ;;  %v1660_v27 = vld [vmem:[%s4255_s14 + $0x1db] sm:$0x1]  ;;  %v1164_v30 = vsel %vm5840_vm3, %v1163_v14, %v1162_v25  ;;  %v1737_v32 = vrot.slane %v1657_v22, 6  ;;  %1213 = vrot.lane.b32.xlu1 %v1184_v29, %s4205_s15  ;;  %v1739_v36 = vrot.slane %v1658_v23, 5 }
  0x74   : > { %v1661_v28 = vld [vmem:[%s4255_s14 + $0x1eb] sm:$0x1]  ;;  %v1648_v34 = vld [vmem:[%s4255_s14 + $0x11b] sm:$0x1]  ;;  %v1166_v35 = vsel %vm5839_vm4, %v1165_v15, %v1164_v30  ;;  %v1741_v37 = vrot.slane %v1659_v26, 4  ;;  %v1743_v38 = vrot.slane %v1660_v27, 3  ;;  %v1736_v41 = vsel %vm221_vm0, %v1735_v31, %v1655_v16 }
  0x75   : > { %v1647_v33 = vld [vmem:[%s4255_s14 + $0x10b] sm:$0x1]  ;;  %v1168_v40 = vsel %vm236_vm5, %v1167_v20, %v1166_v35  ;;  %v1745_v42 = vrot.slane %v1661_v28, 2  ;;  %v1650_v43 = vld [vmem:[%s4255_s14 + $0x13b] sm:$0x1]  ;;  %v1721_v45 = vrot.slane %v1648_v34, 7  ;;  %v1738_v47 = vsel %vm224_vm1, %v1737_v32, %v1736_v41 }
  0x76   : > { %v1649_v39 = vld [vmem:[%s4255_s14 + $0x12b] sm:$0x1]  ;;  %v1170_v46 = vsel %vm239_vm6, %v1169_v21, %v1168_v40  ;;  %v1652_v48 = vld [vmem:[%s4255_s14 + $0x15b] sm:$0x1]  ;;  %v1740_v51 = vsel %vm227_vm2, %v1739_v36, %v1738_v47  ;;  %v1725_v54 = vrot.slane %v1650_v43, 5 }
  0x77   : > { %v1651_v44 = vld [vmem:[%s4255_s14 + $0x14b] sm:$0x1]  ;;  %v1654_v50 = vld [vmem:[%s4255_s14 + $0x17b] sm:$0x1]  ;;  %1211 = vrot.lane.b32.xlu0 %v1170_v46, %s4205_s15  ;;  %v1722_v52 = vsel %vm221_vm0, %v1721_v45, %v1647_v33  ;;  %v1723_v53 = vrot.slane %v1649_v39, 6  ;;  %v1742_v57 = vsel %vm5840_vm3, %v1741_v37, %v1740_v51  ;;  %v1729_v59 = vrot.slane %v1652_v48, 3 }
  0x78   : > { %v1653_v49 = vld [vmem:[%s4255_s14 + $0x16b] sm:$0x1]  ;;  %v2063_v55 = vld [vmem:[%s4255_s14 + $0x18e] sm:$0x1]  ;;  %v2064_v56 = vld [vmem:[%s4255_s14 + $0x19e] sm:$0x1]  ;;  %v1744_v62 = vsel %vm5839_vm4, %v1743_v38, %v1742_v57 }
  0x79   : > { %v1727_v58 = vrot.slane %v1651_v44, 4  ;;  %v1731_v60 = vrot.slane %v1653_v49, 2  ;;  %v2065_v61 = vld [vmem:[%s4255_s14 + $0x1ae] sm:$0x1]  ;;  %v1724_v63 = vsel %vm224_vm1, %v1723_v53, %v1722_v52  ;;  %v1733_v0 = vrot.slane %v1654_v50, 1 }
  0x7a   : > { %v2066_v1 = vld [vmem:[%s4255_s14 + $0x1be] sm:$0x1]  ;;  %v2067_v2 = vld [vmem:[%s4255_s14 + $0x1ce] sm:$0x1]  ;;  %v2143_v3 = vrot.slane %v2064_v56, 7  ;;  %v1746_v4 = vsel %vm236_vm5, %v1745_v42, %v1744_v62  ;;  %v1726_v5 = vsel %vm227_vm2, %v1725_v54, %v1724_v63  ;;  %v2145_v8 = vrot.slane %v2065_v61, 6 }
  0x7b   : > { %v2068_v6 = vld [vmem:[%s4255_s14 + $0x1de] sm:$0x1]  ;;  %v2069_v7 = vld [vmem:[%s4255_s14 + $0x1ee] sm:$0x1]  ;;  %v2147_v9 = vrot.slane %v2066_v1, 5  ;;  %1753 = vrot.lane.b32.xlu1 %v1746_v4, %s4216_s26  ;;  %v1728_v10 = vsel %vm5840_vm3, %v1727_v58, %v1726_v5  ;;  %v2149_v12 = vrot.slane %v2067_v2, 4 }
  0x7c   : > { %v2144_v11 = vsel %vm221_vm0, %v2143_v3, %v2063_v55  ;;  %v2151_v13 = vrot.slane %v2068_v6, 3  ;;  %v2055_v14 = vld [vmem:[%s4255_s14 + $0x10e] sm:$0x1]  ;;  %v2056_v15 = vld [vmem:[%s4255_s14 + $0x11e] sm:$0x1]  ;;  %v1730_v16 = vsel %vm5839_vm4, %v1729_v59, %v1728_v10  ;;  %v2153_v18 = vrot.slane %v2069_v7, 2 }
  0x7d   : > { %v2146_v17 = vsel %vm224_vm1, %v2145_v8, %v2144_v11  ;;  %v2057_v19 = vld [vmem:[%s4255_s14 + $0x12e] sm:$0x1]  ;;  %v2058_v20 = vld [vmem:[%s4255_s14 + $0x13e] sm:$0x1]  ;;  %v2129_v21 = vrot.slane %v2056_v15, 7  ;;  %v1732_v22 = vsel %vm236_vm5, %v1731_v60, %v1730_v16  ;;  %v4218_v4 = vmov 0.0  }
  0x7e   : > { %v2148_v23 = vsel %vm227_vm2, %v2147_v9, %v2146_v17  ;;  %v2059_v24 = vld [vmem:[%s4255_s14 + $0x14e] sm:$0x1]  ;;  %v2060_v25 = vld [vmem:[%s4255_s14 + $0x15e] sm:$0x1]  ;;  %v1734_v27 = vsel %vm239_vm6, %v1733_v0, %v1732_v22  ;;  %v2131_v31 = vrot.slane %v2057_v19, 6  ;;  %v2133_v33 = vrot.slane %v2058_v20, 5 }
  0x7f   : > { %v2061_v26 = vld [vmem:[%s4255_s14 + $0x16e] sm:$0x1]  ;;  %v2150_v28 = vsel %vm5840_vm3, %v2149_v12, %v2148_v23  ;;  %v2062_v29 = vld [vmem:[%s4255_s14 + $0x17e] sm:$0x1]  ;;  %v2130_v30 = vsel %vm221_vm0, %v2129_v21, %v2055_v14  ;;  %1751 = vrot.lane.b32.xlu0 %v1734_v27, %s4216_s26  ;;  %v2135_v34 = vrot.slane %v2059_v24, 4  ;;  %v2137_v35 = vrot.slane %v2060_v25, 3 }
  0x80   : > { %v2152_v32 = vsel %vm5839_vm4, %v2151_v13, %v2150_v28  ;;  %v166_v36 = vld [vmem:[%s4255_s14 + $0x80] sm:$0x1]  ;;  %v167_v37 = vld [vmem:[%s4255_s14 + $0x90] sm:$0x1]  ;;  %v2132_v39 = vsel %vm224_vm1, %v2131_v31, %v2130_v30  ;;  %v2139_v40 = vrot.slane %v2061_v26, 2  ;;  %v2141_v41 = vrot.slane %v2062_v29, 1 }
  0x81   : > { %v2154_v38 = vsel %vm236_vm5, %v2153_v18, %v2152_v32  ;;  %v168_v42 = vld [vmem:[%s4255_s14 + $0xa0] sm:$0x1]  ;;  %v169_v43 = vld [vmem:[%s4255_s14 + $0xb0] sm:$0x1]  ;;  %v2134_v44 = vsel %vm227_vm2, %v2133_v33, %v2132_v39  ;;  %v241_v50 = vrot.slane %v167_v37, 7  ;;  %156 = vst [vmem:[#allocation2 + $0x50] sm:$0xff] %v4218_v4 }
  0x82   : > { %2161 = vrot.lane.b32.xlu1 %v2154_v38, %s4217_s27  ;;  %v170_v45 = vld [vmem:[%s4255_s14 + $0xc0] sm:$0x1]  ;;  %v171_v46 = vld [vmem:[%s4255_s14 + $0xd0] sm:$0x1]  ;;  %v2136_v48 = vsel %vm5840_vm3, %v2135_v34, %v2134_v44  ;;  %v243_v51 = vrot.slane %v168_v42, 6  ;;  %v245_v52 = vrot.slane %v169_v43, 5 }
  0x83   : > { %v172_v47 = vld [vmem:[%s4255_s14 + $0xe0] sm:$0x1]  ;;  %v173_v49 = vld [vmem:[%s4255_s14 + $0xf0] sm:$0x1]  ;;  %v2138_v53 = vsel %vm5839_vm4, %v2137_v35, %v2136_v48  ;;  %v247_v54 = vrot.slane %v170_v45, 4  ;;  %v249_v55 = vrot.slane %v171_v46, 3  ;;  %v242_v59 = vsel %vm221_vm0, %v241_v50, %v166_v36 }
  0x84   : > { %v251_v56 = vrot.slane %v172_v47, 2  ;;  %v158_v57 = vld [vmem:[%s4255_s14] sm:$0x1]  ;;  %v2140_v58 = vsel %vm236_vm5, %v2139_v40, %v2138_v53  ;;  %v253_v60 = vrot.slane %v173_v49, 1  ;;  %v159_v61 = vld [vmem:[%s4255_s14 + $0x10] sm:$0x1]  ;;  %v244_v0 = vsel %vm224_vm1, %v243_v51, %v242_v59 }
  0x85   : > { %v160_v62 = vld [vmem:[%s4255_s14 + $0x20] sm:$0x1]  ;;  %v2142_v63 = vsel %vm239_vm6, %v2141_v41, %v2140_v58  ;;  %v161_v1 = vld [vmem:[%s4255_s14 + $0x30] sm:$0x1]  ;;  %145 = vst [vmem:[#allocation2] sm:$0xff] %v4218_v4  ;;  %146 = vst [vmem:[#allocation2 + $0x8] sm:$0xff] %v4218_v4  ;;  %v246_v5 = vsel %vm227_vm2, %v245_v52, %v244_v0 }
  0x86   : > { %v162_v2 = vld [vmem:[%s4255_s14 + $0x40] sm:$0x1]  ;;  %v163_v3 = vld [vmem:[%s4255_s14 + $0x50] sm:$0x1]  ;;  %149 = vst [vmem:[#allocation2 + $0x18] sm:$0xff] %v4218_v4  ;;  %150 = vst [vmem:[#allocation2 + $0x20] sm:$0xff] %v4218_v4  ;;  %2159 = vrot.lane.b32.xlu0 %v2142_v63, %s4217_s27  ;;  %v248_v10 = vsel %vm5840_vm3, %v247_v54, %v246_v5 }
  0x87   : > { %152 = vst [vmem:[#allocation2 + $0x30] sm:$0xff] %v4218_v4  ;;  %153 = vst [vmem:[#allocation2 + $0x38] sm:$0xff] %v4218_v4  ;;  %v164_v6 = vld [vmem:[%s4255_s14 + $0x60] sm:$0x1]  ;;  %v165_v7 = vld [vmem:[%s4255_s14 + $0x70] sm:$0x1]  ;;  %v250_v15 = vsel %vm5839_vm4, %v249_v55, %v248_v10 }
  0x88   : > { %155 = vst [vmem:[#allocation2 + $0x48] sm:$0xff] %v4218_v4  ;;  %v220_v8 = vrot.slane %v159_v61, 7  ;;  %v223_v9 = vrot.slane %v160_v62, 6  ;;  %v226_v11 = vrot.slane %v161_v1, 5  ;;  %v229_v12 = vrot.slane %v162_v2, 4 }
  0x89   : > { %v232_v13 = vrot.slane %v163_v3, 3  ;;  %v725_v14 = vld [vmem:[%s4255_s14 + $0x184] sm:$0x1]  ;;  %v235_v17 = vrot.slane %v164_v6, 2  ;;  %v238_v18 = vrot.slane %v165_v7, 1  ;;  %v252_v21 = vsel %vm236_vm5, %v251_v56, %v250_v15 }
  0x8a   : > { %v222_v16 = vsel %vm221_vm0, %v220_v8, %v158_v57  ;;  %v726_v19 = vld [vmem:[%s4255_s14 + $0x194] sm:$0x1]  ;;  %v727_v20 = vld [vmem:[%s4255_s14 + $0x1a4] sm:$0x1]  ;;  %v254_v26 = vsel %vm239_vm6, %v253_v60, %v252_v21  ;;  %v1237_v57 = vld [vmem:[%s4255_s14 + $0x88] sm:$0x1] }
  0x8b   : > { %v225_v22 = vsel %vm224_vm1, %v223_v9, %v222_v16  ;;  %v728_v23 = vld [vmem:[%s4255_s14 + $0x1b4] sm:$0x1]  ;;  %v729_v24 = vld [vmem:[%s4255_s14 + $0x1c4] sm:$0x1]  ;;  %v805_v29 = vrot.slane %v726_v19, 7  ;;  %v807_v30 = vrot.slane %v727_v20, 6  ;;  %283 = vrot.lane.b32.xlu1 %v254_v26, %s4207_s17 }
  0x8c   : > { %v730_v25 = vld [vmem:[%s4255_s14 + $0x1d4] sm:$0x1]  ;;  %v228_v27 = vsel %vm227_vm2, %v226_v11, %v225_v22  ;;  %v731_v28 = vld [vmem:[%s4255_s14 + $0x1e4] sm:$0x1]  ;;  %v809_v33 = vrot.slane %v728_v23, 5  ;;  %v811_v34 = vrot.slane %v729_v24, 4 }
  0x8d   : > { %v717_v31 = vld [vmem:[%s4255_s14 + $0x104] sm:$0x1]  ;;  %v231_v32 = vsel %vm5840_vm3, %v229_v12, %v228_v27  ;;  %v813_v35 = vrot.slane %v730_v25, 3  ;;  %v718_v36 = vld [vmem:[%s4255_s14 + $0x114] sm:$0x1]  ;;  %v806_v38 = vsel %vm221_vm0, %v805_v29, %v725_v14  ;;  %v815_v39 = vrot.slane %v731_v28, 2 }
  0x8e   : > { %v234_v37 = vsel %vm5839_vm4, %v232_v13, %v231_v32  ;;  %v719_v40 = vld [vmem:[%s4255_s14 + $0x124] sm:$0x1]  ;;  %v720_v41 = vld [vmem:[%s4255_s14 + $0x134] sm:$0x1]  ;;  %v791_v42 = vrot.slane %v718_v36, 7  ;;  %v808_v44 = vsel %vm224_vm1, %v807_v30, %v806_v38 }
  0x8f   : > { %v237_v43 = vsel %vm236_vm5, %v235_v17, %v234_v37  ;;  %v721_v45 = vld [vmem:[%s4255_s14 + $0x144] sm:$0x1]  ;;  %v722_v46 = vld [vmem:[%s4255_s14 + $0x154] sm:$0x1]  ;;  %v810_v49 = vsel %vm227_vm2, %v809_v33, %v808_v44  ;;  %v793_v52 = vrot.slane %v719_v40, 6  ;;  %v795_v54 = vrot.slane %v720_v41, 5 }
  0x90   : > { %v723_v47 = vld [vmem:[%s4255_s14 + $0x164] sm:$0x1]  ;;  %v240_v48 = vsel %vm239_vm6, %v238_v18, %v237_v43  ;;  %v724_v50 = vld [vmem:[%s4255_s14 + $0x174] sm:$0x1]  ;;  %v792_v51 = vsel %vm221_vm0, %v791_v42, %v717_v31  ;;  %v812_v53 = vsel %vm5840_vm3, %v811_v34, %v810_v49  ;;  %v797_v55 = vrot.slane %v721_v45, 4 }
  0x91   : > { %281 = vrot.lane.b32.xlu0 %v240_v48, %s4207_s17  ;;  %v799_v56 = vrot.slane %v722_v46, 3  ;;  %v1238_v58 = vld [vmem:[%s4255_s14 + $0x98] sm:$0x1]  ;;  %v814_v59 = vsel %vm5839_vm4, %v813_v35, %v812_v53  ;;  %v794_v60 = vsel %vm224_vm1, %v793_v52, %v792_v51  ;;  %v801_v61 = vrot.slane %v723_v47, 2  ;;  %v1239_v63 = vld [vmem:[%s4255_s14 + $0xa8] sm:$0x1] }
  0x92   : > { %v803_v62 = vrot.slane %v724_v50, 1  ;;  %v1240_v0 = vld [vmem:[%s4255_s14 + $0xb8] sm:$0x1]  ;;  %v816_v1 = vsel %vm236_vm5, %v815_v39, %v814_v59  ;;  %v796_v2 = vsel %vm227_vm2, %v795_v54, %v794_v60  ;;  %v1241_v3 = vld [vmem:[%s4255_s14 + $0xc8] sm:$0x1]  ;;  %v1305_v8 = vrot.slane %v1238_v58, 7 }
  0x93   : > { %v1242_v4 = vld [vmem:[%s4255_s14 + $0xd8] sm:$0x1]  ;;  %v1243_v5 = vld [vmem:[%s4255_s14 + $0xe8] sm:$0x1]  ;;  %823 = vrot.lane.b32.xlu1 %v816_v1, %s4219_s28  ;;  %v798_v6 = vsel %vm5840_vm3, %v797_v55, %v796_v2  ;;  %v1307_v9 = vrot.slane %v1239_v63, 6  ;;  %v1309_v10 = vrot.slane %v1240_v0, 5 }
  0x94   : > { %v1244_v7 = vld [vmem:[%s4255_s14 + $0xf8] sm:$0x1]  ;;  %v800_v11 = vsel %vm5839_vm4, %v799_v56, %v798_v6  ;;  %v1311_v12 = vrot.slane %v1241_v3, 4  ;;  %v1313_v13 = vrot.slane %v1242_v4, 3  ;;  %v1229_v14 = vld [vmem:[%s4255_s14 + $0x8] sm:$0x1]  ;;  %v1306_v16 = vsel %vm221_vm0, %v1305_v8, %v1237_v57 }
  0x95   : > { %v802_v15 = vsel %vm236_vm5, %v801_v61, %v800_v11  ;;  %v1315_v17 = vrot.slane %v1243_v5, 2  ;;  %v1317_v18 = vrot.slane %v1244_v7, 1  ;;  %v1230_v19 = vld [vmem:[%s4255_s14 + $0x18] sm:$0x1]  ;;  %v1231_v20 = vld [vmem:[%s4255_s14 + $0x28] sm:$0x1]  ;;  %v1308_v22 = vsel %vm224_vm1, %v1307_v9, %v1306_v16 }
  0x96   : > { %v804_v21 = vsel %vm239_vm6, %v803_v62, %v802_v15  ;;  %v1232_v23 = vld [vmem:[%s4255_s14 + $0x38] sm:$0x1]  ;;  %v1233_v24 = vld [vmem:[%s4255_s14 + $0x48] sm:$0x1]  ;;  %v1310_v26 = vsel %vm227_vm2, %v1309_v10, %v1308_v22  ;;  %v1291_v29 = vrot.slane %v1230_v19, 7  ;;  %v1293_v30 = vrot.slane %v1231_v20, 6 }
  0x97   : > { %v1234_v25 = vld [vmem:[%s4255_s14 + $0x58] sm:$0x1]  ;;  %821 = vrot.lane.b32.xlu0 %v804_v21, %s4219_s28  ;;  %v1235_v27 = vld [vmem:[%s4255_s14 + $0x68] sm:$0x1]  ;;  %v1312_v31 = vsel %vm5840_vm3, %v1311_v12, %v1310_v26  ;;  %v1295_v32 = vrot.slane %v1232_v23, 5  ;;  %v1297_v33 = vrot.slane %v1233_v24, 4 }
  0x98   : > { %v1236_v28 = vld [vmem:[%s4255_s14 + $0x78] sm:$0x1]  ;;  %v1299_v34 = vrot.slane %v1234_v25, 3  ;;  %v2197_v35 = vld [vmem:[%s4255_s14 + $0x18f] sm:$0x1]  ;;  %v1314_v36 = vsel %vm5839_vm4, %v1313_v13, %v1312_v31  ;;  %v1292_v37 = vsel %vm221_vm0, %v1291_v29, %v1229_v14  ;;  %v1301_v38 = vrot.slane %v1235_v27, 2 }
  0x99   : > { %v1303_v39 = vrot.slane %v1236_v28, 1  ;;  %v2198_v40 = vld [vmem:[%s4255_s14 + $0x19f] sm:$0x1]  ;;  %v2199_v41 = vld [vmem:[%s4255_s14 + $0x1af] sm:$0x1]  ;;  %v1316_v42 = vsel %vm236_vm5, %v1315_v17, %v1314_v36  ;;  %v1294_v43 = vsel %vm224_vm1, %v1293_v30, %v1292_v37 }
  0x9a   : > { %v2200_v44 = vld [vmem:[%s4255_s14 + $0x1bf] sm:$0x1]  ;;  %v2201_v45 = vld [vmem:[%s4255_s14 + $0x1cf] sm:$0x1]  ;;  %v1318_v47 = vsel %vm239_vm6, %v1317_v18, %v1316_v42  ;;  %v1296_v48 = vsel %vm227_vm2, %v1295_v32, %v1294_v43  ;;  %v2277_v50 = vrot.slane %v2198_v40, 7  ;;  %v2279_v51 = vrot.slane %v2199_v41, 6 }
  0x9b   : > { %v2202_v46 = vld [vmem:[%s4255_s14 + $0x1df] sm:$0x1]  ;;  %v2203_v49 = vld [vmem:[%s4255_s14 + $0x1ef] sm:$0x1]  ;;  %1347 = vrot.lane.b32.xlu1 %v1318_v47, %s4208_s18  ;;  %v1298_v53 = vsel %vm5840_vm3, %v1297_v33, %v1296_v48  ;;  %v2281_v54 = vrot.slane %v2200_v44, 5  ;;  %v2283_v55 = vrot.slane %v2201_v45, 4 }
  0x9c   : > { %v2189_v52 = vld [vmem:[%s4255_s14 + $0x10f] sm:$0x1]  ;;  %v2285_v56 = vrot.slane %v2202_v46, 3  ;;  %v2190_v57 = vld [vmem:[%s4255_s14 + $0x11f] sm:$0x1]  ;;  %v1300_v58 = vsel %vm5839_vm4, %v1299_v34, %v1298_v53  ;;  %v2278_v59 = vsel %vm221_vm0, %v2277_v50, %v2197_v35  ;;  %v2287_v60 = vrot.slane %v2203_v49, 2 }
  0x9d   : > { %v2191_v61 = vld [vmem:[%s4255_s14 + $0x12f] sm:$0x1]  ;;  %v2192_v62 = vld [vmem:[%s4255_s14 + $0x13f] sm:$0x1]  ;;  %v2263_v63 = vrot.slane %v2190_v57, 7  ;;  %v1302_v0 = vsel %vm236_vm5, %v1301_v38, %v1300_v58  ;;  %v2280_v1 = vsel %vm224_vm1, %v2279_v51, %v2278_v59  ;;  %v4856_v57 = vpop.permute.xlu0 %1083 }
  0x9e   : > { %v2193_v2 = vld [vmem:[%s4255_s14 + $0x14f] sm:$0x1]  ;;  %v2194_v3 = vld [vmem:[%s4255_s14 + $0x15f] sm:$0x1]  ;;  %v1304_v5 = vsel %vm239_vm6, %v1303_v39, %v1302_v0  ;;  %v2282_v6 = vsel %vm227_vm2, %v2281_v54, %v2280_v1  ;;  %v2265_v9 = vrot.slane %v2191_v61, 6  ;;  %v2267_v11 = vrot.slane %v2192_v62, 5  ;;  %v4862_v0 = vpop.permute.xlu1 %1217 }
  0x9f   : > { %v2195_v4 = vld [vmem:[%s4255_s14 + $0x16f] sm:$0x1]  ;;  %v2196_v7 = vld [vmem:[%s4255_s14 + $0x17f] sm:$0x1]  ;;  %v2264_v8 = vsel %vm221_vm0, %v2263_v63, %v2189_v52  ;;  %1345 = vrot.lane.b32.xlu0 %v1304_v5, %s4208_s18  ;;  %v2284_v10 = vsel %vm5840_vm3, %v2283_v55, %v2282_v6  ;;  %v2269_v12 = vrot.slane %v2193_v2, 4  ;;  %v2271_v13 = vrot.slane %v2194_v3, 3 }
  0xa0   : > { %v307_v14 = vld [vmem:[%s4255_s14 + $0x81] sm:$0x1]  ;;  %v308_v15 = vld [vmem:[%s4255_s14 + $0x91] sm:$0x1]  ;;  %v2286_v16 = vsel %vm5839_vm4, %v2285_v56, %v2284_v10  ;;  %v2266_v17 = vsel %vm224_vm1, %v2265_v9, %v2264_v8  ;;  %v2273_v18 = vrot.slane %v2195_v4, 2  ;;  %v2275_v19 = vrot.slane %v2196_v7, 1 }
  0xa1   : > { %v309_v20 = vld [vmem:[%s4255_s14 + $0xa1] sm:$0x1]  ;;  %v310_v21 = vld [vmem:[%s4255_s14 + $0xb1] sm:$0x1]  ;;  %v2288_v22 = vsel %vm236_vm5, %v2287_v60, %v2286_v16  ;;  %v2268_v23 = vsel %vm227_vm2, %v2267_v11, %v2266_v17  ;;  %v375_v29 = vrot.slane %v308_v15, 7 }
  0xa2   : > { %v311_v24 = vld [vmem:[%s4255_s14 + $0xc1] sm:$0x1]  ;;  %v312_v25 = vld [vmem:[%s4255_s14 + $0xd1] sm:$0x1]  ;;  %2295 = vrot.lane.b32.xlu1 %v2288_v22, %s4220_s29  ;;  %v2270_v27 = vsel %vm5840_vm3, %v2269_v12, %v2268_v23  ;;  %v377_v30 = vrot.slane %v309_v20, 6  ;;  %v379_v31 = vrot.slane %v310_v21, 5 }
  0xa3   : > { %v313_v26 = vld [vmem:[%s4255_s14 + $0xe1] sm:$0x1]  ;;  %v314_v28 = vld [vmem:[%s4255_s14 + $0xf1] sm:$0x1]  ;;  %v2272_v32 = vsel %vm5839_vm4, %v2271_v13, %v2270_v27  ;;  %v381_v33 = vrot.slane %v311_v24, 4  ;;  %v383_v34 = vrot.slane %v312_v25, 3  ;;  %v376_v37 = vsel %vm221_vm0, %v375_v29, %v307_v14 }
  0xa4   : > { %v299_v35 = vld [vmem:[%s4255_s14 + $0x1] sm:$0x1]  ;;  %v2274_v36 = vsel %vm236_vm5, %v2273_v18, %v2272_v32  ;;  %v385_v38 = vrot.slane %v313_v26, 2  ;;  %v387_v39 = vrot.slane %v314_v28, 1  ;;  %v300_v40 = vld [vmem:[%s4255_s14 + $0x11] sm:$0x1]  ;;  %v378_v43 = vsel %vm224_vm1, %v377_v30, %v376_v37  ;;  %v4885_v28 = vpop.permute.xlu0 %1081 }
  0xa5   : > { %v301_v41 = vld [vmem:[%s4255_s14 + $0x21] sm:$0x1]  ;;  %v2276_v42 = vsel %vm239_vm6, %v2275_v19, %v2274_v36  ;;  %v302_v44 = vld [vmem:[%s4255_s14 + $0x31] sm:$0x1]  ;;  %v380_v47 = vsel %vm227_vm2, %v379_v31, %v378_v43  ;;  %v361_v50 = vrot.slane %v300_v40, 7 }
  0xa6   : > { %v303_v45 = vld [vmem:[%s4255_s14 + $0x41] sm:$0x1]  ;;  %v304_v46 = vld [vmem:[%s4255_s14 + $0x51] sm:$0x1]  ;;  %2293 = vrot.lane.b32.xlu0 %v2276_v42, %s4220_s29  ;;  %v363_v51 = vrot.slane %v301_v41, 6  ;;  %v382_v52 = vsel %vm5840_vm3, %v381_v33, %v380_v47  ;;  %v365_v53 = vrot.slane %v302_v44, 5 }
  0xa7   : > { %v305_v48 = vld [vmem:[%s4255_s14 + $0x61] sm:$0x1]  ;;  %v306_v49 = vld [vmem:[%s4255_s14 + $0x71] sm:$0x1]  ;;  %v367_v54 = vrot.slane %v303_v45, 4  ;;  %v369_v55 = vrot.slane %v304_v46, 3  ;;  %v384_v58 = vsel %vm5839_vm4, %v383_v34, %v382_v52  ;;  %v362_v59 = vsel %vm221_vm0, %v361_v50, %v299_v35  ;;  %v4891_v35 = vpop.permute.xlu1 %287 }
  0xa8   : > { %v1371_v56 = vld [vmem:[%s4255_s14 + $0x89] sm:$0x1]  ;;  %v371_v60 = vrot.slane %v305_v48, 2  ;;  %v373_v61 = vrot.slane %v306_v49, 1  ;;  %v1372_v62 = vld [vmem:[%s4255_s14 + $0x99] sm:$0x1]  ;;  %v386_v1 = vsel %vm236_vm5, %v385_v38, %v384_v58  ;;  %v364_v2 = vsel %vm224_vm1, %v363_v51, %v362_v59 }
  0xa9   : > { %v1373_v63 = vld [vmem:[%s4255_s14 + $0xa9] sm:$0x1]  ;;  %v1374_v3 = vld [vmem:[%s4255_s14 + $0xb9] sm:$0x1]  ;;  %v388_v6 = vsel %vm239_vm6, %v387_v39, %v386_v1  ;;  %v366_v7 = vsel %vm227_vm2, %v365_v53, %v364_v2  ;;  %v1439_v10 = vrot.slane %v1372_v62, 7  ;;  %v4912_v1 = vpop.permute.xlu0 %285 }
  0xaa   : > { %v1375_v4 = vld [vmem:[%s4255_s14 + $0xc9] sm:$0x1]  ;;  %v1376_v5 = vld [vmem:[%s4255_s14 + $0xd9] sm:$0x1]  ;;  %v1441_v11 = vrot.slane %v1373_v63, 6  ;;  %417 = vrot.lane.b32.xlu1 %v388_v6, %s4209_s19  ;;  %v368_v12 = vsel %vm5840_vm3, %v367_v54, %v366_v7  ;;  %v1443_v13 = vrot.slane %v1374_v3, 5 }
  0xab   : > { %v1377_v8 = vld [vmem:[%s4255_s14 + $0xe9] sm:$0x1]  ;;  %v1378_v9 = vld [vmem:[%s4255_s14 + $0xf9] sm:$0x1]  ;;  %v1445_v14 = vrot.slane %v1375_v4, 4  ;;  %v1447_v15 = vrot.slane %v1376_v5, 3  ;;  %v370_v17 = vsel %vm5839_vm4, %v369_v55, %v368_v12  ;;  %v1440_v18 = vsel %vm221_vm0, %v1439_v10, %v1371_v56 }
  0xac   : > { %v1363_v16 = vld [vmem:[%s4255_s14 + $0x9] sm:$0x1]  ;;  %v1449_v19 = vrot.slane %v1377_v8, 2  ;;  %v1451_v20 = vrot.slane %v1378_v9, 1  ;;  %v1364_v21 = vld [vmem:[%s4255_s14 + $0x19] sm:$0x1]  ;;  %v372_v23 = vsel %vm236_vm5, %v371_v60, %v370_v17  ;;  %v1442_v24 = vsel %vm224_vm1, %v1441_v11, %v1440_v18  ;;  %v4918_v8 = vpop.permute.xlu1 %1351 }
  0xad   : > { %v1365_v22 = vld [vmem:[%s4255_s14 + $0x29] sm:$0x1]  ;;  %v1366_v25 = vld [vmem:[%s4255_s14 + $0x39] sm:$0x1]  ;;  %v374_v29 = vsel %vm239_vm6, %v373_v61, %v372_v23  ;;  %v1444_v30 = vsel %vm227_vm2, %v1443_v13, %v1442_v24  ;;  %v1425_v33 = vrot.slane %v1364_v21, 7  ;;  %296 = vst.msk [vmem:[#allocation2 + $0x30] sm:$0xff] %vm293_vm14, %v4912_v1 }
  0xae   : > { %v1367_v26 = vld [vmem:[%s4255_s14 + $0x49] sm:$0x1]  ;;  %v1368_v27 = vld [vmem:[%s4255_s14 + $0x59] sm:$0x1]  ;;  %v1427_v34 = vrot.slane %v1365_v22, 6  ;;  %415 = vrot.lane.b32.xlu0 %v374_v29, %s4209_s19  ;;  %v1446_v36 = vsel %vm5840_vm3, %v1445_v14, %v1444_v30  ;;  %v1429_v37 = vrot.slane %v1366_v25, 5 }
  0xaf   : > { %v1369_v31 = vld [vmem:[%s4255_s14 + $0x69] sm:$0x1]  ;;  %v1370_v32 = vld [vmem:[%s4255_s14 + $0x79] sm:$0x1]  ;;  %v1431_v38 = vrot.slane %v1367_v26, 4  ;;  %v1433_v39 = vrot.slane %v1368_v27, 3  ;;  %v1448_v41 = vsel %vm5839_vm4, %v1447_v15, %v1446_v36  ;;  %v1426_v42 = vsel %vm221_vm0, %v1425_v33, %v1363_v16 }
  0xb0   : > { %v1773_v40 = vld [vmem:[%s4255_s14 + $0x8c] sm:$0x1]  ;;  %v1435_v43 = vrot.slane %v1369_v31, 2  ;;  %v1437_v44 = vrot.slane %v1370_v32, 1  ;;  %v1774_v45 = vld [vmem:[%s4255_s14 + $0x9c] sm:$0x1]  ;;  %v1450_v47 = vsel %vm236_vm5, %v1449_v19, %v1448_v41  ;;  %v1428_v48 = vsel %vm224_vm1, %v1427_v34, %v1426_v42 }
  0xb1   : > { %v1775_v46 = vld [vmem:[%s4255_s14 + $0xac] sm:$0x1]  ;;  %v1776_v49 = vld [vmem:[%s4255_s14 + $0xbc] sm:$0x1]  ;;  %v1452_v52 = vsel %vm239_vm6, %v1451_v20, %v1450_v47  ;;  %v1430_v53 = vsel %vm227_vm2, %v1429_v37, %v1428_v48  ;;  %v1841_v56 = vrot.slane %v1774_v45, 7  ;;  %v4947_v45 = vpop.permute.xlu1 %421 }
  0xb2   : > { %v1777_v50 = vld [vmem:[%s4255_s14 + $0xcc] sm:$0x1]  ;;  %v1778_v51 = vld [vmem:[%s4255_s14 + $0xdc] sm:$0x1]  ;;  %v1843_v58 = vrot.slane %v1775_v46, 6  ;;  %1481 = vrot.lane.b32.xlu1 %v1452_v52, %s4210_s20  ;;  %v1432_v59 = vsel %vm5840_vm3, %v1431_v38, %v1430_v53  ;;  %v1845_v60 = vrot.slane %v1776_v49, 5  ;;  %v4941_v38 = vpop.permute.xlu0 %1349 }
  0xb3   : > { %v1779_v54 = vld [vmem:[%s4255_s14 + $0xec] sm:$0x1]  ;;  %v1780_v55 = vld [vmem:[%s4255_s14 + $0xfc] sm:$0x1]  ;;  %v1847_v61 = vrot.slane %v1777_v50, 4  ;;  %v1849_v62 = vrot.slane %v1778_v51, 3  ;;  %v1434_v2 = vsel %vm5839_vm4, %v1433_v39, %v1432_v59  ;;  %v1842_v3 = vsel %vm221_vm0, %v1841_v56, %v1773_v40 }
  0xb4   : > { %v1765_v63 = vld [vmem:[%s4255_s14 + $0xc] sm:$0x1]  ;;  %v1851_v4 = vrot.slane %v1779_v54, 2  ;;  %v1853_v5 = vrot.slane %v1780_v55, 1  ;;  %v1766_v6 = vld [vmem:[%s4255_s14 + $0x1c] sm:$0x1]  ;;  %v1436_v9 = vsel %vm236_vm5, %v1435_v43, %v1434_v2  ;;  %v1844_v10 = vsel %vm224_vm1, %v1843_v58, %v1842_v3 }
  0xb5   : > { %v1767_v7 = vld [vmem:[%s4255_s14 + $0x2c] sm:$0x1]  ;;  %v1768_v11 = vld [vmem:[%s4255_s14 + $0x3c] sm:$0x1]  ;;  %v1438_v14 = vsel %vm239_vm6, %v1437_v44, %v1436_v9  ;;  %v1846_v15 = vsel %vm227_vm2, %v1845_v60, %v1844_v10  ;;  %v1827_v18 = vrot.slane %v1766_v6, 7 }
  0xb6   : > { %v1769_v12 = vld [vmem:[%s4255_s14 + $0x4c] sm:$0x1]  ;;  %v1770_v13 = vld [vmem:[%s4255_s14 + $0x5c] sm:$0x1]  ;;  %v1829_v19 = vrot.slane %v1767_v7, 6  ;;  %1479 = vrot.lane.b32.xlu0 %v1438_v14, %s4210_s20  ;;  %v1848_v20 = vsel %vm5840_vm3, %v1847_v61, %v1846_v15  ;;  %v1831_v21 = vrot.slane %v1768_v11, 5 }
  0xb7   : > { %v1771_v16 = vld [vmem:[%s4255_s14 + $0x6c] sm:$0x1]  ;;  %v1772_v17 = vld [vmem:[%s4255_s14 + $0x7c] sm:$0x1]  ;;  %v1833_v22 = vrot.slane %v1769_v12, 4  ;;  %v1835_v23 = vrot.slane %v1770_v13, 3  ;;  %v1850_v25 = vsel %vm5839_vm4, %v1849_v62, %v1848_v20  ;;  %v1828_v26 = vsel %vm221_vm0, %v1827_v18, %v1765_v63  ;;  %v4968_v13 = vpop.permute.xlu0 %419  ;;  %v4974_v20 = vpop.permute.xlu1 %1215 }
  0xb8   : > { %v441_v24 = vld [vmem:[%s4255_s14 + $0x82] sm:$0x1]  ;;  %v1837_v27 = vrot.slane %v1771_v16, 2  ;;  %v1839_v29 = vrot.slane %v1772_v17, 1  ;;  %v442_v30 = vld [vmem:[%s4255_s14 + $0x92] sm:$0x1]  ;;  %v1852_v32 = vsel %vm236_vm5, %v1851_v4, %v1850_v25  ;;  %v1830_v33 = vsel %vm224_vm1, %v1829_v19, %v1828_v26 }
  0xb9   : > { %v443_v31 = vld [vmem:[%s4255_s14 + $0xa2] sm:$0x1]  ;;  %v444_v34 = vld [vmem:[%s4255_s14 + $0xb2] sm:$0x1]  ;;  %v1854_v39 = vsel %vm239_vm6, %v1853_v5, %v1852_v32  ;;  %v1832_v40 = vsel %vm227_vm2, %v1831_v21, %v1830_v33  ;;  %v509_v43 = vrot.slane %v442_v30, 7 }
  0xba   : > { %v445_v36 = vld [vmem:[%s4255_s14 + $0xc2] sm:$0x1]  ;;  %v446_v37 = vld [vmem:[%s4255_s14 + $0xd2] sm:$0x1]  ;;  %v511_v44 = vrot.slane %v443_v31, 6  ;;  %1883 = vrot.lane.b32.xlu1 %v1854_v39, %s4211_s21  ;;  %v1834_v46 = vsel %vm5840_vm3, %v1833_v22, %v1832_v40  ;;  %v513_v47 = vrot.slane %v444_v34, 5 }
  0xbb   : > { %v447_v41 = vld [vmem:[%s4255_s14 + $0xe2] sm:$0x1]  ;;  %v448_v42 = vld [vmem:[%s4255_s14 + $0xf2] sm:$0x1]  ;;  %v515_v48 = vrot.slane %v445_v36, 4  ;;  %v517_v49 = vrot.slane %v446_v37, 3  ;;  %v1836_v51 = vsel %vm5839_vm4, %v1835_v23, %v1834_v46  ;;  %v510_v52 = vsel %vm221_vm0, %v509_v43, %v441_v24 }
  0xbc   : > { %v433_v50 = vld [vmem:[%s4255_s14 + $0x2] sm:$0x1]  ;;  %v519_v53 = vrot.slane %v447_v41, 2  ;;  %v521_v54 = vrot.slane %v448_v42, 1  ;;  %v434_v55 = vld [vmem:[%s4255_s14 + $0x12] sm:$0x1]  ;;  %v1838_v58 = vsel %vm236_vm5, %v1837_v27, %v1836_v51  ;;  %v512_v59 = vsel %vm224_vm1, %v511_v44, %v510_v52  ;;  %v4997_v52 = vpop.permute.xlu0 %1483 }
  0xbd   : > { %v435_v56 = vld [vmem:[%s4255_s14 + $0x22] sm:$0x1]  ;;  %v436_v60 = vld [vmem:[%s4255_s14 + $0x32] sm:$0x1]  ;;  %v1840_v63 = vsel %vm239_vm6, %v1839_v29, %v1838_v58  ;;  %v514_v2 = vsel %vm227_vm2, %v513_v47, %v512_v59  ;;  %v495_v5 = vrot.slane %v434_v55, 7 }
  0xbe   : > { %v437_v61 = vld [vmem:[%s4255_s14 + $0x42] sm:$0x1]  ;;  %v438_v62 = vld [vmem:[%s4255_s14 + $0x52] sm:$0x1]  ;;  %v497_v6 = vrot.slane %v435_v56, 6  ;;  %1881 = vrot.lane.b32.xlu0 %v1840_v63, %s4211_s21  ;;  %v516_v7 = vsel %vm5840_vm3, %v515_v48, %v514_v2  ;;  %v499_v9 = vrot.slane %v436_v60, 5  ;;  %v5003_v60 = vpop.permute.xlu1 %1485 }
  0xbf   : > { %v439_v3 = vld [vmem:[%s4255_s14 + $0x62] sm:$0x1]  ;;  %v440_v4 = vld [vmem:[%s4255_s14 + $0x72] sm:$0x1]  ;;  %v501_v10 = vrot.slane %v437_v61, 4  ;;  %v503_v11 = vrot.slane %v438_v62, 3  ;;  %v518_v14 = vsel %vm5839_vm4, %v517_v49, %v516_v7  ;;  %v496_v15 = vsel %vm221_vm0, %v495_v5, %v433_v50 }
  0xc0   : > { %v1505_v12 = vld [vmem:[%s4255_s14 + $0x8a] sm:$0x1]  ;;  %v505_v16 = vrot.slane %v439_v3, 2  ;;  %v507_v17 = vrot.slane %v440_v4, 1  ;;  %v1506_v18 = vld [vmem:[%s4255_s14 + $0x9a] sm:$0x1]  ;;  %v520_v21 = vsel %vm236_vm5, %v519_v53, %v518_v14  ;;  %v498_v22 = vsel %vm224_vm1, %v497_v6, %v496_v15 }
  0xc1   : > { %v1507_v19 = vld [vmem:[%s4255_s14 + $0xaa] sm:$0x1]  ;;  %v1508_v23 = vld [vmem:[%s4255_s14 + $0xba] sm:$0x1]  ;;  %v522_v26 = vsel %vm239_vm6, %v521_v54, %v520_v21  ;;  %v500_v27 = vsel %vm227_vm2, %v499_v9, %v498_v22  ;;  %v1573_v31 = vrot.slane %v1506_v18, 7 }
  0xc2   : > { %v1509_v24 = vld [vmem:[%s4255_s14 + $0xca] sm:$0x1]  ;;  %v1510_v25 = vld [vmem:[%s4255_s14 + $0xda] sm:$0x1]  ;;  %v1575_v32 = vrot.slane %v1507_v19, 6  ;;  %551 = vrot.lane.b32.xlu1 %v522_v26, %s4212_s22  ;;  %v502_v33 = vsel %vm5840_vm3, %v501_v10, %v500_v27  ;;  %v1577_v34 = vrot.slane %v1508_v23, 5 }
  0xc3   : > { %v1511_v29 = vld [vmem:[%s4255_s14 + $0xea] sm:$0x1]  ;;  %v1512_v30 = vld [vmem:[%s4255_s14 + $0xfa] sm:$0x1]  ;;  %v1579_v36 = vrot.slane %v1509_v24, 4  ;;  %v1581_v37 = vrot.slane %v1510_v25, 3  ;;  %v504_v40 = vsel %vm5839_vm4, %v503_v11, %v502_v33  ;;  %v1574_v41 = vsel %vm221_vm0, %v1573_v31, %v1505_v12 }
  0xc4   : > { %v1497_v39 = vld [vmem:[%s4255_s14 + $0xa] sm:$0x1]  ;;  %v1583_v42 = vrot.slane %v1511_v29, 2  ;;  %v1585_v43 = vrot.slane %v1512_v30, 1  ;;  %v1498_v44 = vld [vmem:[%s4255_s14 + $0x1a] sm:$0x1]  ;;  %v506_v47 = vsel %vm236_vm5, %v505_v16, %v504_v40  ;;  %v1576_v48 = vsel %vm224_vm1, %v1575_v32, %v1574_v41  ;;  %v5024_v30 = vpop.permute.xlu0 %1885 }
  0xc5   : > { %v1499_v46 = vld [vmem:[%s4255_s14 + $0x2a] sm:$0x1]  ;;  %v1500_v49 = vld [vmem:[%s4255_s14 + $0x3a] sm:$0x1]  ;;  %v508_v53 = vsel %vm239_vm6, %v507_v17, %v506_v47  ;;  %v1578_v54 = vsel %vm227_vm2, %v1577_v34, %v1576_v48  ;;  %v1559_v58 = vrot.slane %v1498_v44, 7 }
  0xc6   : > { %v1501_v50 = vld [vmem:[%s4255_s14 + $0x4a] sm:$0x1]  ;;  %v1502_v51 = vld [vmem:[%s4255_s14 + $0x5a] sm:$0x1]  ;;  %v1561_v59 = vrot.slane %v1499_v46, 6  ;;  %549 = vrot.lane.b32.xlu0 %v508_v53, %s4212_s22  ;;  %v1580_v61 = vsel %vm5840_vm3, %v1579_v36, %v1578_v54  ;;  %v1563_v62 = vrot.slane %v1500_v49, 5 }
  0xc7   : > { %v1503_v55 = vld [vmem:[%s4255_s14 + $0x6a] sm:$0x1]  ;;  %v1504_v56 = vld [vmem:[%s4255_s14 + $0x7a] sm:$0x1]  ;;  %v1565_v63 = vrot.slane %v1501_v50, 4  ;;  %v1567_v2 = vrot.slane %v1502_v51, 3  ;;  %v1582_v4 = vsel %vm5839_vm4, %v1581_v37, %v1580_v61  ;;  %v1560_v5 = vsel %vm221_vm0, %v1559_v58, %v1497_v39  ;;  %v5030_v39 = vpop.permute.xlu1 %1887 }
  0xc8   : > { %v1913_v3 = vld [vmem:[%s4255_s14 + $0x8d] sm:$0x1]  ;;  %v1569_v6 = vrot.slane %v1503_v55, 2  ;;  %v1571_v7 = vrot.slane %v1504_v56, 1  ;;  %v1914_v9 = vld [vmem:[%s4255_s14 + $0x9d] sm:$0x1]  ;;  %v1584_v11 = vsel %vm236_vm5, %v1583_v42, %v1582_v4  ;;  %v1562_v12 = vsel %vm224_vm1, %v1561_v59, %v1560_v5 }
  0xc9   : > { %v1915_v10 = vld [vmem:[%s4255_s14 + $0xad] sm:$0x1]  ;;  %v1916_v14 = vld [vmem:[%s4255_s14 + $0xbd] sm:$0x1]  ;;  %v1586_v17 = vsel %vm239_vm6, %v1585_v43, %v1584_v11  ;;  %v1564_v18 = vsel %vm227_vm2, %v1563_v62, %v1562_v12  ;;  %v1981_v22 = vrot.slane %v1914_v9, 7 }
  0xca   : > { %v1917_v15 = vld [vmem:[%s4255_s14 + $0xcd] sm:$0x1]  ;;  %v1918_v16 = vld [vmem:[%s4255_s14 + $0xdd] sm:$0x1]  ;;  %v1983_v23 = vrot.slane %v1915_v10, 6  ;;  %1615 = vrot.lane.b32.xlu1 %v1586_v17, %s4213_s23  ;;  %v1566_v24 = vsel %vm5840_vm3, %v1565_v63, %v1564_v18  ;;  %v1985_v25 = vrot.slane %v1916_v14, 5  ;;  %v5053_v10 = vpop.permute.xlu0 %553 }
  0xcb   : > { %v1919_v19 = vld [vmem:[%s4255_s14 + $0xed] sm:$0x1]  ;;  %v1920_v21 = vld [vmem:[%s4255_s14 + $0xfd] sm:$0x1]  ;;  %v1987_v26 = vrot.slane %v1917_v15, 4  ;;  %v1989_v27 = vrot.slane %v1918_v16, 3  ;;  %v1568_v31 = vsel %vm5839_vm4, %v1567_v2, %v1566_v24  ;;  %v1982_v32 = vsel %vm221_vm0, %v1981_v22, %v1913_v3  ;;  %v5059_v18 = vpop.permute.xlu1 %555 }
  0xcc   : > { %v1905_v29 = vld [vmem:[%s4255_s14 + $0xd] sm:$0x1]  ;;  %v1991_v33 = vrot.slane %v1919_v19, 2  ;;  %v1993_v34 = vrot.slane %v1920_v21, 1  ;;  %v1906_v36 = vld [vmem:[%s4255_s14 + $0x1d] sm:$0x1]  ;;  %v1570_v40 = vsel %vm236_vm5, %v1569_v6, %v1568_v31  ;;  %v1984_v41 = vsel %vm224_vm1, %v1983_v23, %v1982_v32 }
  0xcd   : > { %v1907_v37 = vld [vmem:[%s4255_s14 + $0x2d] sm:$0x1]  ;;  %v1908_v42 = vld [vmem:[%s4255_s14 + $0x3d] sm:$0x1]  ;;  %v1572_v46 = vsel %vm239_vm6, %v1571_v7, %v1570_v40  ;;  %v1986_v47 = vsel %vm227_vm2, %v1985_v25, %v1984_v41  ;;  %v1967_v50 = vrot.slane %v1906_v36, 7 }
  0xce   : > { %v1909_v43 = vld [vmem:[%s4255_s14 + $0x4d] sm:$0x1]  ;;  %v1910_v44 = vld [vmem:[%s4255_s14 + $0x5d] sm:$0x1]  ;;  %v1969_v51 = vrot.slane %v1907_v37, 6  ;;  %1613 = vrot.lane.b32.xlu0 %v1572_v46, %s4213_s23  ;;  %v1988_v53 = vsel %vm5840_vm3, %v1987_v26, %v1986_v47  ;;  %v1971_v54 = vrot.slane %v1908_v42, 5 }
  0xcf   : > { %v1911_v48 = vld [vmem:[%s4255_s14 + $0x6d] sm:$0x1]  ;;  %v1912_v49 = vld [vmem:[%s4255_s14 + $0x7d] sm:$0x1]  ;;  %v1973_v55 = vrot.slane %v1909_v43, 4  ;;  %v1975_v56 = vrot.slane %v1910_v44, 3  ;;  %v1990_v59 = vsel %vm5839_vm4, %v1989_v27, %v1988_v53  ;;  %v1968_v61 = vsel %vm221_vm0, %v1967_v50, %v1905_v29 }
  0xd0   : > { %v575_v58 = vld [vmem:[%s4255_s14 + $0x83] sm:$0x1]  ;;  %v1977_v62 = vrot.slane %v1911_v48, 2  ;;  %v1979_v63 = vrot.slane %v1912_v49, 1  ;;  %v576_v2 = vld [vmem:[%s4255_s14 + $0x93] sm:$0x1]  ;;  %v1992_v4 = vsel %vm236_vm5, %v1991_v33, %v1990_v59  ;;  %v1970_v5 = vsel %vm224_vm1, %v1969_v51, %v1968_v61 }
  0xd1   : > { %v577_v3 = vld [vmem:[%s4255_s14 + $0xa3] sm:$0x1]  ;;  %v578_v6 = vld [vmem:[%s4255_s14 + $0xb3] sm:$0x1]  ;;  %v1994_v11 = vsel %vm239_vm6, %v1993_v34, %v1992_v4  ;;  %v1972_v12 = vsel %vm227_vm2, %v1971_v54, %v1970_v5  ;;  %v643_v16 = vrot.slane %v576_v2, 7  ;;  %v5080_v54 = vpop.permute.xlu0 %1077 }
  0xd2   : > { %v579_v7 = vld [vmem:[%s4255_s14 + $0xc3] sm:$0x1]  ;;  %v580_v9 = vld [vmem:[%s4255_s14 + $0xd3] sm:$0x1]  ;;  %v645_v17 = vrot.slane %v577_v3, 6  ;;  %2023 = vrot.lane.b32.xlu1 %v1994_v11, %s4214_s24  ;;  %v1974_v19 = vsel %vm5840_vm3, %v1973_v55, %v1972_v12  ;;  %v647_v21 = vrot.slane %v578_v6, 5 }
  0xd3   : > { %v581_v14 = vld [vmem:[%s4255_s14 + $0xe3] sm:$0x1]  ;;  %v582_v15 = vld [vmem:[%s4255_s14 + $0xf3] sm:$0x1]  ;;  %v649_v22 = vrot.slane %v579_v7, 4  ;;  %v651_v23 = vrot.slane %v580_v9, 3  ;;  %v1976_v25 = vsel %vm5839_vm4, %v1975_v56, %v1974_v19  ;;  %v644_v26 = vsel %vm221_vm0, %v643_v16, %v575_v58 }
  0xd4   : > { %v567_v24 = vld [vmem:[%s4255_s14 + $0x3] sm:$0x1]  ;;  %v653_v27 = vrot.slane %v581_v14, 2  ;;  %v655_v29 = vrot.slane %v582_v15, 1  ;;  %v568_v31 = vld [vmem:[%s4255_s14 + $0x13] sm:$0x1]  ;;  %v1978_v33 = vsel %vm236_vm5, %v1977_v62, %v1976_v25  ;;  %v646_v34 = vsel %vm224_vm1, %v645_v17, %v644_v26 }
  0xd5   : > { %v569_v32 = vld [vmem:[%s4255_s14 + $0x23] sm:$0x1]  ;;  %v570_v36 = vld [vmem:[%s4255_s14 + $0x33] sm:$0x1]  ;;  %v1980_v41 = vsel %vm239_vm6, %v1979_v63, %v1978_v33  ;;  %v648_v42 = vsel %vm227_vm2, %v647_v21, %v646_v34  ;;  %v629_v46 = vrot.slane %v568_v31, 7  ;;  %v5086_v63 = vpop.permute.xlu1 %1079 }
  0xd6   : > { %v571_v37 = vld [vmem:[%s4255_s14 + $0x43] sm:$0x1]  ;;  %v572_v40 = vld [vmem:[%s4255_s14 + $0x53] sm:$0x1]  ;;  %v631_v47 = vrot.slane %v569_v32, 6  ;;  %2021 = vrot.lane.b32.xlu0 %v1980_v41, %s4214_s24  ;;  %v650_v48 = vsel %vm5840_vm3, %v649_v22, %v648_v42  ;;  %v633_v49 = vrot.slane %v570_v36, 5 }
  0xd7   : > { %v573_v43 = vld [vmem:[%s4255_s14 + $0x63] sm:$0x1]  ;;  %v574_v44 = vld [vmem:[%s4255_s14 + $0x73] sm:$0x1]  ;;  %v635_v50 = vrot.slane %v571_v37, 4  ;;  %v637_v51 = vrot.slane %v572_v40, 3  ;;  %v652_v55 = vsel %vm5839_vm4, %v651_v23, %v650_v48  ;;  %v630_v56 = vsel %vm221_vm0, %v629_v46, %v567_v24  ;;  %v5109_v37 = vpop.permute.xlu0 %1617 }
  0xd8   : > { %v1639_v53 = vld [vmem:[%s4255_s14 + $0x8b] sm:$0x1]  ;;  %v639_v58 = vrot.slane %v573_v43, 2  ;;  %v641_v59 = vrot.slane %v574_v44, 1  ;;  %v1640_v61 = vld [vmem:[%s4255_s14 + $0x9b] sm:$0x1]  ;;  %v654_v2 = vsel %vm236_vm5, %v653_v27, %v652_v55  ;;  %v632_v3 = vsel %vm224_vm1, %v631_v47, %v630_v56 }
  0xd9   : > { %v1641_v62 = vld [vmem:[%s4255_s14 + $0xab] sm:$0x1]  ;;  %v1642_v4 = vld [vmem:[%s4255_s14 + $0xbb] sm:$0x1]  ;;  %v656_v7 = vsel %vm239_vm6, %v655_v29, %v654_v2  ;;  %v634_v9 = vsel %vm227_vm2, %v633_v49, %v632_v3  ;;  %v1707_v14 = vrot.slane %v1640_v61, 7  ;;  %v5115_v47 = vpop.permute.xlu1 %1619 }
  0xda   : > { %v1643_v5 = vld [vmem:[%s4255_s14 + $0xcb] sm:$0x1]  ;;  %v1644_v6 = vld [vmem:[%s4255_s14 + $0xdb] sm:$0x1]  ;;  %v1709_v15 = vrot.slane %v1641_v62, 6  ;;  %685 = vrot.lane.b32.xlu1 %v656_v7, %s4215_s25  ;;  %v636_v16 = vsel %vm5840_vm3, %v635_v50, %v634_v9  ;;  %v1711_v17 = vrot.slane %v1642_v4, 5 }
  0xdb   : > { %v1645_v11 = vld [vmem:[%s4255_s14 + $0xeb] sm:$0x1]  ;;  %v1646_v12 = vld [vmem:[%s4255_s14 + $0xfb] sm:$0x1]  ;;  %v1713_v19 = vrot.slane %v1643_v5, 4  ;;  %v1715_v21 = vrot.slane %v1644_v6, 3  ;;  %v638_v23 = vsel %vm5839_vm4, %v637_v51, %v636_v16  ;;  %v1708_v24 = vsel %vm221_vm0, %v1707_v14, %v1639_v53 }
  0xdc   : > { %v1631_v22 = vld [vmem:[%s4255_s14 + $0xb] sm:$0x1]  ;;  %v1717_v25 = vrot.slane %v1645_v11, 2  ;;  %v1719_v26 = vrot.slane %v1646_v12, 1  ;;  %v1632_v27 = vld [vmem:[%s4255_s14 + $0x1b] sm:$0x1]  ;;  %v640_v31 = vsel %vm236_vm5, %v639_v58, %v638_v23  ;;  %v1710_v32 = vsel %vm224_vm1, %v1709_v15, %v1708_v24  ;;  %v5136_v23 = vpop.permute.xlu0 %2025 }
  0xdd   : > { %v1633_v29 = vld [vmem:[%s4255_s14 + $0x2b] sm:$0x1]  ;;  %v1634_v33 = vld [vmem:[%s4255_s14 + $0x3b] sm:$0x1]  ;;  %v642_v40 = vsel %vm239_vm6, %v641_v59, %v640_v31  ;;  %v1712_v41 = vsel %vm227_vm2, %v1711_v17, %v1710_v32  ;;  %v1693_v44 = vrot.slane %v1632_v27, 7  ;;  %v5142_v32 = vpop.permute.xlu1 %2027 }
  0xde   : > { %v1635_v34 = vld [vmem:[%s4255_s14 + $0x4b] sm:$0x1]  ;;  %v1636_v36 = vld [vmem:[%s4255_s14 + $0x5b] sm:$0x1]  ;;  %v1695_v46 = vrot.slane %v1633_v29, 6  ;;  %683 = vrot.lane.b32.xlu0 %v642_v40, %s4215_s25  ;;  %v1714_v48 = vsel %vm5840_vm3, %v1713_v19, %v1712_v41  ;;  %v1697_v49 = vrot.slane %v1634_v33, 5 }
  0xdf   : > { %v1637_v42 = vld [vmem:[%s4255_s14 + $0x6b] sm:$0x1]  ;;  %v1638_v43 = vld [vmem:[%s4255_s14 + $0x7b] sm:$0x1]  ;;  %v1699_v50 = vrot.slane %v1635_v34, 4  ;;  %v1701_v51 = vrot.slane %v1636_v36, 3  ;;  %v1716_v55 = vsel %vm5839_vm4, %v1715_v21, %v1714_v48  ;;  %v1694_v56 = vsel %vm221_vm0, %v1693_v44, %v1631_v22 }
  0xe0   : > { %v2047_v53 = vld [vmem:[%s4255_s14 + $0x8e] sm:$0x1]  ;;  %v1703_v58 = vrot.slane %v1637_v42, 2  ;;  %v1705_v59 = vrot.slane %v1638_v43, 1  ;;  %v2048_v61 = vld [vmem:[%s4255_s14 + $0x9e] sm:$0x1]  ;;  %v1718_v2 = vsel %vm236_vm5, %v1717_v25, %v1716_v55  ;;  %v1696_v3 = vsel %vm224_vm1, %v1695_v46, %v1694_v56 }
  0xe1   : > { %v2049_v62 = vld [vmem:[%s4255_s14 + $0xae] sm:$0x1]  ;;  %v2050_v4 = vld [vmem:[%s4255_s14 + $0xbe] sm:$0x1]  ;;  %v1720_v7 = vsel %vm239_vm6, %v1719_v26, %v1718_v2  ;;  %v1698_v9 = vsel %vm227_vm2, %v1697_v49, %v1696_v3  ;;  %v2115_v14 = vrot.slane %v2048_v61, 7 }
  0xe2   : > { %v2051_v5 = vld [vmem:[%s4255_s14 + $0xce] sm:$0x1]  ;;  %v2052_v6 = vld [vmem:[%s4255_s14 + $0xde] sm:$0x1]  ;;  %v2117_v15 = vrot.slane %v2049_v62, 6  ;;  %1749 = vrot.lane.b32.xlu1 %v1720_v7, %s4216_s26  ;;  %v1700_v16 = vsel %vm5840_vm3, %v1699_v50, %v1698_v9  ;;  %v2119_v17 = vrot.slane %v2050_v4, 5 }
  0xe3   : > { %v2053_v11 = vld [vmem:[%s4255_s14 + $0xee] sm:$0x1]  ;;  %v2054_v12 = vld [vmem:[%s4255_s14 + $0xfe] sm:$0x1]  ;;  %v2121_v19 = vrot.slane %v2051_v5, 4  ;;  %v2123_v21 = vrot.slane %v2052_v6, 3  ;;  %v1702_v24 = vsel %vm5839_vm4, %v1701_v51, %v1700_v16  ;;  %v2116_v25 = vsel %vm221_vm0, %v2115_v14, %v2047_v53 }
  0xe4   : > { %v2039_v22 = vld [vmem:[%s4255_s14 + $0xe] sm:$0x1]  ;;  %v2125_v26 = vrot.slane %v2053_v11, 2  ;;  %v2127_v27 = vrot.slane %v2054_v12, 1  ;;  %v2040_v29 = vld [vmem:[%s4255_s14 + $0x1e] sm:$0x1]  ;;  %v1704_v33 = vsel %vm236_vm5, %v1703_v58, %v1702_v24  ;;  %v2118_v34 = vsel %vm224_vm1, %v2117_v15, %v2116_v25  ;;  %v5165_v11 = vpop.permute.xlu0 %687 }
  0xe5   : > { %v2041_v31 = vld [vmem:[%s4255_s14 + $0x2e] sm:$0x1]  ;;  %v2042_v36 = vld [vmem:[%s4255_s14 + $0x3e] sm:$0x1]  ;;  %v1706_v42 = vsel %vm239_vm6, %v1705_v59, %v1704_v33  ;;  %v2120_v43 = vsel %vm227_vm2, %v2119_v17, %v2118_v34  ;;  %v2101_v48 = vrot.slane %v2040_v29, 7 }
  0xe6   : > { %v2043_v40 = vld [vmem:[%s4255_s14 + $0x4e] sm:$0x1]  ;;  %v2044_v41 = vld [vmem:[%s4255_s14 + $0x5e] sm:$0x1]  ;;  %v2103_v49 = vrot.slane %v2041_v31, 6  ;;  %1747 = vrot.lane.b32.xlu0 %v1706_v42, %s4216_s26  ;;  %v2122_v50 = vsel %vm5840_vm3, %v2121_v19, %v2120_v43  ;;  %v2105_v51 = vrot.slane %v2042_v36, 5 }
  0xe7   : > { %v2045_v44 = vld [vmem:[%s4255_s14 + $0x6e] sm:$0x1]  ;;  %v2046_v46 = vld [vmem:[%s4255_s14 + $0x7e] sm:$0x1]  ;;  %v2107_v53 = vrot.slane %v2043_v40, 4  ;;  %v2109_v55 = vrot.slane %v2044_v41, 3  ;;  %v2124_v58 = vsel %vm5839_vm4, %v2123_v21, %v2122_v50  ;;  %v2102_v59 = vsel %vm221_vm0, %v2101_v48, %v2039_v22  ;;  %v5171_v21 = vpop.permute.xlu1 %689 }
  0xe8   : > { %v709_v56 = vld [vmem:[%s4255_s14 + $0x84] sm:$0x1]  ;;  %v2111_v61 = vrot.slane %v2045_v44, 2  ;;  %v2113_v62 = vrot.slane %v2046_v46, 1  ;;  %v710_v2 = vld [vmem:[%s4255_s14 + $0x94] sm:$0x1]  ;;  %v2126_v4 = vsel %vm236_vm5, %v2125_v26, %v2124_v58  ;;  %v2104_v5 = vsel %vm224_vm1, %v2103_v49, %v2102_v59 }
  0xe9   : > { %v711_v3 = vld [vmem:[%s4255_s14 + $0xa4] sm:$0x1]  ;;  %v712_v6 = vld [vmem:[%s4255_s14 + $0xb4] sm:$0x1]  ;;  %v2128_v12 = vsel %vm239_vm6, %v2127_v27, %v2126_v4  ;;  %v2106_v14 = vsel %vm227_vm2, %v2105_v51, %v2104_v5  ;;  %v777_v17 = vrot.slane %v710_v2, 7  ;;  %v5192_v2 = vpop.permute.xlu0 %1211 }
  0xea   : > { %v713_v7 = vld [vmem:[%s4255_s14 + $0xc4] sm:$0x1]  ;;  %v714_v9 = vld [vmem:[%s4255_s14 + $0xd4] sm:$0x1]  ;;  %v779_v19 = vrot.slane %v711_v3, 6  ;;  %2157 = vrot.lane.b32.xlu1 %v2128_v12, %s4217_s27  ;;  %v2108_v22 = vsel %vm5840_vm3, %v2107_v53, %v2106_v14  ;;  %v781_v24 = vrot.slane %v712_v6, 5 }
  0xeb   : > { %v715_v15 = vld [vmem:[%s4255_s14 + $0xe4] sm:$0x1]  ;;  %v716_v16 = vld [vmem:[%s4255_s14 + $0xf4] sm:$0x1]  ;;  %v783_v25 = vrot.slane %v713_v7, 4  ;;  %v785_v26 = vrot.slane %v714_v9, 3  ;;  %v2110_v29 = vsel %vm5839_vm4, %v2109_v55, %v2108_v22  ;;  %v778_v31 = vsel %vm221_vm0, %v777_v17, %v709_v56  ;;  %v5198_v12 = vpop.permute.xlu1 %1213 }
  0xec   : > { %v701_v27 = vld [vmem:[%s4255_s14 + $0x4] sm:$0x1]  ;;  %v787_v33 = vrot.slane %v715_v15, 2  ;;  %v789_v34 = vrot.slane %v716_v16, 1  ;;  %v702_v36 = vld [vmem:[%s4255_s14 + $0x14] sm:$0x1]  ;;  %v2112_v41 = vsel %vm236_vm5, %v2111_v61, %v2110_v29  ;;  %v780_v42 = vsel %vm224_vm1, %v779_v19, %v778_v31 }
  0xed   : > { %v703_v40 = vld [vmem:[%s4255_s14 + $0x24] sm:$0x1]  ;;  %v704_v43 = vld [vmem:[%s4255_s14 + $0x34] sm:$0x1]  ;;  %v2114_v48 = vsel %vm239_vm6, %v2113_v62, %v2112_v41  ;;  %v782_v49 = vsel %vm227_vm2, %v781_v24, %v780_v42  ;;  %v763_v53 = vrot.slane %v702_v36, 7 }
  0xee   : > { %v705_v44 = vld [vmem:[%s4255_s14 + $0x44] sm:$0x1]  ;;  %v706_v46 = vld [vmem:[%s4255_s14 + $0x54] sm:$0x1]  ;;  %v765_v55 = vrot.slane %v703_v40, 6  ;;  %2155 = vrot.lane.b32.xlu0 %v2114_v48, %s4217_s27  ;;  %v784_v56 = vsel %vm5840_vm3, %v783_v25, %v782_v49  ;;  %v767_v58 = vrot.slane %v704_v43, 5 }
  0xef   : > { %v707_v50 = vld [vmem:[%s4255_s14 + $0x64] sm:$0x1]  ;;  %v708_v51 = vld [vmem:[%s4255_s14 + $0x74] sm:$0x1]  ;;  %v769_v59 = vrot.slane %v705_v44, 4  ;;  %v771_v61 = vrot.slane %v706_v46, 3  ;;  %v786_v3 = vsel %vm5839_vm4, %v785_v26, %v784_v56  ;;  %v764_v4 = vsel %vm221_vm0, %v763_v53, %v701_v27 }
  0xf0   : > { %v859_v62 = vld [vmem:[%s4255_s14 + $0x185] sm:$0x1]  ;;  %v773_v5 = vrot.slane %v707_v50, 2  ;;  %v775_v6 = vrot.slane %v708_v51, 1  ;;  %v860_v7 = vld [vmem:[%s4255_s14 + $0x195] sm:$0x1]  ;;  %v788_v14 = vsel %vm236_vm5, %v787_v33, %v786_v3  ;;  %v766_v15 = vsel %vm224_vm1, %v765_v55, %v764_v4  ;;  %v5227_v4 = vpop.permute.xlu1 %1753 }
  0xf1   : > { %v861_v9 = vld [vmem:[%s4255_s14 + $0x1a5] sm:$0x1]  ;;  %v862_v16 = vld [vmem:[%s4255_s14 + $0x1b5] sm:$0x1]  ;;  %v790_v22 = vsel %vm239_vm6, %v789_v34, %v788_v14  ;;  %v768_v24 = vsel %vm227_vm2, %v767_v58, %v766_v15  ;;  %v939_v26 = vrot.slane %v860_v7, 7  ;;  %v5221_v56 = vpop.permute.xlu0 %1751 }
  0xf2   : > { %v863_v17 = vld [vmem:[%s4255_s14 + $0x1c5] sm:$0x1]  ;;  %v864_v19 = vld [vmem:[%s4255_s14 + $0x1d5] sm:$0x1]  ;;  %v941_v27 = vrot.slane %v861_v9, 6  ;;  %819 = vrot.lane.b32.xlu1 %v790_v22, %s4219_s28  ;;  %v770_v31 = vsel %vm5840_vm3, %v769_v59, %v768_v24  ;;  %v943_v33 = vrot.slane %v862_v16, 5 }
  0xf3   : > { %v865_v25 = vld [vmem:[%s4255_s14 + $0x1e5] sm:$0x1]  ;;  %v2181_v29 = vld [vmem:[%s4255_s14 + $0x8f] sm:$0x1]  ;;  %v945_v36 = vrot.slane %v863_v17, 4  ;;  %v947_v40 = vrot.slane %v864_v19, 3  ;;  %v772_v34 = vsel %vm5839_vm4, %v771_v61, %v770_v31  ;;  %v940_v42 = vsel %vm221_vm0, %v939_v26, %v859_v62 }
  0xf4   : > { %v2182_v41 = vld [vmem:[%s4255_s14 + $0x9f] sm:$0x1]  ;;  %v949_v43 = vrot.slane %v865_v25, 2  ;;  %v2183_v44 = vld [vmem:[%s4255_s14 + $0xaf] sm:$0x1]  ;;  %v774_v49 = vsel %vm236_vm5, %v773_v5, %v772_v34  ;;  %v942_v50 = vsel %vm224_vm1, %v941_v27, %v940_v42 }
  0xf5   : > { %v2184_v46 = vld [vmem:[%s4255_s14 + $0xbf] sm:$0x1]  ;;  %v2249_v48 = vrot.slane %v2182_v41, 7  ;;  %v2185_v51 = vld [vmem:[%s4255_s14 + $0xcf] sm:$0x1]  ;;  %v776_v58 = vsel %vm239_vm6, %v775_v6, %v774_v49  ;;  %v944_v59 = vsel %vm227_vm2, %v943_v33, %v942_v50  ;;  %v2251_v3 = vrot.slane %v2183_v44, 6 }
  0xf6   : > { %v2186_v53 = vld [vmem:[%s4255_s14 + $0xdf] sm:$0x1]  ;;  %v2187_v55 = vld [vmem:[%s4255_s14 + $0xef] sm:$0x1]  ;;  %817 = vrot.lane.b32.xlu0 %v776_v58, %s4219_s28  ;;  %v946_v5 = vsel %vm5840_vm3, %v945_v36, %v944_v59  ;;  %v2253_v7 = vrot.slane %v2184_v46, 5  ;;  %v2255_v9 = vrot.slane %v2185_v51, 4  ;;  %v5255_v59 = vpop.permute.xlu1 %2161 }
  0xf7   : > { %v2188_v61 = vld [vmem:[%s4255_s14 + $0xff] sm:$0x1]  ;;  %v2250_v62 = vsel %vm221_vm0, %v2249_v48, %v2181_v29  ;;  %v2257_v6 = vrot.slane %v2186_v53, 3  ;;  %v2173_v14 = vld [vmem:[%s4255_s14 + $0xf] sm:$0x1]  ;;  %v948_v16 = vsel %vm5839_vm4, %v947_v40, %v946_v5  ;;  %v2259_v19 = vrot.slane %v2187_v55, 2 }
  0xf8   : > { %v2174_v15 = vld [vmem:[%s4255_s14 + $0x1f] sm:$0x1]  ;;  %v2252_v17 = vsel %vm224_vm1, %v2251_v3, %v2250_v62  ;;  %v2261_v22 = vrot.slane %v2188_v61, 1  ;;  %v2175_v24 = vld [vmem:[%s4255_s14 + $0x2f] sm:$0x1]  ;;  %v950_v26 = vsel %vm236_vm5, %v949_v43, %v948_v16  ;;  %v5249_v50 = vpop.permute.xlu0 %2159 }
  0xf9   : > { %v2176_v25 = vld [vmem:[%s4255_s14 + $0x3f] sm:$0x1]  ;;  %v2254_v27 = vsel %vm227_vm2, %v2253_v7, %v2252_v17  ;;  %v2177_v29 = vld [vmem:[%s4255_s14 + $0x4f] sm:$0x1]  ;;  %960 = vst.msk [vmem:[#allocation2 + $0x50] sm:$0x7f] %vm959_vm7, %v950_v26 }
  0xfa   : > { %v2178_v31 = vld [vmem:[%s4255_s14 + $0x5f] sm:$0x1]  ;;  %v2179_v33 = vld [vmem:[%s4255_s14 + $0x6f] sm:$0x1]  ;;  %v2256_v36 = vsel %vm5840_vm3, %v2255_v9, %v2254_v27  ;;  %v2235_v41 = vrot.slane %v2174_v15, 7  ;;  %v2237_v34 = vrot.slane %v2175_v24, 6 }
  0xfb   : > { %v2180_v40 = vld [vmem:[%s4255_s14 + $0x7f] sm:$0x1]  ;;  %v2239_v42 = vrot.slane %v2176_v25, 5  ;;  %1094 = vst.msk [vmem:[#allocation2 + $0x50] sm:$0x7f] %vm1093_vm8, %v4856_v57  ;;  %v2258_v43 = vsel %vm5839_vm4, %v2257_v6, %v2256_v36  ;;  %v2241_v44 = vrot.slane %v2177_v29, 4 }
  0xfc   : > { %v2243_v46 = vrot.slane %v2178_v31, 3  ;;  %v2245_v48 = vrot.slane %v2179_v33, 2  ;;  %v851_v49 = vld [vmem:[%s4255_s14 + $0x105] sm:$0x1]  ;;  %v2260_v51 = vsel %vm236_vm5, %v2259_v19, %v2258_v43  ;;  %v2236_v53 = vsel %vm221_vm0, %v2235_v41, %v2173_v14  ;;  %v852_v57 = vld [vmem:[%s4255_s14 + $0x115] sm:$0x1] }
  0xfd   : > { %v2247_v55 = vrot.slane %v2180_v40, 1  ;;  %v853_v58 = vld [vmem:[%s4255_s14 + $0x125] sm:$0x1]  ;;  %v2262_v61 = vsel %vm239_vm6, %v2261_v22, %v2260_v51  ;;  %v2238_v62 = vsel %vm224_vm1, %v2237_v34, %v2236_v53  ;;  %v854_v3 = vld [vmem:[%s4255_s14 + $0x135] sm:$0x1]  ;;  %v925_v7 = vrot.slane %v852_v57, 7 }
  0xfe   : > { %v855_v5 = vld [vmem:[%s4255_s14 + $0x145] sm:$0x1]  ;;  %2291 = vrot.lane.b32.xlu1 %v2262_v61, %s4220_s29  ;;  %v2240_v9 = vsel %vm227_vm2, %v2239_v42, %v2238_v62  ;;  %v856_v6 = vld [vmem:[%s4255_s14 + $0x155] sm:$0x1]  ;;  %v927_v19 = vrot.slane %v853_v58, 6  ;;  %v929_v22 = vrot.slane %v854_v3, 5 }
  0xff   : > { %v857_v14 = vld [vmem:[%s4255_s14 + $0x165] sm:$0x1]  ;;  %v858_v15 = vld [vmem:[%s4255_s14 + $0x175] sm:$0x1]  ;;  %v2242_v16 = vsel %vm5840_vm3, %v2241_v44, %v2240_v9  ;;  %v926_v17 = vsel %vm221_vm0, %v925_v7, %v851_v49  ;;  %v931_v25 = vrot.slane %v855_v5, 4  ;;  %v933_v26 = vrot.slane %v856_v6, 3 }
 0x100   : > { %v2244_v24 = vsel %vm5839_vm4, %v2243_v46, %v2242_v16  ;;  %v935_v27 = vrot.slane %v857_v14, 2  ;;  %v928_v31 = vsel %vm224_vm1, %v927_v19, %v926_v17  ;;  %v937_v33 = vrot.slane %v858_v15, 1  ;;  %298 = vst.msk [vmem:[#allocation2 + $0x48] sm:$0x7f] %vm297_vm11, %v4891_v35  ;;  %v844_v34 = vld [vmem:[%s4255_s14 + $0x95] sm:$0x1]  ;;  %v284_v46 = vpop.permute.xlu1 %283 }
 0x101   : > { %v2246_v29 = vsel %vm236_vm5, %v2245_v48, %v2244_v24  ;;  %v930_v41 = vsel %vm227_vm2, %v929_v22, %v928_v31  ;;  %v5276_v42 = vld [vmem:[%s4255_s14 + $0xa5] sm:$0x1]  ;;  %v5279_v43 = vld [vmem:[%s4255_s14 + $0xb5] sm:$0x1]  ;;  %1228 = vst.msk [vmem:[#allocation2 + $0x50] sm:$0x7f] %vm1227_vm12, %v4862_v0 }
 0x102   : > { %v2248_v40 = vsel %vm239_vm6, %v2247_v55, %v2246_v29  ;;  %v5282_v44 = vld [vmem:[%s4255_s14 + $0xc5] sm:$0x1]  ;;  %v932_v48 = vsel %vm5840_vm3, %v931_v25, %v930_v41  ;;  %vm1223_vm7 = vcmask 425248   ;;  %v5288_v35 = vld [vmem:[%s4255_s14 + $0xd5] sm:$0x1]  ;;  %vm427_vm8 = vcmask 589248  }
 0x103   : > { %v282_v36 = vpop.permute.xlu0 %281  ;;  %2289 = vrot.lane.b32.xlu0 %v2248_v40, %s4220_s29  ;;  %v5291_v49 = vld [vmem:[%s4255_s14 + $0xe5] sm:$0x1]  ;;  %v934_v51 = vsel %vm5839_vm4, %v933_v26, %v932_v48  ;;  %1362 = vst.msk [vmem:[#allocation2 + $0x50] sm:$0x7f] %vm1361_vm13, %v4918_v8  ;;  %vm1495_vm11 = vcmask 719424   ;;  %vm1357_vm12 = vcmask 572848  }
 0x104   : > { %432 = vst.msk [vmem:[#allocation2 + $0x48] sm:$0x7f] %vm431_vm15, %v4947_v45  ;;  %v843_v0 = vld [vmem:[%s4255_s14 + $0x85] sm:$0x1]  ;;  %v5299_v53 = vld [vmem:[%s4255_s14 + $0xf5] sm:$0x1]  ;;  %v936_v55 = vsel %vm236_vm5, %v935_v27, %v934_v51 }
 0x105   : > { %295 = vst.msk [vmem:[#allocation2 + $0x18] sm:$0xff] %vm293_vm14, %v284_v46  ;;  %294 = vst.msk [vmem:[#allocation2] sm:$0xff] %vm293_vm14, %v282_v36  ;;  %vm1491_vm13 = vcmask 720448   ;;  %vm147_vm4 = vcmask 867328   ;;  %vm1903_vm3 = vcmask 112640   ;;  %v938_v45 = vsel %vm239_vm6, %v937_v33, %v936_v55  ;;  %v5308_v57 = vld [vmem:[#allocation2 + $0x8] sm:$0xff]  ;;  %v824_v6 = vpop.permute.xlu1 %823 }
 0x106   : > { %430 = vst.msk [vmem:[#allocation2 + $0x30] sm:$0xff] %vm427_vm8, %v4968_v13  ;;  %v835_v1 = vld [vmem:[%s4255_s14 + $0x5] sm:$0x1]  ;;  %v836_v8 = vld [vmem:[%s4255_s14 + $0x15] sm:$0x1]  ;;  %vm5842_vm14 = vcmask 113664  }
 0x107   : > { %1496 = vst.msk [vmem:[#allocation2 + $0x50] sm:$0x7f] %vm1495_vm11, %v5003_v60  ;;  %vm565_vm15 = vcmask 735824   ;;  %vm5841_vm11 = vcmask 736848   ;;  %v837_v13 = vld [vmem:[%s4255_s14 + $0x25] sm:$0x1] }
 0x108   : > { %157 = vst.msk [vmem:[#allocation2 + $0x58] sm:$0xff] %vm147_vm4, %v5308_v57  ;;  %148 = vst.msk [vmem:[#allocation2 + $0x10] sm:$0xff] %vm147_vm4, %v5308_v57  ;;  %v911_v60 = vrot.slane %v844_v34, 7  ;;  %v913_v58 = vrot.slane %v5276_v42, 6  ;;  %v915_v61 = vrot.slane %v5279_v43, 5  ;;  %v917_v62 = vrot.slane %v5282_v44, 4 }
 0x109   : > { %151 = vst.msk [vmem:[#allocation2 + $0x28] sm:$0xff] %vm147_vm4, %v5308_v57  ;;  %154 = vst.msk [vmem:[#allocation2 + $0x40] sm:$0xff] %vm147_vm4, %v5308_v57  ;;  %v838_v3 = vld [vmem:[%s4255_s14 + $0x35] sm:$0x1]  ;;  %v919_v5 = vrot.slane %v5288_v35, 3  ;;  %v923_v7 = vrot.slane %v5299_v53, 1 }
 0x10a   : > { %958 = vst.msk [vmem:[#allocation2 + $0x38] sm:$0xff] %vm955_vm9, %v938_v45  ;;  %v897_v9 = vrot.slane %v836_v8, 7  ;;  %v912_v14 = vsel %vm221_vm0, %v911_v60, %v843_v0  ;;  %v840_v15 = vld [vmem:[%s4255_s14 + $0x55] sm:$0x1]  ;;  %v841_v16 = vld [vmem:[%s4255_s14 + $0x65] sm:$0x1] }
 0x10b   : > { %1904 = vst.msk [vmem:[#allocation2 + $0x58] sm:$0x7f] %vm1903_vm3, %v5030_v39  ;;  %v842_v17 = vld [vmem:[%s4255_s14 + $0x75] sm:$0x1]  ;;  %v899_v22 = vrot.slane %v837_v13, 6  ;;  %v901_v24 = vrot.slane %v838_v3, 5 }
 0x10c   : > { %1900 = vst.msk [vmem:[#allocation2 + $0x40] sm:$0xff] %vm5842_vm14, %v5024_v30  ;;  %v898_v19 = vsel %vm221_vm0, %v897_v9, %v835_v1  ;;  %v905_v26 = vrot.slane %v840_v15, 3  ;;  %v907_v27 = vrot.slane %v841_v16, 2  ;;  %vm5844_vm3 = vcmask 1044484  }
 0x10d   : > { %566 = vst.msk [vmem:[#allocation2 + $0x48] sm:$0x7f] %vm565_vm15, %v5059_v18  ;;  %v921_v18 = vrot.slane %v5291_v49, 2  ;;  %v900_v31 = vsel %vm224_vm1, %v899_v22, %v898_v19  ;;  %v909_v33 = vrot.slane %v842_v17, 1  ;;  %vm1629_vm4 = vcmask 867024   ;;  %vm5846_vm14 = vmmov %vm5844_vm3  ;;  %v1348_v34 = vpop.permute.xlu1 %1347 }
 0x10e   : > { %564 = vst.msk [vmem:[#allocation2 + $0x30] sm:$0xff] %vm5841_vm11, %v5053_v10  ;;  %v839_v10 = vld [vmem:[%s4255_s14 + $0x45] sm:$0x1]  ;;  %vm5845_vm15 = vcmask 1045509   ;;  %v902_v40 = vsel %vm227_vm2, %v901_v24, %v900_v31  ;;  %vm5843_vm0 = vcmask 868048   ;;  %vm2037_vm11 = vcmask 260224  }
 0x10f   : > { %1092 = vst.msk [vmem:[#allocation2 + $0x38] sm:$0xff] %vm1089_vm10, %v4885_v28  ;;  %v914_v28 = vsel %vm224_vm1, %v913_v58, %v912_v14  ;;  %vm2033_vm1 = vcmask 261248  }
 0x110   : > { %1226 = vst.msk [vmem:[#allocation2 + $0x38] sm:$0xff] %vm1223_vm7, %v4974_v20  ;;  %v916_v25 = vsel %vm227_vm2, %v915_v61, %v914_v28  ;;  %v903_v20 = vrot.slane %v839_v10, 4  ;;  %vm695_vm2 = vcmask 884448  }
 0x111   : > { %1360 = vst.msk [vmem:[#allocation2 + $0x38] sm:$0xff] %vm1357_vm12, %v4941_v38  ;;  %v918_v29 = vsel %vm5844_vm3, %v917_v62, %v916_v25  ;;  %v822_v38 = vpop.permute.xlu0 %821  ;;  %vm699_vm3 = vcmask 883424  }
 0x112   : > { %1494 = vst.msk [vmem:[#allocation2 + $0x38] sm:$0xff] %vm1491_vm13, %v4997_v52  ;;  %v920_v36 = vsel %vm5845_vm15, %v919_v5, %v918_v29  ;;  %v904_v41 = vsel %vm5846_vm14, %v903_v20, %v902_v40  ;;  %vm1901_vm14 = vcmask 1047536  }
 0x113   : > { %1630 = vst.msk [vmem:[#allocation2 + $0x50] sm:$0x7f] %vm1629_vm4, %v5115_v47  ;;  %v922_v52 = vsel %vm236_vm5, %v921_v18, %v920_v36  ;;  %v906_v43 = vsel %vm5845_vm15, %v905_v26, %v904_v41  ;;  %vm1763_vm4 = vcmask 1014624   ;;  %vm833_vm15 = vcmask 1031024  }
 0x114   : > { %1628 = vst.msk [vmem:[#allocation2 + $0x38] sm:$0xff] %vm5843_vm0, %v5109_v37  ;;  %v924_v42 = vsel %vm239_vm6, %v923_v7, %v922_v52  ;;  %v908_v37 = vsel %vm236_vm5, %v907_v27, %v906_v43  ;;  %vm1893_vm0 = vcmask 1048560   ;;  %vm2167_vm5 = vcmask 408848  }
 0x115   : > { %2038 = vst.msk [vmem:[#allocation2 + $0x58] sm:$0x7f] %vm2037_vm11, %v5142_v32  ;;  %vm1759_vm11 = vcmask 1015648   ;;  %v910_v47 = vsel %vm239_vm6, %v909_v33, %v908_v37  ;;  %vm829_vm6 = vcmask 1032048  }
 0x116   : > { %2036 = vst.msk [vmem:[#allocation2 + $0x40] sm:$0xff] %vm2033_vm1, %v5136_v23 }
 0x117   : > { %700 = vst.msk [vmem:[#allocation2 + $0x48] sm:$0x7f] %vm699_vm3, %v5171_v21  ;;  %vm2171_vm3 = vcmask 407824  }
 0x118   : > { %957 = vst.msk [vmem:[#allocation2 + $0x20] sm:$0xff] %vm955_vm9, %v924_v42  ;;  %956 = vst.msk [vmem:[#allocation2 + $0x8] sm:$0xff] %vm955_vm9, %v910_v47  ;;  %vm2301_vm9 = vcmask 556448  }
 0x119   : > { %698 = vst.msk [vmem:[#allocation2 + $0x30] sm:$0xff] %vm695_vm2, %v5165_v11 }
 0x11a   : > { %1764 = vst.msk [vmem:[#allocation2 + $0x50] sm:$0x7f] %vm1763_vm4, %v5227_v4  ;;  %vm2305_vm4 = vcmask 555424  }
 0x11b   : > { %1091 = vst.msk [vmem:[#allocation2 + $0x20] sm:$0xff] %vm1089_vm10, %v5086_v63  ;;  %1090 = vst.msk [vmem:[#allocation2 + $0x8] sm:$0xff] %vm1089_vm10, %v5080_v54  ;;  %vm2360_vm10 = vcmask 551936  }
 0x11c   : > { %1902 = vst.msk [vmem:[#allocation2 + $0x50] sm:$0x7f] %vm1901_vm14, %v5030_v39  ;;  %v1346_v39 = vpop.permute.xlu0 %1345 }
 0x11d   : > { %1762 = vst.msk [vmem:[#allocation2 + $0x38] sm:$0xff] %vm1759_vm11, %v5221_v56 }
 0x11e   : > { %1225 = vst.msk [vmem:[#allocation2 + $0x20] sm:$0xff] %vm1223_vm7, %v5198_v12  ;;  %1224 = vst.msk [vmem:[#allocation2 + $0x8] sm:$0xff] %vm1223_vm7, %v5192_v2  ;;  %vm5847_vm7 = vcmask 113664  }
 0x11f   : > { %1899 = vst.msk [vmem:[#allocation2 + $0x38] sm:$0xff] %vm1893_vm0, %v5024_v30  ;;  %v2296_v30 = vpop.permute.xlu1 %2295 }
 0x120   : > { %2172 = vst.msk [vmem:[#allocation2 + $0x58] sm:$0x7f] %vm2171_vm3, %v5255_v59  ;;  %v2294_v63 = vpop.permute.xlu0 %2293  ;;  %vm5851_vm3 = vcmask 868048  }
 0x121   : > { %2170 = vst.msk [vmem:[#allocation2 + $0x40] sm:$0xff] %vm2167_vm5, %v5249_v50 }
 0x122   : > { %834 = vst.msk [vmem:[#allocation2 + $0x48] sm:$0x7f] %vm833_vm15, %v824_v6  ;;  %vm2438_vm15 = vcmask 1039360  }
 0x123   : > { %832 = vst.msk [vmem:[#allocation2 + $0x30] sm:$0xff] %vm829_vm6, %v822_v38  ;;  %v2317_v23 = vld [vmem:[#allocation2 + $0x50] sm:$0xff]  ;;  %v418_v4 = vpop.permute.xlu1 %417 }
 0x124   : > { %1359 = vst.msk [vmem:[#allocation2 + $0x20] sm:$0xff] %vm1357_vm12, %v1348_v34  ;;  %1358 = vst.msk [vmem:[#allocation2 + $0x8] sm:$0xff] %vm1357_vm12, %v1346_v39  ;;  %v416_v44 = vpop.permute.xlu0 %415  ;;  %vm5849_vm12 = vcmask 736848  }
 0x125   : > { %2306 = vst.msk [vmem:[#allocation2 + $0x58] sm:$0x7f] %vm2305_vm4, %v2296_v30  ;;  %vm5850_vm14 = vmmov %vm5849_vm12  ;;  %vm2903_vm4 = vcmask 752640  }
 0x126   : > { %2304 = vst.msk [vmem:[#allocation2 + $0x40] sm:$0xff] %vm2301_vm9, %v2294_v63  ;;  %v2314_v54 = vld [vmem:[#allocation2 + $0x38] sm:$0xff] }
 0x127   : > { %429 = vst.msk [vmem:[#allocation2 + $0x18] sm:$0xff] %vm427_vm8, %v418_v4  ;;  %428 = vst.msk [vmem:[#allocation2] sm:$0xff] %vm427_vm8, %v416_v44  ;;  %v1482_v46 = vpop.permute.xlu1 %1481 }
 0x128   : > { %1493 = vst.msk [vmem:[#allocation2 + $0x20] sm:$0xff] %vm1491_vm13, %v1482_v46  ;;  %v1480_v48 = vpop.permute.xlu0 %1479  ;;  %vm5848_vm8 = vmmov %vm5847_vm7 }
 0x129   : > { %v2316_v32 = vld [vmem:[#allocation2 + $0x48] sm:$0xff]  ;;  %1492 = vst.msk [vmem:[#allocation2 + $0x8] sm:$0xff] %vm1491_vm13, %v1480_v48  ;;  %vm5852_vm13 = vmmov %vm5851_vm3 }
 0x12a   : > { %v5387_v11 = vpack.c.bf16 %v2317_v23, %v2316_v32  ;;  %v2313_v21 = vld [vmem:[#allocation2 + $0x30] sm:$0xff] }
 0x12b   : > { %v5389_v12 = vpack.c.bf16 %v2314_v54, %v2313_v21  ;;  %v4223_v21 = vmov 0  }
 0x12c   : > { %2366 = vst [vmem:[#allocation3 + $0x24] sm:$0xff] %v5387_v11  ;;  %v2318_v2 = vld [vmem:[#allocation2 + $0x58] sm:$0xff]  ;;  %2611 = vrot.lane.b32.xlu0 %v5387_v11, %s4219_s28  ;;  %v1884_v35 = vpop.permute.xlu1 %1883  ;;  %3635 = vmatprep.mubr.bf16.mxu1 %v4223_v21 }
 0x12d   : > { %2364 = vst [vmem:[#allocation3 + $0x18] sm:$0xff] %v5389_v12  ;;  %v5395_v56 = vpack.c.bf16 %v2318_v2, %v2318_v2  ;;  %v2315_v50 = vld [vmem:[#allocation2 + $0x40] sm:$0xff]  ;;  %1898 = vst.msk [vmem:[#allocation2 + $0x28] sm:$0xff] %vm5847_vm7, %v1884_v35  ;;  %vm2717_vm7 = vcmask 891904  }
 0x12e   : > { %v5404_v59 = vpack.c.bf16 %v2315_v50, %v2315_v50 }
 0x12f   : > { %2367 = vst.msk [vmem:[#allocation3 + $0x2c] sm:$0xf] %vm2360_vm10, %v5395_v56  ;;  %2613 = vrot.lane.b32.xlu1 %v5395_v56, %s4219_s28 }
 0x130   : > { %3076 = vrot.lane.b32.xlu0 %v5387_v11, %s4213_s23  ;;  %2365 = vst.msk [vmem:[#allocation3 + $0x20] sm:$0xf] %vm2360_vm10, %v5404_v59  ;;  %v1882_v49 = vpop.permute.xlu0 %1881 }
 0x131   : > { %1896 = vst.msk [vmem:[#allocation2 + $0x10] sm:$0xff] %vm5848_vm8, %v1882_v49  ;;  %vm3782_vm8 = vcmask 556032  }
 0x133   : > { %3078 = vrot.lane.b32.xlu1 %v5395_v56, %s4213_s23 }
 0x134   : > { %2607 = vrot.lane.b32.xlu0 %v5389_v12, %s4219_s28  ;;  %v552_v51 = vpop.permute.xlu1 %551 }
 0x135   : > { %563 = vst.msk [vmem:[#allocation2 + $0x18] sm:$0xff] %vm5849_vm12, %v552_v51 }
 0x137   : > { %2609 = vrot.lane.b32.xlu1 %v5404_v59, %s4219_s28 }
 0x138   : > { %3072 = vrot.lane.b32.xlu0 %v5389_v12, %s4213_s23  ;;  %v550_v0 = vpop.permute.xlu0 %549 }
 0x139   : > { %562 = vst.msk [vmem:[#allocation2] sm:$0xff] %vm5850_vm14, %v550_v0 }
 0x13b   : > { %3074 = vrot.lane.b32.xlu1 %v5404_v59, %s4213_s23 }
 0x13c   : > { %v1616_v53 = vpop.permute.xlu1 %1615 }
 0x13d   : > { %1627 = vst.msk [vmem:[#allocation2 + $0x20] sm:$0xff] %vm5851_vm3, %v1616_v53 }
 0x140   : > { %v1614_v55 = vpop.permute.xlu0 %1613 }
 0x141   : > { %1626 = vst.msk [vmem:[#allocation2 + $0x8] sm:$0xff] %vm5852_vm13, %v1614_v55 }
 0x144   : > { %v2024_v1 = vpop.permute.xlu1 %2023 }
 0x145   : > { %2035 = vst.msk [vmem:[#allocation2 + $0x28] sm:$0xff] %vm2033_vm1, %v2024_v1 }
 0x148   : > { %v2022_v8 = vpop.permute.xlu0 %2021 }
 0x149   : > { %2034 = vst.msk [vmem:[#allocation2 + $0x10] sm:$0xff] %vm2033_vm1, %v2022_v8  ;;  %vm2624_vm1 = vcmask 900096  }
 0x14c   : > { %v686_v45 = vpop.permute.xlu1 %685 }
 0x14d   : > { %697 = vst.msk [vmem:[#allocation2 + $0x18] sm:$0xff] %vm695_vm2, %v686_v45 }
 0x150   : > { %v684_v13 = vpop.permute.xlu0 %683 }
 0x151   : > { %696 = vst.msk [vmem:[#allocation2] sm:$0xff] %vm695_vm2, %v684_v13  ;;  %vm3089_vm2 = vcmask 736256  }
 0x154   : > { %v1750_v60 = vpop.permute.xlu1 %1749 }
 0x155   : > { %1761 = vst.msk [vmem:[#allocation2 + $0x20] sm:$0xff] %vm1759_vm11, %v1750_v60 }
 0x156   : > { %1897 = vst.msk [vmem:[#allocation2 + $0x20] sm:$0xff] %vm1893_vm0, %v1884_v35 }
 0x158   : > { %v1748_v58 = vpop.permute.xlu0 %1747 }
 0x159   : > { %1760 = vst.msk [vmem:[#allocation2 + $0x8] sm:$0xff] %vm1759_vm11, %v1748_v58  ;;  %vm2531_vm11 = vcmask 1031168  }
 0x15a   : > { %1894 = vst.msk [vmem:[#allocation2 + $0x8] sm:$0xff] %vm1893_vm0, %v1882_v49  ;;  %vm2436_vm0 = vcmask 1043456  }
 0x15c   : > { %v2158_v61 = vpop.permute.xlu1 %2157 }
 0x15d   : > { %2169 = vst.msk [vmem:[#allocation2 + $0x28] sm:$0xff] %vm2167_vm5, %v2158_v61  ;;  %v5439_v18 = vld [vmem:[#allocation2 + $0x20] sm:$0xff] }
 0x160   : > { %v2156_v62 = vpop.permute.xlu0 %2155 }
 0x161   : > { %2168 = vst.msk [vmem:[#allocation2 + $0x10] sm:$0xff] %vm2167_vm5, %v2156_v62  ;;  %v5447_v6 = vld [vmem:[#allocation2 + $0x8] sm:$0xff]  ;;  %vm3530_vm5 = vcmask 261120  }
 0x164   : > { %v820_v3 = vpop.permute.xlu1 %819 }
 0x165   : > { %831 = vst.msk [vmem:[#allocation2 + $0x18] sm:$0xff] %vm829_vm6, %v820_v3 }
 0x168   : > { %v818_v5 = vpop.permute.xlu0 %817 }
 0x169   : > { %830 = vst.msk [vmem:[#allocation2] sm:$0xff] %vm829_vm6, %v818_v5  ;;  %vm2996_vm6 = vcmask 744448  }
 0x16c   : > { %v5441_v7 = vld [vmem:[#allocation2 + $0x18] sm:$0xff] }
 0x16d   : > { %v5445_v10 = vpack.c.bf16 %v5439_v18, %v5441_v7 }
 0x170   : > { %v2292_v9 = vpop.permute.xlu1 %2291  ;;  %v5449_v14 = vld [vmem:[#allocation2] sm:$0xff] }
 0x171   : > { %2303 = vst.msk [vmem:[#allocation2 + $0x28] sm:$0xff] %vm2301_vm9, %v2292_v9  ;;  %v5454_v15 = vpack.c.bf16 %v5447_v6, %v5449_v14 }
 0x173   : > { %2599 = vrot.lane.b32.xlu0 %v5454_v15, %s4219_s28 }
 0x175   : > { %v2290_v16 = vpop.permute.xlu0 %2289 }
 0x176   : > { %2302 = vst.msk [vmem:[#allocation2 + $0x10] sm:$0xff] %vm2301_vm9, %v2290_v16  ;;  %vm2810_vm9 = vcmask 883712  }
 0x177   : > { %2603 = vrot.lane.b32.xlu0 %v5445_v10, %s4219_s28 }
 0x178   : > { %v2312_v17 = vld [vmem:[#allocation2 + $0x28] sm:$0xff] }
 0x179   : > { %v5461_v28 = vpack.c.bf16 %v2312_v17, %v2312_v17 }
 0x17b   : > { %2363 = vst.msk [vmem:[#allocation3 + $0x14] sm:$0xf] %vm2360_vm10, %v5461_v28  ;;  %3064 = vrot.lane.b32.xlu0 %v5454_v15, %s4213_s23 }
 0x17d   : > { %v2309_v19 = vld [vmem:[#allocation2 + $0x10] sm:$0xff] }
 0x17e   : > { %v5467_v22 = vpack.c.bf16 %v2309_v19, %v2309_v19 }
 0x17f   : > { %3068 = vrot.lane.b32.xlu0 %v5445_v10, %s4213_s23 }
 0x180   : > { %2361 = vst.msk [vmem:[#allocation3 + $0x8] sm:$0xf] %vm2360_vm10, %v5467_v22  ;;  %2601 = vrot.lane.b32.xlu1 %v5467_v22, %s4219_s28 }
 0x183   : > { %2514 = vrot.lane.b32.xlu0 %v5389_v12, %s4211_s21 }
 0x184   : > { %2605 = vrot.lane.b32.xlu1 %v5461_v28, %s4219_s28 }
 0x187   : > { %2518 = vrot.lane.b32.xlu0 %v5387_v11, %s4211_s21 }
 0x188   : > { %3066 = vrot.lane.b32.xlu1 %v5467_v22, %s4213_s23 }
 0x18b   : > { %2506 = vrot.lane.b32.xlu0 %v5454_v15, %s4211_s21 }
 0x18c   : > { %3070 = vrot.lane.b32.xlu1 %v5461_v28, %s4213_s23 }
 0x18f   : > { %2510 = vrot.lane.b32.xlu0 %v5445_v10, %s4211_s21 }
 0x190   : > { %2516 = vrot.lane.b32.xlu1 %v5404_v59, %s4211_s21 }
 0x193   : > { %2981 = vrot.lane.b32.xlu0 %v5404_v59, %s4221_s30 }
 0x194   : > { %2520 = vrot.lane.b32.xlu1 %v5395_v56, %s4211_s21 }
 0x197   : > { %2420 = vrot.lane.b32.xlu0 %v5389_v12, %s4222_s3 }
 0x198   : > { %2508 = vrot.lane.b32.xlu1 %v5467_v22, %s4211_s21 }
 0x19b   : > { %2424 = vrot.lane.b32.xlu0 %v5387_v11, %s4222_s3 }
 0x19c   : > { %2512 = vrot.lane.b32.xlu1 %v5461_v28, %s4211_s21 }
 0x19e   : > { %v2612_v24 = vpop.permute.xlu0 %2611 }
 0x19f   : > { %v2621_v20 = vrot.slane %v2612_v24, 4  ;;  %2973 = vrot.lane.b32.xlu0 %v5467_v22, %s4221_s30 }
 0x1a0   : > { %2985 = vrot.lane.b32.xlu1 %v5395_v56, %s4221_s30 }
 0x1a1   : > { %v2614_v25 = vpop.permute.xlu1 %2613 }
 0x1a2   : > { %v3077_v26 = vpop.permute.xlu0 %3076  ;;  %v2622_v27 = vrot.slane %v2614_v25, 4  ;;  %2647 = vst.msk [vmem:[#allocation3 + $0xbc] sm:$0xf] %vm2360_vm10, %v2614_v25 }
 0x1a3   : > { %v3086_v38 = vrot.slane %v3077_v26, 4  ;;  %2412 = vrot.lane.b32.xlu0 %v5454_v15, %s4222_s3 }
 0x1a4   : > { %v2630_v29 = vsel %vm2436_vm0, %v2621_v20, %v2622_v27  ;;  %2422 = vrot.lane.b32.xlu1 %v5404_v59, %s4222_s3 }
 0x1a5   : > { %v2631_v31 = vsel %vm2624_vm1, %v2612_v24, %v2630_v29  ;;  %v3079_v33 = vpop.permute.xlu1 %3078 }
 0x1a6   : > { %v2608_v36 = vpop.permute.xlu0 %2607  ;;  %v3087_v40 = vrot.slane %v3079_v33, 4  ;;  %3112 = vst.msk [vmem:[#allocation3 + $0x1ac] sm:$0xf] %vm2360_vm10, %v3079_v33  ;;  %v5605_v33 = vld [vmem:[%s5837_s1 + $0x8] ss:$12 sps:$4 sm:$0xff]  }
 0x1a7   : > { %v2619_v42 = vrot.slane %v2608_v36, 4  ;;  %2416 = vrot.lane.b32.xlu0 %v5445_v10, %s4222_s3 }
 0x1a8   : > { %v3095_v52 = vsel %vm2436_vm0, %v3086_v38, %v3087_v40  ;;  %2426 = vrot.lane.b32.xlu1 %v5395_v56, %s4222_s3 }
 0x1a9   : > { %v3096_v41 = vsel %vm3089_vm2, %v3077_v26, %v3095_v52  ;;  %v2610_v34 = vpop.permute.xlu1 %2609 }
 0x1aa   : > { %v2620_v43 = vrot.slane %v2610_v34, 4  ;;  %2645 = vst.msk [vmem:[#allocation3 + $0xb0] sm:$0xf] %vm2360_vm10, %v2610_v34  ;;  %v3073_v37 = vpop.permute.xlu0 %3072 }
 0x1ab   : > { %v3084_v63 = vrot.slane %v3073_v37, 4  ;;  %2888 = vrot.lane.b32.xlu0 %v5404_v59, %s4215_s25 }
 0x1ac   : > { %v2628_v47 = vsel %vm2436_vm0, %v2619_v42, %v2620_v43  ;;  %2977 = vrot.lane.b32.xlu1 %v5461_v28, %s4221_s30 }
 0x1ad   : > { %v2629_v39 = vsel %vm2624_vm1, %v2608_v36, %v2628_v47  ;;  %v3075_v30 = vpop.permute.xlu1 %3074 }
 0x1ae   : > { %v3085_v23 = vrot.slane %v3075_v30, 4  ;;  %3110 = vst.msk [vmem:[#allocation3 + $0x1a0] sm:$0xf] %vm2360_vm10, %v3075_v30  ;;  %v3964_v32 = vcombine.high %v2629_v39, %v2631_v31  ;;  %v3963_v54 = vcombine.low %v2629_v39, %v2631_v31 }
 0x1af   : > { %2880 = vrot.lane.b32.xlu0 %v5467_v22, %s4215_s25 }
 0x1b0   : > { %v3093_v2 = vsel %vm2436_vm0, %v3084_v63, %v3085_v23  ;;  %3540 = vmatprep.subr.bf16.mxu0 %v3964_v32  ;;  %2414 = vrot.lane.b32.xlu1 %v5467_v22, %s4222_s3  ;;  %v5623_v32 = vld [vmem:[%s5837_s1 + $0x20] ss:$12 sps:$4 sm:$0xff]  }
 0x1b1   : > { %v3094_v4 = vsel %vm3089_vm2, %v3073_v37, %v3093_v2  ;;  %3541 = vmatpush1.bf16.msra.mxu0 %v3963_v54 }
 0x1b2   : > { %v3994_v50 = vcombine.high %v3094_v4, %v3096_v41  ;;  %v3993_v44 = vcombine.low %v3094_v4, %v3096_v41 }
 0x1b3   : > { %2795 = vrot.lane.b32.xlu0 %v5404_v59, %s4216_s26 }
 0x1b4   : > { %3615 = vmatprep.subr.bf16.mxu1 %v3994_v50  ;;  %2418 = vrot.lane.b32.xlu1 %v5461_v28, %s4222_s3 }
 0x1b5   : > { %3616 = vmatpush1.bf16.msra.mxu1 %v3993_v44 }
 0x1b7   : > { %2979 = vrot.lane.b32.xlu0 %v5389_v12, %s4221_s30 }
 0x1b8   : > { %2892 = vrot.lane.b32.xlu1 %v5395_v56, %s4215_s25 }
 0x1bb   : > { %2787 = vrot.lane.b32.xlu0 %v5467_v22, %s4216_s26 }
 0x1bc   : > { %2884 = vrot.lane.b32.xlu1 %v5461_v28, %s4215_s25 }
 0x1bf   : > { %2971 = vrot.lane.b32.xlu0 %v5454_v15, %s4221_s30 }
 0x1c0   : > { %2799 = vrot.lane.b32.xlu1 %v5395_v56, %s4216_s26 }
 0x1c3   : > { %2702 = vrot.lane.b32.xlu0 %v5404_v59, %s4224_s4  ;;  %v5572_v59 = vld [vmem:[%s5837_s1 + $0x4] ss:$12 sps:$4 sm:$0xff]  }
 0x1c4   : > { %2983 = vrot.lane.b32.xlu1 %v5387_v11, %s4221_s30  ;;  %3572 = vmatprep.mubr.bf16.mxu0 %v5572_v59 }
 0x1c7   : > { %2886 = vrot.lane.b32.xlu0 %v5389_v12, %s4215_s25 }
 0x1c8   : > { %2791 = vrot.lane.b32.xlu1 %v5461_v28, %s4216_s26 }
 0x1cb   : > { %2694 = vrot.lane.b32.xlu0 %v5467_v22, %s4224_s4 }
 0x1cc   : > { %2975 = vrot.lane.b32.xlu1 %v5445_v10, %s4221_s30 }
 0x1cf   : > { %2878 = vrot.lane.b32.xlu0 %v5454_v15, %s4215_s25 }
 0x1d0   : > { %2706 = vrot.lane.b32.xlu1 %v5395_v56, %s4224_s4 }
 0x1d3   : > { %2793 = vrot.lane.b32.xlu0 %v5389_v12, %s4216_s26 }
 0x1d4   : > { %2890 = vrot.lane.b32.xlu1 %v5387_v11, %s4215_s25 }
 0x1d7   : > { %2785 = vrot.lane.b32.xlu0 %v5454_v15, %s4216_s26 }
 0x1d8   : > { %2698 = vrot.lane.b32.xlu1 %v5461_v28, %s4224_s4 }
 0x1db   : > { %2700 = vrot.lane.b32.xlu0 %v5389_v12, %s4224_s4 }
 0x1dc   : > { %2882 = vrot.lane.b32.xlu1 %v5445_v10, %s4215_s25  ;;  %s4132_s25 = smul.u32 144, %s5854_s10 }
 0x1de   : > { %s5804_s28 = scalar_lea.vmem %s5838_s2, %s4132_s25 }
 0x1df   : > { %2692 = vrot.lane.b32.xlu0 %v5454_v15, %s4224_s4 }
 0x1e0   : > { %2797 = vrot.lane.b32.xlu1 %v5387_v11, %s4216_s26 }
 0x1e4   : > { %2789 = vrot.lane.b32.xlu1 %v5445_v10, %s4216_s26 }
 0x1e5   : > { %v2600_v56 = vpop.permute.xlu0 %2599 }
 0x1e6   : > { %v2615_v51 = vrot.slane %v2600_v56, 4 }
 0x1e8   : > { %2704 = vrot.lane.b32.xlu1 %v5387_v11, %s4224_s4 }
 0x1e9   : > { %v2604_v46 = vpop.permute.xlu0 %2603 }
 0x1ea   : > { %v2617_v8 = vrot.slane %v2604_v46, 4 }
 0x1ec   : > { %2696 = vrot.lane.b32.xlu1 %v5445_v10, %s4224_s4 }
 0x1ed   : > { %v3065_v48 = vpop.permute.xlu0 %3064 }
 0x1ee   : > { %v3080_v61 = vrot.slane %v3065_v48, 4 }
 0x1f1   : > { %v3069_v49 = vpop.permute.xlu0 %3068 }
 0x1f2   : > { %v2602_v35 = vpop.permute.xlu1 %2601  ;;  %v3082_v17 = vrot.slane %v3069_v49, 4 }
 0x1f3   : > { %v2616_v0 = vrot.slane %v2602_v35, 4  ;;  %2641 = vst.msk [vmem:[#allocation3 + $0x98] sm:$0xf] %vm2360_vm10, %v2602_v35 }
 0x1f5   : > { %v2623_v12 = vsel %vm2436_vm0, %v2615_v51, %v2616_v0  ;;  %v2515_v1 = vpop.permute.xlu0 %2514  ;;  %v5643_v0 = vld [vmem:[%s5837_s1 + $0x38] ss:$12 sps:$4 sm:$0xff]  }
 0x1f6   : > { %v2625_v53 = vsel %vm2624_vm1, %v2600_v56, %v2623_v12  ;;  %v2606_v55 = vpop.permute.xlu1 %2605  ;;  %v2526_v20 = vrot.slane %v2515_v1, 4 }
 0x1f7   : > { %v2618_v45 = vrot.slane %v2606_v55, 4  ;;  %2643 = vst.msk [vmem:[#allocation3 + $0xa4] sm:$0xf] %vm2360_vm10, %v2606_v55 }
 0x1f9   : > { %v2626_v11 = vsel %vm2436_vm0, %v2617_v8, %v2618_v45  ;;  %v2519_v58 = vpop.permute.xlu0 %2518 }
 0x1fa   : > { %v2627_v13 = vsel %vm2624_vm1, %v2604_v46, %v2626_v11  ;;  %v3067_v60 = vpop.permute.xlu1 %3066  ;;  %v2528_v52 = vrot.slane %v2519_v58, 4 }
 0x1fb   : > { %v3081_v62 = vrot.slane %v3067_v60, 4  ;;  %3106 = vst.msk [vmem:[#allocation3 + $0x188] sm:$0xf] %vm2360_vm10, %v3067_v60  ;;  %v3961_v3 = vcombine.high %v2625_v53, %v2627_v13  ;;  %v3960_v5 = vcombine.low %v2625_v53, %v2627_v13 }
 0x1fd   : > { %v3088_v10 = vsel %vm2436_vm0, %v3080_v61, %v3081_v62  ;;  %3542 = vmatprep.subr.bf16.mxu0 %v3961_v3  ;;  %v2507_v16 = vpop.permute.xlu0 %2506  ;;  %v4164_v61 = vld [vmem:[#allocation3 + $0xb0] ss:$12 sps:$4 sm:$0xff]  }
 0x1fe   : > { %v3090_v9 = vsel %vm3089_vm2, %v3065_v48, %v3088_v10  ;;  %v3071_v15 = vpop.permute.xlu1 %3070  ;;  %3543 = vmatpush1.bf16.msra.mxu0 %v3960_v5  ;;  %v2522_v47 = vrot.slane %v2507_v16, 4 }
 0x1ff   : > { %v3083_v28 = vrot.slane %v3071_v15, 4  ;;  %3108 = vst.msk [vmem:[#allocation3 + $0x194] sm:$0xf] %vm2360_vm10, %v3071_v15 }
 0x201   : > { %v3091_v19 = vsel %vm2436_vm0, %v3082_v17, %v3083_v28  ;;  %v2511_v25 = vpop.permute.xlu0 %2510 }
 0x202   : > { %v3092_v22 = vsel %vm3089_vm2, %v3069_v49, %v3091_v19  ;;  %v2517_v24 = vpop.permute.xlu1 %2516  ;;  %v2524_v50 = vrot.slane %v2511_v25, 4 }
 0x203   : > { %v2527_v26 = vrot.slane %v2517_v24, 4  ;;  %2552 = vst.msk [vmem:[#allocation3 + $0x80] sm:$0xf] %vm2360_vm10, %v2517_v24  ;;  %v3991_v27 = vcombine.high %v3090_v9, %v3092_v22  ;;  %v3990_v29 = vcombine.low %v3090_v9, %v3092_v22 }
 0x205   : > { %v2535_v31 = vsel %vm2436_vm0, %v2526_v20, %v2527_v26  ;;  %3617 = vmatprep.subr.bf16.mxu1 %v3991_v27  ;;  %v5608_v40 = vpop.permute.xlu0 %2981 }
 0x206   : > { %v2536_v38 = vsel %vm2531_vm11, %v2515_v1, %v2535_v31  ;;  %v2521_v36 = vpop.permute.xlu1 %2520  ;;  %3618 = vmatpush1.bf16.msra.mxu1 %v3990_v29  ;;  %3017 = vst.msk [vmem:[#allocation3 + $0x170] sm:$0xf] %vm2360_vm10, %v5608_v40  ;;  %v4166_v29 = vld [vmem:[#allocation3 + $0x98] ss:$12 sps:$4 sm:$0xff]  }
 0x207   : > { %v2529_v41 = vrot.slane %v2521_v36, 4  ;;  %2554 = vst.msk [vmem:[#allocation3 + $0x8c] sm:$0xf] %vm2360_vm10, %v2521_v36 }
 0x209   : > { %v2537_v34 = vsel %vm2436_vm0, %v2528_v52, %v2529_v41  ;;  %3996 = vmatmul.mubr.msk.bf16.vlgmr.msra.gmra.mxu1 %vm3530_vm5, %v5605_v33  ;;  %v2421_v37 = vpop.permute.xlu0 %2420  ;;  %v2992_v41 = vrot.slane %v5608_v40, 4 }
 0x20a   : > { %v2538_v42 = vsel %vm2531_vm11, %v2519_v58, %v2537_v34  ;;  %v2509_v43 = vpop.permute.xlu1 %2508  ;;  %3645 = vmatprep.mubr.bf16.mxu1 %v4223_v21  ;;  %v2432_v55 = vrot.slane %v2421_v37, 4 }
 0x20b   : > { %v2523_v39 = vrot.slane %v2509_v43, 4  ;;  %2548 = vst.msk [vmem:[#allocation3 + $0x68] sm:$0xf] %vm2360_vm10, %v2509_v43  ;;  %v3958_v30 = vcombine.high %v2536_v38, %v2538_v42  ;;  %v3957_v63 = vcombine.low %v2536_v38, %v2538_v42 }
 0x20d   : > { %v2530_v23 = vsel %vm2436_vm0, %v2522_v47, %v2523_v39  ;;  %3544 = vmatprep.subr.bf16.mxu0 %v3958_v30  ;;  %v2425_v4 = vpop.permute.xlu0 %2424  ;;  %v3129_v47 = vld [vmem:[#allocation3 + $0x18] sm:$0xff]  ;;  %v3131_v39 = vld [vmem:[#allocation3 + $0x24] sm:$0xff] }
 0x20e   : > { %v2532_v54 = vsel %vm2531_vm11, %v2507_v16, %v2530_v23  ;;  %v2513_v2 = vpop.permute.xlu1 %2512  ;;  %3545 = vmatpush1.bf16.msra.mxu0 %v3957_v63  ;;  %v2434_v60 = vrot.slane %v2425_v4, 4  ;;  %v4169_v30 = vld [vmem:[#allocation3 + $0x1c] ss:$12 sps:$4 sm:$0xff]   ;;  %v3945_v40 = vcombine.low %v3129_v47, %v3131_v39 }
 0x20f   : > { %v2525_v44 = vrot.slane %v2513_v2, 4  ;;  %2550 = vst.msk [vmem:[#allocation3 + $0x74] sm:$0xf] %vm2360_vm10, %v2513_v2  ;;  %v4195_v2 = vpack.c.bf16 %v5439_v18, %v5447_v6 }
 0x211   : > { %v2533_v56 = vsel %vm2436_vm0, %v2524_v50, %v2525_v44  ;;  %3997 = vmatmul.mubr.msk.bf16.gmra.mxu1 %vm3530_vm5, %v5623_v32  ;;  %v5633_v35 = vpop.permute.xlu0 %2973 }
 0x212   : > { %v2534_v46 = vsel %vm2531_vm11, %v2511_v25, %v2533_v56  ;;  %v5631_v48 = vpop.permute.xlu1 %2985  ;;  %3655 = vmatprep.mubr.bf16.mxu1 %v4223_v21  ;;  %3013 = vst.msk [vmem:[#allocation3 + $0x158] sm:$0xf] %vm2360_vm10, %v5633_v35  ;;  %v2988_v56 = vrot.slane %v5633_v35, 4 }
 0x213   : > { %3019 = vst.msk [vmem:[#allocation3 + $0x17c] sm:$0xf] %vm2360_vm10, %v5631_v48  ;;  %v3955_v49 = vcombine.high %v2532_v54, %v2534_v46  ;;  %v3954_v51 = vcombine.low %v2532_v54, %v2534_v46  ;;  %v4168_v46 = vld [vmem:[#allocation3 + $0x80] ss:$12 sps:$4 sm:$0xff]   ;;  %v2994_v35 = vrot.slane %v5631_v48, 4 }
 0x215   : > { %3546 = vmatprep.subr.bf16.mxu0 %v3955_v49  ;;  %v2413_v53 = vpop.permute.xlu0 %2412 }
 0x216   : > { %v2423_v12 = vpop.permute.xlu1 %2422  ;;  %3547 = vmatpush1.bf16.msra.mxu0 %v3954_v51  ;;  %v2428_v17 = vrot.slane %v2413_v53, 4  ;;  %v4196_v51 = vpack.c.bf16 %v5441_v7, %v5449_v14 }
 0x217   : > { %v2433_v21 = vrot.slane %v2423_v12, 4  ;;  %2459 = vst.msk [vmem:[#allocation3 + $0x50] sm:$0xf] %vm2360_vm10, %v2423_v12 }
 0x219   : > { %v2442_v1 = vsel %vm2436_vm0, %v2432_v55, %v2433_v21  ;;  %3998 = vmatmul.mubr.msk.bf16.gmra.mxu1 %vm3530_vm5, %v5643_v0  ;;  %v2417_v13 = vpop.permute.xlu0 %2416 }
 0x21a   : > { %v2443_v8 = vsel %vm2438_vm15, %v2421_v37, %v2442_v1  ;;  %v2427_v45 = vpop.permute.xlu1 %2426  ;;  %v4162_v11 = vld [vmem:[#allocation3 + $0x170] ss:$12 sps:$4 sm:$0xff]   ;;  %3698 = vmatprep.mubr.bf16.mxu1 %v5572_v59  ;;  %v2430_v26 = vrot.slane %v2417_v13, 4  ;;  %v4172_v1 = vld [vmem:[#allocation3 + $0x68] ss:$12 sps:$4 sm:$0xff]  }
 0x21b   : > { %v2435_v58 = vrot.slane %v2427_v45, 4  ;;  %2461 = vst.msk [vmem:[#allocation3 + $0x5c] sm:$0xf] %vm2360_vm10, %v2427_v45  ;;  %4076 = vmatprep.subr.bf16.mxu1 %v4162_v11 }
 0x21c   : > { %4077 = vmatpush3.bf16.msra.mxu1 %v4164_v61 }
 0x21d   : > { %v2444_v62 = vsel %vm2436_vm0, %v2434_v60, %v2435_v58  ;;  %v5656_v10 = vpop.permute.xlu0 %2888 }
 0x21e   : > { %v2445_v3 = vsel %vm2438_vm15, %v2425_v4, %v2444_v62  ;;  %v5654_v5 = vpop.permute.xlu1 %2977  ;;  %2924 = vst.msk [vmem:[#allocation3 + $0x140] sm:$0xf] %vm2360_vm10, %v5656_v10 }
 0x21f   : > { %3015 = vst.msk [vmem:[#allocation3 + $0x164] sm:$0xf] %vm2360_vm10, %v5654_v5  ;;  %v3952_v59 = vcombine.high %v2443_v8, %v2445_v3  ;;  %v3951_v9 = vcombine.low %v2443_v8, %v2445_v3 }
 0x221   : > { %3548 = vmatprep.subr.bf16.mxu0 %v3952_v59  ;;  %v5662_v16 = vpop.permute.xlu0 %2880 }
 0x222   : > { %v2415_v15 = vpop.permute.xlu1 %2414  ;;  %3549 = vmatpush1.bf16.msra.mxu0 %v3951_v9  ;;  %2920 = vst.msk [vmem:[#allocation3 + $0x128] sm:$0xf] %vm2360_vm10, %v5662_v16  ;;  %v4174_v48 = vld [vmem:[#allocation3 + $0x50] ss:$12 sps:$4 sm:$0xff]  }
 0x223   : > { %v2429_v28 = vrot.slane %v2415_v15, 4  ;;  %2455 = vst.msk [vmem:[#allocation3 + $0x38] sm:$0xf] %vm2360_vm10, %v2415_v15 }
 0x225   : > { %v2437_v19 = vsel %vm2436_vm0, %v2428_v17, %v2429_v28  ;;  %v5669_v20 = vpop.permute.xlu0 %2795 }
 0x226   : > { %v2439_v22 = vsel %vm2438_vm15, %v2413_v53, %v2437_v19  ;;  %v2419_v24 = vpop.permute.xlu1 %2418  ;;  %v4165_v25 = vld [vmem:[#allocation3 + $0x158] ss:$12 sps:$4 sm:$0xff]   ;;  %2831 = vst.msk [vmem:[#allocation3 + $0x110] sm:$0xf] %vm2360_vm10, %v5669_v20 }
 0x227   : > { %v2431_v27 = vrot.slane %v2419_v24, 4  ;;  %2457 = vst.msk [vmem:[#allocation3 + $0x44] sm:$0xf] %vm2360_vm10, %v2419_v24  ;;  %4078 = vmatprep.subr.bf16.mxu1 %v4165_v25  ;;  %v2895_v25 = vrot.slane %v5662_v16, 4 }
 0x228   : > { %4079 = vmatpush3.bf16.msra.mxu1 %v4166_v29 }
 0x229   : > { %v2440_v31 = vsel %vm2436_vm0, %v2430_v26, %v2431_v27  ;;  %v2980_v52 = vpop.permute.xlu0 %2979 }
 0x22a   : > { %v2441_v38 = vsel %vm2438_vm15, %v2417_v13, %v2440_v31  ;;  %v5676_v36 = vpop.permute.xlu1 %2892  ;;  %v2991_v34 = vrot.slane %v2980_v52, 4  ;;  %v2899_v13 = vrot.slane %v5656_v10, 4  ;;  %v2990_v10 = vrot.slane %v5654_v5, 4 }
 0x22b   : > { %2926 = vst.msk [vmem:[#allocation3 + $0x14c] sm:$0xf] %vm2360_vm10, %v5676_v36  ;;  %v3949_v42 = vcombine.high %v2439_v22, %v2441_v38  ;;  %v3948_v43 = vcombine.low %v2439_v22, %v2441_v38  ;;  %v2901_v16 = vrot.slane %v5676_v36, 4 }
 0x22c   : > { %v3000_v37 = vsel %vm2436_vm0, %v2991_v34, %v2992_v41  ;;  %v2806_v34 = vrot.slane %v5669_v20, 4  ;;  %v4180_v20 = vld [vmem:[#allocation3 + $0x20] ss:$12 sps:$4 sm:$0xff]  }
 0x22d   : > { %3550 = vmatprep.subr.bf16.mxu0 %v3949_v42  ;;  %v3001_v23 = vsel %vm2996_vm6, %v2980_v52, %v3000_v37  ;;  %v5685_v54 = vpop.permute.xlu0 %2787 }
 0x22e   : > { %v5682_v63 = vpop.permute.xlu1 %2884  ;;  %3551 = vmatpush1.bf16.msra.mxu0 %v3948_v43  ;;  %2827 = vst.msk [vmem:[#allocation3 + $0xf8] sm:$0xf] %vm2360_vm10, %v5685_v54  ;;  %v4177_v26 = vld [vmem:[#allocation3 + $0x38] ss:$12 sps:$4 sm:$0xff]  }
 0x22f   : > { %2922 = vst.msk [vmem:[#allocation3 + $0x134] sm:$0xf] %vm2360_vm10, %v5682_v63  ;;  %3552 = vmatprep.subr.bf16.mxu0 %v4169_v30 }
 0x231   : > { %v2972_v44 = vpop.permute.xlu0 %2971 }
 0x232   : > { %v5693_v4 = vpop.permute.xlu1 %2799  ;;  %v4167_v50 = vld [vmem:[#allocation3 + $0x140] ss:$12 sps:$4 sm:$0xff]   ;;  %3553 = vmatpush1.bf16.msra.mxu0 %v3945_v40  ;;  %v2987_v49 = vrot.slane %v2972_v44, 4 }
 0x233   : > { %2833 = vst.msk [vmem:[#allocation3 + $0x11c] sm:$0xf] %vm2360_vm10, %v5693_v4  ;;  %3554 = vmatprep.subr.bf16.mxu0 %v4195_v2  ;;  %4080 = vmatprep.subr.bf16.mxu1 %v4167_v50  ;;  %v2802_v50 = vrot.slane %v5685_v54, 4  ;;  %v2897_v54 = vrot.slane %v5682_v63, 4 }
 0x234   : > { %4081 = vmatpush3.bf16.msra.mxu1 %v4168_v46  ;;  %v2995_v18 = vsel %vm2436_vm0, %v2987_v49, %v2988_v56 }
 0x235   : > { %v2997_v53 = vsel %vm2996_vm6, %v2972_v44, %v2995_v18  ;;  %v5702_v55 = vpop.permute.xlu0 %2702 }
 0x236   : > { %v2984_v6 = vpop.permute.xlu1 %2983  ;;  %v4171_v12 = vld [vmem:[#allocation3 + $0x128] ss:$12 sps:$4 sm:$0xff]   ;;  %3555 = vmatpush1.bf16.msra.mxu0 %v4196_v51  ;;  %2738 = vst.msk [vmem:[#allocation3 + $0xe0] sm:$0xf] %vm2360_vm10, %v5702_v55 }
 0x237   : > { %v2993_v21 = vrot.slane %v2984_v6, 4  ;;  %4082 = vmatprep.subr.bf16.mxu1 %v4171_v12 }
 0x238   : > { %4083 = vmatpush3.bf16.msra.mxu1 %v4172_v1  ;;  %v2808_v1 = vrot.slane %v5693_v4, 4 }
 0x239   : > { %v3002_v7 = vsel %vm2436_vm0, %v2993_v21, %v2994_v35  ;;  %v2887_v11 = vpop.permute.xlu0 %2886 }
 0x23a   : > { %v3003_v14 = vsel %vm2996_vm6, %v2984_v6, %v3002_v7  ;;  %v5709_v8 = vpop.permute.xlu1 %2791  ;;  %v4173_v45 = vld [vmem:[#allocation3 + $0x110] ss:$12 sps:$4 sm:$0xff]   ;;  %v2898_v60 = vrot.slane %v2887_v11, 4  ;;  %v2713_v6 = vrot.slane %v5702_v55, 4 }
 0x23b   : > { %2829 = vst.msk [vmem:[#allocation3 + $0x104] sm:$0xf] %vm2360_vm10, %v5709_v8  ;;  %v3988_v58 = vcombine.high %v3001_v23, %v3003_v14  ;;  %v3987_v61 = vcombine.low %v3001_v23, %v3003_v14  ;;  %4084 = vmatprep.subr.bf16.mxu1 %v4173_v45 }
 0x23c   : > { %4085 = vmatpush3.bf16.msra.mxu1 %v4174_v48  ;;  %v2907_v62 = vsel %vm2436_vm0, %v2898_v60, %v2899_v13  ;;  %v4182_v60 = vld [vmem:[#allocation3 + $0x8] ss:$12 sps:$4 sm:$0xff]  }
 0x23d   : > { %3556 = vmatprep.subr.bf16.mxu0 %v3988_v58  ;;  %v2908_v59 = vsel %vm2903_vm4, %v2887_v11, %v2907_v62  ;;  %v5716_v9 = vpop.permute.xlu0 %2694  ;;  %v4183_v62 = vld [vmem:[%s5837_s1] ss:$12 sps:$4 sm:$0xff]  }
 0x23e   : > { %v2976_v3 = vpop.permute.xlu1 %2975  ;;  %3557 = vmatpush2.bf16.msra.mxu0 %v3987_v61  ;;  %2734 = vst.msk [vmem:[#allocation3 + $0xc8] sm:$0xf] %vm2360_vm10, %v5716_v9  ;;  %v2709_v7 = vrot.slane %v5716_v9, 4 }
 0x23f   : > { %v2989_v15 = vrot.slane %v2976_v3, 4 }
 0x241   : > { %v2998_v17 = vsel %vm2436_vm0, %v2989_v15, %v2990_v10  ;;  %v2879_v24 = vpop.permute.xlu0 %2878 }
 0x242   : > { %v2999_v28 = vsel %vm2996_vm6, %v2976_v3, %v2998_v17  ;;  %v5723_v19 = vpop.permute.xlu1 %2706  ;;  %v4176_v22 = vld [vmem:[#allocation3 + $0xf8] ss:$12 sps:$4 sm:$0xff]   ;;  %v2894_v27 = vrot.slane %v2879_v24, 4  ;;  %v2804_v17 = vrot.slane %v5709_v8, 4 }
 0x243   : > { %2740 = vst.msk [vmem:[#allocation3 + $0xec] sm:$0xf] %vm2360_vm10, %v5723_v19  ;;  %v3985_v5 = vcombine.high %v2997_v53, %v2999_v28  ;;  %v3984_v29 = vcombine.low %v2997_v53, %v2999_v28  ;;  %4086 = vmatprep.subr.bf16.mxu1 %v4176_v22  ;;  %v4186_v22 = vld [vmem:[#allocation3 + $0x1a0] ss:$12 sps:$4 sm:$0xff]  }
 0x244   : > { %4087 = vmatpush3.bf16.msra.mxu1 %v4177_v26  ;;  %v2902_v31 = vsel %vm2436_vm0, %v2894_v27, %v2895_v25 }
 0x245   : > { %3558 = vmatprep.subr.bf16.mxu0 %v3985_v5  ;;  %v2904_v52 = vsel %vm2903_vm4, %v2879_v24, %v2902_v31  ;;  %v2794_v41 = vpop.permute.xlu0 %2793  ;;  %v4187_v31 = vld [vmem:[#allocation3 + $0x188] ss:$12 sps:$4 sm:$0xff]  }
 0x246   : > { %v2891_v38 = vpop.permute.xlu1 %2890  ;;  %3559 = vmatpush2.bf16.msra.mxu0 %v3984_v29  ;;  %v2805_v43 = vrot.slane %v2794_v41, 4  ;;  %v2715_v29 = vrot.slane %v5723_v19, 4 }
 0x247   : > { %v2900_v42 = vrot.slane %v2891_v38, 4 }
 0x248   : > { %v2814_v47 = vsel %vm2436_vm0, %v2805_v43, %v2806_v34  ;;  %v4191_v34 = vld [vmem:[%s5837_s1 + $0x34] ss:$12 sps:$4 sm:$0xff]  }
 0x249   : > { %v2909_v37 = vsel %vm2436_vm0, %v2900_v42, %v2901_v16  ;;  %v5738_v40 = vsel %vm2810_vm9, %v2794_v41, %v2814_v47  ;;  %v2786_v2 = vpop.permute.xlu0 %2785  ;;  %v4190_v41 = vld [vmem:[%s5837_s1 + $0x18] ss:$12 sps:$4 sm:$0xff]  }
 0x24a   : > { %v2910_v39 = vsel %vm2903_vm4, %v2891_v38, %v2909_v37  ;;  %v5735_v30 = vpop.permute.xlu1 %2698  ;;  %v4179_v23 = vld [vmem:[#allocation3 + $0xe0] ss:$12 sps:$4 sm:$0xff]   ;;  %v2801_v36 = vrot.slane %v2786_v2, 4 }
 0x24b   : > { %2736 = vst.msk [vmem:[#allocation3 + $0xd4] sm:$0xf] %vm2360_vm10, %v5735_v30  ;;  %v3982_v44 = vcombine.high %v2908_v59, %v2910_v39  ;;  %v3981_v56 = vcombine.low %v2908_v59, %v2910_v39  ;;  %4088 = vmatprep.subr.bf16.mxu1 %v4179_v23  ;;  %v4188_v59 = vld [vmem:[%s5837_s1 + $0x1c] ss:$12 sps:$4 sm:$0xff]   ;;  %v2711_v43 = vrot.slane %v5735_v30, 4  ;;  %vm4225_vm10 = vmmov 0  }
 0x24c   : > { %4089 = vmatpush3.bf16.msra.mxu1 %v4180_v20  ;;  %v2809_v46 = vsel %vm2436_vm0, %v2801_v36, %v2802_v50  ;;  %v4193_v20 = vld [vmem:[%s5837_s1 + $0x30] ss:$12 sps:$4 sm:$0xff]  }
 0x24d   : > { %3560 = vmatprep.subr.bf16.mxu0 %v3982_v44  ;;  %v2811_v51 = vsel %vm2810_vm9, %v2786_v2, %v2809_v46  ;;  %v2701_v18 = vpop.permute.xlu0 %2700 }
 0x24e   : > { %v2883_v49 = vpop.permute.xlu1 %2882  ;;  %3561 = vmatpush2.bf16.msra.mxu0 %v3981_v56  ;;  %v2712_v53 = vrot.slane %v2701_v18, 4 }
 0x24f   : > { %v2896_v12 = vrot.slane %v2883_v49, 4 }
 0x250   : > { %v2721_v21 = vsel %vm2436_vm0, %v2712_v53, %v2713_v6 }
 0x251   : > { %v2905_v35 = vsel %vm2436_vm0, %v2896_v12, %v2897_v54  ;;  %v2722_v13 = vsel %vm2717_vm7, %v2701_v18, %v2721_v21  ;;  %v2693_v48 = vpop.permute.xlu0 %2692 }
 0x252   : > { %v2906_v14 = vsel %vm2903_vm4, %v2883_v49, %v2905_v35  ;;  %v2798_v45 = vpop.permute.xlu1 %2797  ;;  %v4181_v11 = vld [vmem:[#allocation3 + $0xc8] ss:$12 sps:$4 sm:$0xff]   ;;  %v2708_v55 = vrot.slane %v2693_v48, 4 }
 0x253   : > { %v2807_v63 = vrot.slane %v2798_v45, 4  ;;  %v3979_v58 = vcombine.high %v2904_v52, %v2906_v14  ;;  %v3978_v61 = vcombine.low %v2904_v52, %v2906_v14  ;;  %4090 = vmatprep.subr.bf16.mxu1 %v4181_v11 }
 0x254   : > { %4091 = vmatpush3.bf16.msra.mxu1 %v4182_v60  ;;  %v2716_v3 = vsel %vm2436_vm0, %v2708_v55, %v2709_v7 }
 0x255   : > { %v2816_v4 = vsel %vm2436_vm0, %v2807_v63, %v2808_v1  ;;  %3562 = vmatprep.subr.bf16.mxu0 %v3979_v58  ;;  %4115 = vmatprep.subr.bf16.mxu1 %v5308_v57  ;;  %v2718_v15 = vsel %vm2717_vm7, %v2693_v48, %v2716_v3 }
 0x256   : > { %v2817_v9 = vsel %vm2810_vm9, %v2798_v45, %v2816_v4  ;;  %v2790_v10 = vpop.permute.xlu1 %2789  ;;  %3563 = vmatpush2.bf16.msra.mxu0 %v3978_v61 }
 0x257   : > { %v2803_v28 = vrot.slane %v2790_v10, 4  ;;  %v3976_v24 = vcombine.high %v5738_v40, %v2817_v9  ;;  %v3975_v25 = vcombine.low %v5738_v40, %v2817_v9  ;;  %3699 = vmatmul.mubr.bf16.vlgmr.msra.gmra.mxu1 %v4183_v62 }
 0x258   : > { %4116 = vmatpush3.bf16.msra.mxu1 %v4186_v22  ;;  %3706 = vmatprep.mubr.bf16.mxu1 %v4188_v59 }
 0x259   : > { %v2812_v26 = vsel %vm2436_vm0, %v2803_v28, %v2804_v17  ;;  %4117 = vmatprep.subr.bf16.mxu1 %v5308_v57  ;;  %3564 = vmatprep.subr.bf16.mxu0 %v3976_v24 }
 0x25a   : > { %v2813_v27 = vsel %vm2810_vm9, %v2790_v10, %v2812_v26  ;;  %v2705_v5 = vpop.permute.xlu1 %2704  ;;  %3565 = vmatpush2.bf16.msra.mxu0 %v3975_v25 }
 0x25b   : > { %v2714_v8 = vrot.slane %v2705_v5, 4  ;;  %v3973_v38 = vcombine.high %v2811_v51, %v2813_v27  ;;  %v3972_v52 = vcombine.low %v2811_v51, %v2813_v27 }
 0x25c   : > { %4118 = vmatpush3.bf16.msra.mxu1 %v4187_v31 }
 0x25d   : > { %v2723_v16 = vsel %vm2436_vm0, %v2714_v8, %v2715_v29  ;;  %3566 = vmatprep.subr.bf16.mxu0 %v3973_v38 }
 0x25e   : > { %v2724_v42 = vsel %vm2717_vm7, %v2705_v5, %v2723_v16  ;;  %v2697_v19 = vpop.permute.xlu1 %2696  ;;  %3567 = vmatpush2.bf16.msra.mxu0 %v3972_v52 }
 0x25f   : > { %v2710_v37 = vrot.slane %v2697_v19, 4  ;;  %v3970_v47 = vcombine.high %v2722_v13, %v2724_v42  ;;  %v3969_v39 = vcombine.low %v2722_v13, %v2724_v42  ;;  %3707 = vmatmul.mubr.bf16.gmra.mxu1 %v4190_v41 }
 0x260   : > { %3714 = vmatprep.mubr.bf16.mxu1 %v4191_v34 }
 0x261   : > { %v2719_v23 = vsel %vm2436_vm0, %v2710_v37, %v2711_v43  ;;  %3568 = vmatprep.subr.bf16.mxu0 %v3970_v47 }
 0x262   : > { %v2720_v40 = vsel %vm2717_vm7, %v2697_v19, %v2719_v23  ;;  %3569 = vmatpush2.bf16.msra.mxu0 %v3969_v39 }
 0x263   : > { %v3967_v2 = vcombine.high %v2718_v15, %v2720_v40  ;;  %v3966_v50 = vcombine.low %v2718_v15, %v2720_v40 }
 0x265   : > { %3570 = vmatprep.subr.bf16.mxu0 %v3967_v2 }
 0x266   : > { %3571 = vmatpush2.bf16.msra.mxu0 %v3966_v50 }
 0x267   : > { %3715 = vmatmul.mubr.bf16.gmra.mxu1 %v4193_v20 }
 0x268   : > { %4119 = vmatprep.mubr.msk.bf16.mxu1 %vm4225_vm10, %v5308_v57 }
 0x269   : > { %3573 = vmatmul.mubr.bf16.vlgmr.msra.gmra.mxu0 %v4183_v62 }
 0x26a   : > { %3582 = vmatprep.mubr.bf16.mxu0 %v4188_v59 }
 0x26f   : > { %4120 = vmatmul.mubr.msk.bf16.vlgmr.msra.gmra.mxu1 %vm3530_vm5, %v5605_v33 }
 0x270   : > { %4123 = vmatprep.mubr.msk.bf16.mxu1 %vm4225_vm10, %v5308_v57 }
 0x271   : > { %3583 = vmatmul.mubr.bf16.gmra.mxu0 %v4190_v41 }
 0x272   : > { %3592 = vmatprep.mubr.bf16.mxu0 %v4191_v34 }
 0x277   : > { %4124 = vmatmul.mubr.msk.bf16.gmra.mxu1 %vm3530_vm5, %v5623_v32 }
 0x278   : > { %4127 = vmatprep.mubr.msk.bf16.mxu1 %vm4225_vm10, %v5308_v57 }
 0x279   : > { %3593 = vmatmul.mubr.bf16.gmra.mxu0 %v4193_v20 }
 0x27f   : > { %4128 = vmatmul.mubr.msk.bf16.gmra.mxu1 %vm3530_vm5, %v5643_v0 }
 0x2c9   : > { %v3637_v30 = vpop.f32.mrf.mxu1 }
 0x2cb   : > { %v3639_v36 = vpop.f32.mrf.mxu1 }
 0x2cd   : > { %v3641_v44 = vpop.f32.mrf.mxu1 }
 0x2cf   : > { %v3643_v56 = vpop.f32.mrf.mxu1 }
 0x2d1   : > { %v3647_v46 = vpop.f32.mrf.mxu1 }
 0x2d3   : > { %v3649_v33 = vpop.f32.mrf.mxu1 }
 0x2d5   : > { %v3651_v49 = vpop.f32.mrf.mxu1 }
 0x2d7   : > { %v3653_v51 = vpop.f32.mrf.mxu1 }
 0x2d9   : > { %v3657_v18 = vpop.f32.mrf.mxu1 }
 0x2db   : > { %v5794_v54 = vpop.f32.mrf.mxu1 }
 0x2dd   : > { %v5796_v6 = vpop.f32.mrf.mxu1 }
 0x2df   : > { %v5798_v32 = vpop.f32.mrf.mxu1 }
 0x317   : > { %v4092_v57 = vpop.f32.mrf.mxu1 }
 0x319   : > { %v4093_v12 = vpop.f32.mrf.mxu1 }
 0x31a   : > { %v4094_v61 = vadd.f32 %v4093_v12, %v4092_v57 }
 0x31b   : > { %v4095_v53 = vpop.f32.mrf.mxu1 }
 0x31d   : > { %v4096_v0 = vpop.f32.mrf.mxu1 }
 0x31e   : > { %v4097_v17 = vadd.f32 %v4096_v0, %v4095_v53 }
 0x31f   : > { %v4098_v35 = vpop.f32.mrf.mxu1 }
 0x321   : > { %v4099_v21 = vpop.f32.mrf.mxu1 }
 0x322   : > { %v4100_v29 = vadd.f32 %v4099_v21, %v4098_v35 }
 0x323   : > { %v4101_v1 = vpop.f32.mrf.mxu1 }
 0x325   : > { %v4102_v7 = vpop.f32.mrf.mxu1 }
 0x326   : > { %v4103_v42 = vadd.f32 %v4102_v7, %v4101_v1 }
 0x327   : > { %v4104_v14 = vpop.f32.mrf.mxu1 }
 0x329   : > { %v4105_v45 = vpop.f32.mrf.mxu1  ;;  %v3574_v11 = vpop.f32.mrf.mxu0 }
 0x32a   : > { %v3638_v13 = vadd.f32 %v3637_v30, %v3574_v11  ;;  %v4106_v2 = vadd.f32 %v4105_v45, %v4104_v14 }
 0x32b   : > { %v4107_v48 = vpop.f32.mrf.mxu1  ;;  %v3576_v63 = vpop.f32.mrf.mxu0 }
 0x32c   : > { %3780 = vst [vmem:[%s5804_s28] sm:$0xff] %v3638_v13  ;;  %v3640_v60 = vadd.f32 %v3639_v36, %v3576_v63 }
 0x32d   : > { %v4108_v55 = vpop.f32.mrf.mxu1  ;;  %v3578_v58 = vpop.f32.mrf.mxu0 }
 0x32e   : > { %3781 = vst [vmem:[%s5804_s28 + $0x8] sm:$0xff] %v3640_v60  ;;  %v3642_v62 = vadd.f32 %v3641_v44, %v3578_v58 }
 0x32f   : > { %v3757_v4 = vpop.f32.mrf.mxu1  ;;  %v3580_v3 = vpop.f32.mrf.mxu0 }
 0x330   : > { %v3758_v59 = vadd.f32 %v4094_v61, %v3757_v4  ;;  %3784 = vst [vmem:[%s5804_s28 + $0x18] sm:$0xff] %v3642_v62  ;;  %v3644_v9 = vadd.f32 %v3643_v56, %v3580_v3 }
 0x331   : > { %v4121_v10 = vpop.f32.mrf.mxu1  ;;  %v3584_v15 = vpop.f32.mrf.mxu0 }
 0x332   : > { %3783 = vst.msk [vmem:[%s5804_s28 + $0x10] sm:$0xff] %vm3782_vm8, %v3758_v59  ;;  %3785 = vst [vmem:[%s5804_s28 + $0x20] sm:$0xff] %v3644_v9  ;;  %v3648_v28 = vadd.f32 %v3647_v46, %v3584_v15  ;;  %v4109_v46 = vadd.f32 %v4108_v55, %v4107_v48 }
 0x333   : > { %v3760_v22 = vpop.f32.mrf.mxu1  ;;  %v3586_v24 = vpop.f32.mrf.mxu0 }
 0x334   : > { %v3761_v25 = vadd.f32 %v4097_v17, %v3760_v22  ;;  %3787 = vst [vmem:[%s5804_s28 + $0x30] sm:$0xff] %v3648_v28  ;;  %v3650_v26 = vadd.f32 %v3649_v33, %v3586_v24 }
 0x335   : > { %v4122_v27 = vpop.f32.mrf.mxu1  ;;  %v3588_v5 = vpop.f32.mrf.mxu0 }
 0x336   : > { %3786 = vst.msk [vmem:[%s5804_s28 + $0x28] sm:$0xff] %vm3782_vm8, %v3761_v25  ;;  %3788 = vst [vmem:[%s5804_s28 + $0x38] sm:$0xff] %v3650_v26  ;;  %v3652_v8 = vadd.f32 %v3651_v49, %v3588_v5 }
 0x337   : > { %v3765_v31 = vpop.f32.mrf.mxu1  ;;  %v3590_v38 = vpop.f32.mrf.mxu0 }
 0x338   : > { %v3766_v52 = vadd.f32 %v4100_v29, %v3765_v31  ;;  %3790 = vst [vmem:[%s5804_s28 + $0x48] sm:$0xff] %v3652_v8  ;;  %v3654_v41 = vadd.f32 %v3653_v51, %v3590_v38 }
 0x339   : > { %v4125_v16 = vpop.f32.mrf.mxu1  ;;  %v3594_v34 = vpop.f32.mrf.mxu0 }
 0x33a   : > { %3789 = vst.msk [vmem:[%s5804_s28 + $0x40] sm:$0xff] %vm3782_vm8, %v3766_v52  ;;  %3791 = vst [vmem:[%s5804_s28 + $0x50] sm:$0xff] %v3654_v41  ;;  %v3658_v19 = vadd.f32 %v3657_v18, %v3594_v34 }
 0x33b   : > { %v3768_v43 = vpop.f32.mrf.mxu1  ;;  %v3596_v37 = vpop.f32.mrf.mxu0 }
 0x33c   : > { %v3769_v47 = vadd.f32 %v4103_v42, %v3768_v43  ;;  %3793 = vst [vmem:[%s5804_s28 + $0x60] sm:$0xff] %v3658_v19  ;;  %v3660_v39 = vadd.f32 %v5794_v54, %v3596_v37 }
 0x33d   : > { %v4126_v23 = vpop.f32.mrf.mxu1  ;;  %v3598_v40 = vpop.f32.mrf.mxu0 }
 0x33e   : > { %3792 = vst.msk [vmem:[%s5804_s28 + $0x58] sm:$0xff] %vm3782_vm8, %v3769_v47  ;;  %3794 = vst [vmem:[%s5804_s28 + $0x68] sm:$0xff] %v3660_v39  ;;  %v3662_v50 = vadd.f32 %v5796_v6, %v3598_v40 }
 0x33f   : > { %v3773_v20 = vpop.f32.mrf.mxu1  ;;  %v3600_v30 = vpop.f32.mrf.mxu0 }
 0x340   : > { %v3774_v36 = vadd.f32 %v4106_v2, %v3773_v20  ;;  %3796 = vst [vmem:[%s5804_s28 + $0x78] sm:$0xff] %v3662_v50  ;;  %v3664_v44 = vadd.f32 %v5798_v32, %v3600_v30 }
 0x341   : > { %v4129_v56 = vpop.f32.mrf.mxu1 }
 0x342   : > { %3795 = vst.msk [vmem:[%s5804_s28 + $0x70] sm:$0xff] %vm3782_vm8, %v3774_v36  ;;  %3797 = vst [vmem:[%s5804_s28 + $0x80] sm:$0xff] %v3664_v44 }
 0x343   : > { %v3776_v33 = vpop.f32.mrf.mxu1 }
 0x344   : > { %v3777_v49 = vadd.f32 %v4109_v46, %v3776_v33 }
 0x345   : > { %v4130_v51 = vpop.f32.mrf.mxu1 }
 0x346   : > { %3798 = vst.msk [vmem:[%s5804_s28 + $0x88] sm:$0xff] %vm3782_vm8, %v3777_v49 }
 0x347 PF: > { %s12_s9 = sadd.s32 1, %s4203_s9  }
 0x348   : > { %p9_p4 = scmp.ge.s32.totalorder %s12_s9, 4  }
 0x34a   :  { %11 = sbr.rel (!%p9_p4) target bundleno = 1 (0x1), region = 58 }

</bundles_post_ra>
